<compile_context>
chip_gen: v6e
topology: v6e:2x2x1
jax: 0.10.0
libtpu: 0.0.40
codegen_flags: <defaults>
</compile_context>

<pallas_src>
import functools
import math

import jax
import jax.numpy as jnp
from jax import lax
from jax.experimental import pallas as pl
from jax.experimental.pallas import tpu as pltpu


# ----------------------------- config ---------------------------------------
CFG = dict(
    vocab_size=128,
    context_length=16,
    emb_dim=32,
    n_heads=4,
    n_layers=2,
    drop_rate=0.0,   # dropout is identity in this forward pass
    qkv_bias=False,
)
EPS = 1e-5

# Matmul operand dtype. f32 here (E=32, negligible MXU cost, keeps the 2e-3
# tolerance vs the f32 reference); set to jnp.bfloat16 on v6e/v7x when scaling.
MATMUL_DTYPE = jnp.float32


# --------------------------- kernel helpers ---------------------------------
def _layernorm(v, scale, shift):
    # v: (..., E); scale/shift: (1, E). Biased variance, matches PyTorch.
    mean = jnp.mean(v, axis=-1, keepdims=True)
    var = jnp.mean((v - mean) ** 2, axis=-1, keepdims=True)
    return scale * ((v - mean) * lax.rsqrt(var + EPS)) + shift


def _gelu(x):
    c = math.sqrt(2.0 / math.pi)
    return 0.5 * x * (1.0 + jnp.tanh(c * (x + 0.044715 * x * x * x)))


def _mm(a, b):
    return jnp.dot(a.astype(MATMUL_DTYPE), b.astype(MATMUL_DTYPE),
                   preferred_element_type=jnp.float32)


# ------------------------ fused GPT forward kernel ---------------------------
def gpt_kernel(x_ref, wbig_ref, w2_ref, vecs_ref, b1_ref, wout_ref, o_ref, *,
               batch, seq, num_heads):
    """Whole batch, every layer, final LN + LM head in one grid step.

    x_ref    : (B*T, E)     token+position embeddings, batch folded into rows
    wbig_ref : (L, E, 8E)   per layer [Wq | Wk | Wv | Wo | W1]  (all (in, out))
    w2_ref   : (L, 4E, E)   per layer W2
    vecs_ref : (L+1, 8, E)  rows [ln1s, ln1b, bo, ln2s, ln2b, b2, 0, 0];
                            slot L holds [fin_scale, fin_shift, 0, ...]
    b1_ref   : (L, 1, 4E)   per layer FFN bias 1
    wout_ref : (E, V)       LM head
    o_ref    : (B*T, V)     logits (lane-dense)
    """
    B, T, H = batch, seq, num_heads
    x = x_ref[...]                                   # (BT, E)
    BT, E = x.shape
    hd = E // H
    L = wbig_ref.shape[0]
    inv_sqrt_hd = jnp.float32(1.0 / math.sqrt(hd))

    # Single boolean causal mask shared by every layer/head: (1, T, T)
    row = lax.broadcasted_iota(jnp.int32, (T, T), 0)
    col = lax.broadcasted_iota(jnp.int32, (T, T), 1)
    causal = (col > row)[None]                       # True above the diagonal

    def split_heads(t):                              # (BT, E) -> (B*H, T, hd)
        return t.reshape(B, T, H, hd).transpose(0, 2, 1, 3).reshape(B * H, T, hd)

    for l in range(L):
        wblob = wbig_ref[l]                          # (E, 8E)
        w_qkv = wblob[:, :3 * E]                     # (E, 3E)
        w_o = wblob[:, 3 * E:4 * E]                  # (E, E)
        w_1 = wblob[:, 4 * E:]                       # (E, 4E)
        w_2 = w2_ref[l]                              # (4E, E)
        vec = vecs_ref[l]                            # (8, E)
        ln1s, ln1b, b_o = vec[0:1], vec[1:2], vec[2:3]
        ln2s, ln2b, b_2 = vec[3:4], vec[4:5], vec[5:6]
        b_1 = b1_ref[l]                              # (1, 4E)

        # ---- attention branch ----
        h = _layernorm(x, ln1s, ln1b)                # (BT, E)
        qkv = _mm(h, w_qkv)                          # (BT, 3E): one fused matmul

        q = split_heads(qkv[:, :E]) * inv_sqrt_hd    # (BH, T, hd)
        k = split_heads(qkv[:, E:2 * E])
        v = split_heads(qkv[:, 2 * E:])

        s = jnp.einsum('hqd,hkd->hqk',
                       q.astype(MATMUL_DTYPE), k.astype(MATMUL_DTYPE),
                       preferred_element_type=jnp.float32)       # (BH, T, T)
        m = jnp.max(s, axis=-1, keepdims=True)
        p = jnp.where(causal, 0.0, jnp.exp(s - m))               # masked probs
        w = p * pl.reciprocal(jnp.sum(p, axis=-1, keepdims=True), approx=False)
        ctx = jnp.einsum('hqk,hkd->hqd',
                         w.astype(MATMUL_DTYPE), v.astype(MATMUL_DTYPE),
                         preferred_element_type=jnp.float32)     # (BH, T, hd)

        # (BH, T, hd) -> (BT, E): concat heads, then ONE (BT,E)@(E,E) out-proj
        ctx = ctx.reshape(B, H, T, hd).transpose(0, 2, 1, 3).reshape(BT, E)
        x = x + (_mm(ctx, w_o) + b_o)                # residual 1

        # ---- feed-forward branch ----
        h2 = _layernorm(x, ln2s, ln2b)
        f = _gelu(_mm(h2, w_1) + b_1)
        x = x + (_mm(f, w_2) + b_2)                  # residual 2

    # ---- final LayerNorm + LM head ----
    fin = vecs_ref[L]                                # (8, E)
    hf = _layernorm(x, fin[0:1], fin[1:2])
    o_ref[...] = _mm(hf, wout_ref[...])              # (BT, V)


# ----------------------------- wrappers --------------------------------------
def prepare_params(params, cfg):
    """One-time weight packing / layout (hoisted out of the forward path)."""
    E = cfg["emb_dim"]
    w_big, w2_all, b1_all, vec_rows = [], [], [], []
    for p in params["blocks"]:
        w_big.append(jnp.concatenate(
            [p["wq"], p["wk"], p["wv"], p["wo"], p["w1"]], axis=1))   # (E, 8E)
        w2_all.append(p["w2"])                                        # (4E, E)
        b1_all.append(p["b1"])                                        # (1, 4E)
        vec_rows.append(jnp.concatenate(
            [p["ln1_scale"], p["ln1_shift"], p["bo"],
             p["ln2_scale"], p["ln2_shift"], p["b2"],
             jnp.zeros((2, E), jnp.float32)], axis=0))                # (8, E)
    vec_rows.append(jnp.concatenate(
        [params["fin_scale"], params["fin_shift"],
         jnp.zeros((6, E), jnp.float32)], axis=0))                    # (8, E)
    return dict(
        tok_emb=params["tok_emb"],
        pos_emb=params["pos_emb"],
        w_big=jnp.stack(w_big),          # (L, E, 8E)
        w2_all=jnp.stack(w2_all),        # (L, 4E, E)
        b1_all=jnp.stack(b1_all),        # (L, 1, 4E)
        vecs=jnp.stack(vec_rows),        # (L+1, 8, E)
        w_out=params["w_out"],           # (E, V)
    )


def _const_spec(arr):
    """Full-array block whose index never changes -> DMA'd into VMEM once."""
    zeros = (0,) * arr.ndim
    return pl.BlockSpec(arr.shape, lambda i, _z=zeros: _z)


def _cost_estimate(B, T, E, H, V, L):
    hd = E // H
    M = B * T
    per_layer = (2 * M * E * 3 * E          # fused QKV projection
                 + 4 * B * H * T * T * hd   # scores + PV
                 + 2 * M * E * E            # output projection
                 + 4 * M * E * 4 * E)       # two FFN matmuls
    flops = L * per_layer + 2 * M * E * V
    transcendentals = L * (B * H * T * T + M * 4 * E) + (2 * L + 1) * M
    w_bytes = 4 * (L * (8 * E * E + 4 * E * E + 4 * E + 8 * E) + 8 * E + E * V)
    bytes_accessed = 4 * (M * E + M * V) + w_bytes
    return pl.CostEstimate(flops=int(flops),
                           transcendentals=int(transcendentals),
                           bytes_accessed=int(bytes_accessed))


def gpt_forward(in_idx, packed, cfg):
    """in_idx: (B, T) int32 token ids. Returns logits (B, T, vocab_size)."""
    B, T = in_idx.shape
    E, H, V = cfg["emb_dim"], cfg["n_heads"], cfg["vocab_size"]
    L = packed["w_big"].shape[0]

    # Token/position embedding lookup: plain-JAX glue (gather).
    # TODO(synk): embedding gather kept outside the kernel (jnp.take); a DMA
    # gather kernel is overkill at this size.
    x = jnp.take(packed["tok_emb"], in_idx, axis=0) + packed["pos_emb"][:T][None]
    x2 = x.reshape(B * T, E)                         # batch folded into rows

    operands = (x2, packed["w_big"], packed["w2_all"], packed["vecs"],
                packed["b1_all"], packed["w_out"])

    kern = functools.partial(gpt_kernel, batch=B, seq=T, num_heads=H)
    logits = pl.pallas_call(
        kern,
        out_shape=jax.ShapeDtypeStruct((B * T, V), jnp.float32),
        grid=(1,),   # single step: whole batch in one block (v5e/v6e: 1 TC)
        in_specs=[_const_spec(a) for a in operands],
        out_specs=pl.BlockSpec((B * T, V), lambda i: (0, 0)),
        compiler_params=pltpu.CompilerParams(dimension_semantics=("arbitrary",)),
        cost_estimate=_cost_estimate(B, T, E, H, V, L),
    )(*operands)
    return logits.reshape(B, T, V)


# ------------------------ deterministic parameter init -----------------------
def init_params(cfg, key):
    E, V, C, L = cfg["emb_dim"], cfg["vocab_size"], cfg["context_length"], cfg["n_layers"]

    def nrm(k, shape):
        return (0.02 * jax.random.normal(k, shape)).astype(jnp.float32)

    keys = iter(jax.random.split(key, 4 + 8 * L))
    params = dict(
        tok_emb=nrm(next(keys), (V, E)),
        pos_emb=nrm(next(keys), (C, E)),
        fin_scale=jnp.ones((1, E), jnp.float32),
        fin_shift=jnp.zeros((1, E), jnp.float32),
        w_out=nrm(next(keys), (E, V)),          # out_head weight, stored (in, out)
        blocks=[],
    )
    for _ in range(L):
        params["blocks"].append(dict(
            ln1_scale=jnp.ones((1, E), jnp.float32),
            ln1_shift=jnp.zeros((1, E), jnp.float32),
            wq=nrm(next(keys), (E, E)),
            wk=nrm(next(keys), (E, E)),
            wv=nrm(next(keys), (E, E)),
            wo=nrm(next(keys), (E, E)),
            bo=jnp.zeros((1, E), jnp.float32),
            ln2_scale=jnp.ones((1, E), jnp.float32),
            ln2_shift=jnp.zeros((1, E), jnp.float32),
            w1=nrm(next(keys), (E, 4 * E)),
            b1=jnp.zeros((1, 4 * E), jnp.float32),
            w2=nrm(next(keys), (4 * E, E)),
            b2=jnp.zeros((1, E), jnp.float32),
        ))
    return params


# ----------------------------- pure-JAX reference ----------------------------
def ref_forward(in_idx, params, cfg):
    B, T = in_idx.shape
    H = cfg["n_heads"]
    x = jnp.take(params["tok_emb"], in_idx, axis=0) + params["pos_emb"][:T][None]
    for p in params["blocks"]:
        h = _layernorm(x, p["ln1_scale"], p["ln1_shift"])
        q, k, v = h @ p["wq"], h @ p["wk"], h @ p["wv"]
        E = q.shape[-1]
        hd = E // H

        def split(t):
            return t.reshape(B, T, H, hd).transpose(0, 2, 1, 3)

        qh, kh, vh = split(q), split(k), split(v)
        scores = jnp.einsum("bhqd,bhkd->bhqk", qh, kh)
        mask = jnp.triu(jnp.ones((T, T), bool), k=1)
        scores = jnp.where(mask, -jnp.inf, scores)
        w = jax.nn.softmax(scores / math.sqrt(hd), axis=-1)
        ctx = jnp.einsum("bhqk,bhkd->bhqd", w, vh).transpose(0, 2, 1, 3).reshape(B, T, E)
        x = x + (ctx @ p["wo"] + p["bo"])
        h2 = _layernorm(x, p["ln2_scale"], p["ln2_shift"])
        x = x + (_gelu(h2 @ p["w1"] + p["b1"]) @ p["w2"] + p["b2"])
    x = _layernorm(x, params["fin_scale"], params["fin_shift"])
    return x @ params["w_out"]


# --------------------------------- main --------------------------------------
if __name__ == "__main__":
    key = jax.random.PRNGKey(0)
    pkey, ikey = jax.random.split(key)
    params = init_params(CFG, pkey)
    packed = prepare_params(params, CFG)     # one-time weight layout / packing

    B, T = 2, 8
    in_idx = jax.random.randint(ikey, (B, T), 0, CFG["vocab_size"], dtype=jnp.int32)

    logits = gpt_forward(in_idx, packed, CFG)
    logits = jax.block_until_ready(logits)

    expected = ref_forward(in_idx, params, CFG)
    assert logits.shape == (B, T, CFG["vocab_size"])
    assert jnp.allclose(logits, expected, rtol=2e-3, atol=2e-3), "mismatch vs reference"

    print("KERNEL_OK")
</pallas_src>

<mosaic_0001>
module attributes {stable_mosaic.version = 11 : i64} {
  func.func @gpt_kernel(%arg0: i32, %arg1: memref<16x32xf32, #tpu.memory_space<vmem>>, %arg2: memref<2x32x256xf32, #tpu.memory_space<vmem>>, %arg3: memref<2x128x32xf32, #tpu.memory_space<vmem>>, %arg4: memref<3x8x32xf32, #tpu.memory_space<vmem>>, %arg5: memref<2x1x128xf32, #tpu.memory_space<vmem>>, %arg6: memref<32x128xf32, #tpu.memory_space<vmem>>, %arg7: memref<16x128xf32, #tpu.memory_space<vmem>>) attributes {dimension_semantics = [#tpu.dimension_semantics<arbitrary>], iteration_bounds = array<i64: 1>, scalar_prefetch = 0 : i64, scratch_operands = 0 : i64, tpu.core_type = #tpu.core_type<tc>, window_params = [{pipeline_mode = #tpu.pipeline_mode<synchronous>, transform_indices = @transform_0, window_bounds = array<i64: 16, 32>}, {pipeline_mode = #tpu.pipeline_mode<synchronous>, transform_indices = @transform_1, window_bounds = array<i64: 2, 32, 256>}, {pipeline_mode = #tpu.pipeline_mode<synchronous>, transform_indices = @transform_2, window_bounds = array<i64: 2, 128, 32>}, {pipeline_mode = #tpu.pipeline_mode<synchronous>, transform_indices = @transform_3, window_bounds = array<i64: 3, 8, 32>}, {pipeline_mode = #tpu.pipeline_mode<synchronous>, transform_indices = @transform_4, window_bounds = array<i64: 2, 1, 128>}, {pipeline_mode = #tpu.pipeline_mode<synchronous>, transform_indices = @transform_5, window_bounds = array<i64: 32, 128>}, {pipeline_mode = #tpu.pipeline_mode<synchronous>, transform_indices = @transform_6, window_bounds = array<i64: 16, 128>}]} {
    %c0 = arith.constant 0 : index
    %c0_0 = arith.constant 0 : index
    %0 = vector.load %arg1[%c0, %c0_0] : memref<16x32xf32, #tpu.memory_space<vmem>>, vector<16x32xf32>
    %1 = tpu.iota {dimensions = array<i32: 0>} : vector<8x8xi32>
    %2 = tpu.iota {dimensions = array<i32: 1>} : vector<8x8xi32>
    %3 = arith.cmpi sgt, %2, %1 : vector<8x8xi32>
    %4 = vector.shape_cast %3 : vector<8x8xi1> to vector<1x8x8xi1>
    %c0_1 = arith.constant 0 : index
    %c0_2 = arith.constant 0 : index
    %c0_3 = arith.constant 0 : index
    %5 = vector.load %arg2[%c0_1, %c0_2, %c0_3] : memref<2x32x256xf32, #tpu.memory_space<vmem>>, vector<1x32x256xf32>
    %6 = vector.shape_cast %5 : vector<1x32x256xf32> to vector<32x256xf32>
    %7 = vector.extract_strided_slice %6 {offsets = [0, 0], sizes = [32, 96], strides = [1, 1]} : vector<32x256xf32> to vector<32x96xf32>
    %8 = vector.extract_strided_slice %6 {offsets = [0, 96], sizes = [32, 32], strides = [1, 1]} : vector<32x256xf32> to vector<32x32xf32>
    %9 = vector.extract_strided_slice %6 {offsets = [0, 128], sizes = [32, 128], strides = [1, 1]} : vector<32x256xf32> to vector<32x128xf32>
    %c0_4 = arith.constant 0 : index
    %c0_5 = arith.constant 0 : index
    %c0_6 = arith.constant 0 : index
    %10 = vector.load %arg3[%c0_4, %c0_5, %c0_6] : memref<2x128x32xf32, #tpu.memory_space<vmem>>, vector<1x128x32xf32>
    %11 = vector.shape_cast %10 : vector<1x128x32xf32> to vector<128x32xf32>
    %c0_7 = arith.constant 0 : index
    %c0_8 = arith.constant 0 : index
    %c0_9 = arith.constant 0 : index
    %12 = vector.load %arg4[%c0_7, %c0_8, %c0_9] : memref<3x8x32xf32, #tpu.memory_space<vmem>>, vector<1x8x32xf32>
    %13 = vector.shape_cast %12 : vector<1x8x32xf32> to vector<8x32xf32>
    %14 = vector.extract_strided_slice %13 {offsets = [0, 0], sizes = [1, 32], strides = [1, 1]} : vector<8x32xf32> to vector<1x32xf32>
    %15 = vector.extract_strided_slice %13 {offsets = [1, 0], sizes = [1, 32], strides = [1, 1]} : vector<8x32xf32> to vector<1x32xf32>
    %16 = vector.extract_strided_slice %13 {offsets = [2, 0], sizes = [1, 32], strides = [1, 1]} : vector<8x32xf32> to vector<1x32xf32>
    %17 = vector.extract_strided_slice %13 {offsets = [3, 0], sizes = [1, 32], strides = [1, 1]} : vector<8x32xf32> to vector<1x32xf32>
    %18 = vector.extract_strided_slice %13 {offsets = [4, 0], sizes = [1, 32], strides = [1, 1]} : vector<8x32xf32> to vector<1x32xf32>
    %19 = vector.extract_strided_slice %13 {offsets = [5, 0], sizes = [1, 32], strides = [1, 1]} : vector<8x32xf32> to vector<1x32xf32>
    %c0_10 = arith.constant 0 : index
    %c0_11 = arith.constant 0 : index
    %c0_12 = arith.constant 0 : index
    %20 = vector.load %arg5[%c0_10, %c0_11, %c0_12] : memref<2x1x128xf32, #tpu.memory_space<vmem>>, vector<1x1x128xf32>
    %21 = vector.shape_cast %20 : vector<1x1x128xf32> to vector<1x128xf32>
    %cst = arith.constant dense<0.000000e+00> : vector<16xf32>
    %22 = vector.multi_reduction <add>, %0, %cst [1] : vector<16x32xf32> to vector<16xf32>
    %23 = vector.shape_cast %22 : vector<16xf32> to vector<16x1xf32>
    %cst_13 = arith.constant 3.200000e+01 : f32
    %24 = vector.broadcast %cst_13 : f32 to vector<16x1xf32>
    %25 = arith.divf %23, %24 : vector<16x1xf32>
    %26 = vector.broadcast %25 : vector<16x1xf32> to vector<16x32xf32>
    %27 = arith.subf %0, %26 : vector<16x32xf32>
    %28 = arith.mulf %27, %27 : vector<16x32xf32>
    %cst_14 = arith.constant dense<0.000000e+00> : vector<16xf32>
    %29 = vector.multi_reduction <add>, %28, %cst_14 [1] : vector<16x32xf32> to vector<16xf32>
    %30 = vector.shape_cast %29 : vector<16xf32> to vector<16x1xf32>
    %cst_15 = arith.constant 3.200000e+01 : f32
    %31 = vector.broadcast %cst_15 : f32 to vector<16x1xf32>
    %32 = arith.divf %30, %31 : vector<16x1xf32>
    %33 = vector.broadcast %25 : vector<16x1xf32> to vector<16x32xf32>
    %34 = arith.subf %0, %33 : vector<16x32xf32>
    %cst_16 = arith.constant 9.99999974E-6 : f32
    %35 = vector.broadcast %cst_16 : f32 to vector<16x1xf32>
    %36 = arith.addf %32, %35 : vector<16x1xf32>
    %37 = math.rsqrt %36 : vector<16x1xf32>
    %38 = vector.broadcast %37 : vector<16x1xf32> to vector<16x32xf32>
    %39 = arith.mulf %34, %38 : vector<16x32xf32>
    %40 = vector.broadcast %14 : vector<1x32xf32> to vector<16x32xf32>
    %41 = arith.mulf %40, %39 : vector<16x32xf32>
    %42 = vector.broadcast %15 : vector<1x32xf32> to vector<16x32xf32>
    %43 = arith.addf %41, %42 : vector<16x32xf32>
    %cst_17 = arith.constant dense<0.000000e+00> : vector<16x96xf32>
    %44 = tpu.matmul %43, %7, %cst_17 {dimension_numbers = #tpu.dot_dimension_numbers<[1], [0], [0], [1], [0, 0, 1, 1], [], []>} : vector<16x32xf32>, vector<32x96xf32>, vector<16x96xf32> -> vector<16x96xf32>
    %45 = vector.extract_strided_slice %44 {offsets = [0, 0], sizes = [16, 32], strides = [1, 1]} : vector<16x96xf32> to vector<16x32xf32>
    %46 = vector.shape_cast %45 : vector<16x32xf32> to vector<2x8x4x8xf32>
    %47 = tpu.transpose %46, [0, 2, 1, 3] : vector<2x8x4x8xf32> -> vector<2x4x8x8xf32>
    %48 = vector.shape_cast %47 : vector<2x4x8x8xf32> to vector<8x8x8xf32>
    %cst_18 = arith.constant 0.353553385 : f32
    %49 = vector.broadcast %cst_18 : f32 to vector<8x8x8xf32>
    %50 = arith.mulf %48, %49 : vector<8x8x8xf32>
    %51 = vector.extract_strided_slice %44 {offsets = [0, 32], sizes = [16, 32], strides = [1, 1]} : vector<16x96xf32> to vector<16x32xf32>
    %52 = vector.shape_cast %51 : vector<16x32xf32> to vector<2x8x4x8xf32>
    %53 = tpu.transpose %52, [0, 2, 1, 3] : vector<2x8x4x8xf32> -> vector<2x4x8x8xf32>
    %54 = vector.shape_cast %53 : vector<2x4x8x8xf32> to vector<8x8x8xf32>
    %55 = vector.extract_strided_slice %44 {offsets = [0, 64], sizes = [16, 32], strides = [1, 1]} : vector<16x96xf32> to vector<16x32xf32>
    %56 = vector.shape_cast %55 : vector<16x32xf32> to vector<2x8x4x8xf32>
    %57 = tpu.transpose %56, [0, 2, 1, 3] : vector<2x8x4x8xf32> -> vector<2x4x8x8xf32>
    %58 = vector.shape_cast %57 : vector<2x4x8x8xf32> to vector<8x8x8xf32>
    "tpu.trace_start"() <{level = 10 : i32, message = "hqd,hkd->hqk"}> : () -> ()
    %cst_19 = arith.constant dense<0.000000e+00> : vector<8x8x8xf32>
    %59 = tpu.matmul %50, %54, %cst_19 {dimension_numbers = #tpu.dot_dimension_numbers<[2], [2], [1], [1], [0, 0, 0, 1, 1, 1], [0], [0]>} : vector<8x8x8xf32>, vector<8x8x8xf32>, vector<8x8x8xf32> -> vector<8x8x8xf32>
    "tpu.trace_stop"() : () -> ()
    %cst_20 = arith.constant dense<0xFF800000> : vector<8x8xf32>
    %60 = vector.multi_reduction <maximumf>, %59, %cst_20 [2] : vector<8x8x8xf32> to vector<8x8xf32>
    %61 = vector.shape_cast %60 : vector<8x8xf32> to vector<8x8x1xf32>
    %62 = vector.broadcast %61 : vector<8x8x1xf32> to vector<8x8x8xf32>
    %63 = arith.subf %59, %62 : vector<8x8x8xf32>
    %64 = math.exp %63 : vector<8x8x8xf32>
    %cst_21 = arith.constant 0.000000e+00 : f32
    %65 = vector.shape_cast %4 : vector<1x8x8xi1> to vector<1x8x8xi1>
    %66 = vector.broadcast %65 : vector<1x8x8xi1> to vector<8x8x8xi1>
    %67 = vector.broadcast %cst_21 : f32 to vector<8x8x8xf32>
    %68 = arith.select %66, %67, %64 : vector<8x8x8xi1>, vector<8x8x8xf32>
    %cst_22 = arith.constant dense<0.000000e+00> : vector<8x8xf32>
    %69 = vector.multi_reduction <add>, %68, %cst_22 [2] : vector<8x8x8xf32> to vector<8x8xf32>
    %70 = vector.shape_cast %69 : vector<8x8xf32> to vector<8x8x1xf32>
    %71 = tpu.reciprocal %70 : vector<8x8x1xf32> -> vector<8x8x1xf32>
    %72 = vector.broadcast %71 : vector<8x8x1xf32> to vector<8x8x8xf32>
    %73 = arith.mulf %68, %72 : vector<8x8x8xf32>
    "tpu.trace_start"() <{level = 10 : i32, message = "hqk,hkd->hqd"}> : () -> ()
    %cst_23 = arith.constant dense<0.000000e+00> : vector<8x8x8xf32>
    %74 = tpu.matmul %73, %58, %cst_23 {dimension_numbers = #tpu.dot_dimension_numbers<[2], [1], [1], [2], [0, 0, 0, 1, 1, 2], [0], [0]>} : vector<8x8x8xf32>, vector<8x8x8xf32>, vector<8x8x8xf32> -> vector<8x8x8xf32>
    "tpu.trace_stop"() : () -> ()
    %75 = vector.shape_cast %74 : vector<8x8x8xf32> to vector<2x4x8x8xf32>
    %76 = tpu.transpose %75, [0, 2, 1, 3] : vector<2x4x8x8xf32> -> vector<2x8x4x8xf32>
    %77 = vector.shape_cast %76 : vector<2x8x4x8xf32> to vector<16x32xf32>
    %cst_24 = arith.constant dense<0.000000e+00> : vector<16x32xf32>
    %78 = tpu.matmul %77, %8, %cst_24 {dimension_numbers = #tpu.dot_dimension_numbers<[1], [0], [0], [1], [0, 0, 1, 1], [], []>} : vector<16x32xf32>, vector<32x32xf32>, vector<16x32xf32> -> vector<16x32xf32>
    %79 = vector.broadcast %16 : vector<1x32xf32> to vector<16x32xf32>
    %80 = arith.addf %78, %79 : vector<16x32xf32>
    %81 = arith.addf %0, %80 : vector<16x32xf32>
    %cst_25 = arith.constant dense<0.000000e+00> : vector<16xf32>
    %82 = vector.multi_reduction <add>, %81, %cst_25 [1] : vector<16x32xf32> to vector<16xf32>
    %83 = vector.shape_cast %82 : vector<16xf32> to vector<16x1xf32>
    %cst_26 = arith.constant 3.200000e+01 : f32
    %84 = vector.broadcast %cst_26 : f32 to vector<16x1xf32>
    %85 = arith.divf %83, %84 : vector<16x1xf32>
    %86 = vector.broadcast %85 : vector<16x1xf32> to vector<16x32xf32>
    %87 = arith.subf %81, %86 : vector<16x32xf32>
    %88 = arith.mulf %87, %87 : vector<16x32xf32>
    %cst_27 = arith.constant dense<0.000000e+00> : vector<16xf32>
    %89 = vector.multi_reduction <add>, %88, %cst_27 [1] : vector<16x32xf32> to vector<16xf32>
    %90 = vector.shape_cast %89 : vector<16xf32> to vector<16x1xf32>
    %cst_28 = arith.constant 3.200000e+01 : f32
    %91 = vector.broadcast %cst_28 : f32 to vector<16x1xf32>
    %92 = arith.divf %90, %91 : vector<16x1xf32>
    %93 = vector.broadcast %85 : vector<16x1xf32> to vector<16x32xf32>
    %94 = arith.subf %81, %93 : vector<16x32xf32>
    %cst_29 = arith.constant 9.99999974E-6 : f32
    %95 = vector.broadcast %cst_29 : f32 to vector<16x1xf32>
    %96 = arith.addf %92, %95 : vector<16x1xf32>
    %97 = math.rsqrt %96 : vector<16x1xf32>
    %98 = vector.broadcast %97 : vector<16x1xf32> to vector<16x32xf32>
    %99 = arith.mulf %94, %98 : vector<16x32xf32>
    %100 = vector.broadcast %17 : vector<1x32xf32> to vector<16x32xf32>
    %101 = arith.mulf %100, %99 : vector<16x32xf32>
    %102 = vector.broadcast %18 : vector<1x32xf32> to vector<16x32xf32>
    %103 = arith.addf %101, %102 : vector<16x32xf32>
    %cst_30 = arith.constant dense<0.000000e+00> : vector<16x128xf32>
    %104 = tpu.matmul %103, %9, %cst_30 {dimension_numbers = #tpu.dot_dimension_numbers<[1], [0], [0], [1], [0, 0, 1, 1], [], []>} : vector<16x32xf32>, vector<32x128xf32>, vector<16x128xf32> -> vector<16x128xf32>
    %105 = vector.broadcast %21 : vector<1x128xf32> to vector<16x128xf32>
    %106 = arith.addf %104, %105 : vector<16x128xf32>
    %cst_31 = arith.constant 5.000000e-01 : f32
    %107 = vector.broadcast %cst_31 : f32 to vector<16x128xf32>
    %108 = arith.mulf %107, %106 : vector<16x128xf32>
    %cst_32 = arith.constant 4.471500e-02 : f32
    %109 = vector.broadcast %cst_32 : f32 to vector<16x128xf32>
    %110 = arith.mulf %109, %106 : vector<16x128xf32>
    %111 = arith.mulf %110, %106 : vector<16x128xf32>
    %112 = arith.mulf %111, %106 : vector<16x128xf32>
    %113 = arith.addf %106, %112 : vector<16x128xf32>
    %cst_33 = arith.constant 0.797884583 : f32
    %114 = vector.broadcast %cst_33 : f32 to vector<16x128xf32>
    %115 = arith.mulf %114, %113 : vector<16x128xf32>
    %116 = math.tanh %115 : vector<16x128xf32>
    %cst_34 = arith.constant 1.000000e+00 : f32
    %117 = vector.broadcast %cst_34 : f32 to vector<16x128xf32>
    %118 = arith.addf %117, %116 : vector<16x128xf32>
    %119 = arith.mulf %108, %118 : vector<16x128xf32>
    %cst_35 = arith.constant dense<0.000000e+00> : vector<16x32xf32>
    %120 = tpu.matmul %119, %11, %cst_35 {dimension_numbers = #tpu.dot_dimension_numbers<[1], [0], [0], [1], [0, 0, 1, 1], [], []>} : vector<16x128xf32>, vector<128x32xf32>, vector<16x32xf32> -> vector<16x32xf32>
    %121 = vector.broadcast %19 : vector<1x32xf32> to vector<16x32xf32>
    %122 = arith.addf %120, %121 : vector<16x32xf32>
    %123 = arith.addf %81, %122 : vector<16x32xf32>
    %c1 = arith.constant 1 : index
    %c0_36 = arith.constant 0 : index
    %c0_37 = arith.constant 0 : index
    %124 = vector.load %arg2[%c1, %c0_36, %c0_37] : memref<2x32x256xf32, #tpu.memory_space<vmem>>, vector<1x32x256xf32>
    %125 = vector.shape_cast %124 : vector<1x32x256xf32> to vector<32x256xf32>
    %126 = vector.extract_strided_slice %125 {offsets = [0, 0], sizes = [32, 96], strides = [1, 1]} : vector<32x256xf32> to vector<32x96xf32>
    %127 = vector.extract_strided_slice %125 {offsets = [0, 96], sizes = [32, 32], strides = [1, 1]} : vector<32x256xf32> to vector<32x32xf32>
    %128 = vector.extract_strided_slice %125 {offsets = [0, 128], sizes = [32, 128], strides = [1, 1]} : vector<32x256xf32> to vector<32x128xf32>
    %c1_38 = arith.constant 1 : index
    %c0_39 = arith.constant 0 : index
    %c0_40 = arith.constant 0 : index
    %129 = vector.load %arg3[%c1_38, %c0_39, %c0_40] : memref<2x128x32xf32, #tpu.memory_space<vmem>>, vector<1x128x32xf32>
    %130 = vector.shape_cast %129 : vector<1x128x32xf32> to vector<128x32xf32>
    %c1_41 = arith.constant 1 : index
    %c0_42 = arith.constant 0 : index
    %c0_43 = arith.constant 0 : index
    %131 = vector.load %arg4[%c1_41, %c0_42, %c0_43] : memref<3x8x32xf32, #tpu.memory_space<vmem>>, vector<1x8x32xf32>
    %132 = vector.shape_cast %131 : vector<1x8x32xf32> to vector<8x32xf32>
    %133 = vector.extract_strided_slice %132 {offsets = [0, 0], sizes = [1, 32], strides = [1, 1]} : vector<8x32xf32> to vector<1x32xf32>
    %134 = vector.extract_strided_slice %132 {offsets = [1, 0], sizes = [1, 32], strides = [1, 1]} : vector<8x32xf32> to vector<1x32xf32>
    %135 = vector.extract_strided_slice %132 {offsets = [2, 0], sizes = [1, 32], strides = [1, 1]} : vector<8x32xf32> to vector<1x32xf32>
    %136 = vector.extract_strided_slice %132 {offsets = [3, 0], sizes = [1, 32], strides = [1, 1]} : vector<8x32xf32> to vector<1x32xf32>
    %137 = vector.extract_strided_slice %132 {offsets = [4, 0], sizes = [1, 32], strides = [1, 1]} : vector<8x32xf32> to vector<1x32xf32>
    %138 = vector.extract_strided_slice %132 {offsets = [5, 0], sizes = [1, 32], strides = [1, 1]} : vector<8x32xf32> to vector<1x32xf32>
    %c1_44 = arith.constant 1 : index
    %c0_45 = arith.constant 0 : index
    %c0_46 = arith.constant 0 : index
    %139 = vector.load %arg5[%c1_44, %c0_45, %c0_46] : memref<2x1x128xf32, #tpu.memory_space<vmem>>, vector<1x1x128xf32>
    %140 = vector.shape_cast %139 : vector<1x1x128xf32> to vector<1x128xf32>
    %cst_47 = arith.constant dense<0.000000e+00> : vector<16xf32>
    %141 = vector.multi_reduction <add>, %123, %cst_47 [1] : vector<16x32xf32> to vector<16xf32>
    %142 = vector.shape_cast %141 : vector<16xf32> to vector<16x1xf32>
    %cst_48 = arith.constant 3.200000e+01 : f32
    %143 = vector.broadcast %cst_48 : f32 to vector<16x1xf32>
    %144 = arith.divf %142, %143 : vector<16x1xf32>
    %145 = vector.broadcast %144 : vector<16x1xf32> to vector<16x32xf32>
    %146 = arith.subf %123, %145 : vector<16x32xf32>
    %147 = arith.mulf %146, %146 : vector<16x32xf32>
    %cst_49 = arith.constant dense<0.000000e+00> : vector<16xf32>
    %148 = vector.multi_reduction <add>, %147, %cst_49 [1] : vector<16x32xf32> to vector<16xf32>
    %149 = vector.shape_cast %148 : vector<16xf32> to vector<16x1xf32>
    %cst_50 = arith.constant 3.200000e+01 : f32
    %150 = vector.broadcast %cst_50 : f32 to vector<16x1xf32>
    %151 = arith.divf %149, %150 : vector<16x1xf32>
    %152 = vector.broadcast %144 : vector<16x1xf32> to vector<16x32xf32>
    %153 = arith.subf %123, %152 : vector<16x32xf32>
    %cst_51 = arith.constant 9.99999974E-6 : f32
    %154 = vector.broadcast %cst_51 : f32 to vector<16x1xf32>
    %155 = arith.addf %151, %154 : vector<16x1xf32>
    %156 = math.rsqrt %155 : vector<16x1xf32>
    %157 = vector.broadcast %156 : vector<16x1xf32> to vector<16x32xf32>
    %158 = arith.mulf %153, %157 : vector<16x32xf32>
    %159 = vector.broadcast %133 : vector<1x32xf32> to vector<16x32xf32>
    %160 = arith.mulf %159, %158 : vector<16x32xf32>
    %161 = vector.broadcast %134 : vector<1x32xf32> to vector<16x32xf32>
    %162 = arith.addf %160, %161 : vector<16x32xf32>
    %cst_52 = arith.constant dense<0.000000e+00> : vector<16x96xf32>
    %163 = tpu.matmul %162, %126, %cst_52 {dimension_numbers = #tpu.dot_dimension_numbers<[1], [0], [0], [1], [0, 0, 1, 1], [], []>} : vector<16x32xf32>, vector<32x96xf32>, vector<16x96xf32> -> vector<16x96xf32>
    %164 = vector.extract_strided_slice %163 {offsets = [0, 0], sizes = [16, 32], strides = [1, 1]} : vector<16x96xf32> to vector<16x32xf32>
    %165 = vector.shape_cast %164 : vector<16x32xf32> to vector<2x8x4x8xf32>
    %166 = tpu.transpose %165, [0, 2, 1, 3] : vector<2x8x4x8xf32> -> vector<2x4x8x8xf32>
    %167 = vector.shape_cast %166 : vector<2x4x8x8xf32> to vector<8x8x8xf32>
    %cst_53 = arith.constant 0.353553385 : f32
    %168 = vector.broadcast %cst_53 : f32 to vector<8x8x8xf32>
    %169 = arith.mulf %167, %168 : vector<8x8x8xf32>
    %170 = vector.extract_strided_slice %163 {offsets = [0, 32], sizes = [16, 32], strides = [1, 1]} : vector<16x96xf32> to vector<16x32xf32>
    %171 = vector.shape_cast %170 : vector<16x32xf32> to vector<2x8x4x8xf32>
    %172 = tpu.transpose %171, [0, 2, 1, 3] : vector<2x8x4x8xf32> -> vector<2x4x8x8xf32>
    %173 = vector.shape_cast %172 : vector<2x4x8x8xf32> to vector<8x8x8xf32>
    %174 = vector.extract_strided_slice %163 {offsets = [0, 64], sizes = [16, 32], strides = [1, 1]} : vector<16x96xf32> to vector<16x32xf32>
    %175 = vector.shape_cast %174 : vector<16x32xf32> to vector<2x8x4x8xf32>
    %176 = tpu.transpose %175, [0, 2, 1, 3] : vector<2x8x4x8xf32> -> vector<2x4x8x8xf32>
    %177 = vector.shape_cast %176 : vector<2x4x8x8xf32> to vector<8x8x8xf32>
    "tpu.trace_start"() <{level = 10 : i32, message = "hqd,hkd->hqk"}> : () -> ()
    %cst_54 = arith.constant dense<0.000000e+00> : vector<8x8x8xf32>
    %178 = tpu.matmul %169, %173, %cst_54 {dimension_numbers = #tpu.dot_dimension_numbers<[2], [2], [1], [1], [0, 0, 0, 1, 1, 1], [0], [0]>} : vector<8x8x8xf32>, vector<8x8x8xf32>, vector<8x8x8xf32> -> vector<8x8x8xf32>
    "tpu.trace_stop"() : () -> ()
    %cst_55 = arith.constant dense<0xFF800000> : vector<8x8xf32>
    %179 = vector.multi_reduction <maximumf>, %178, %cst_55 [2] : vector<8x8x8xf32> to vector<8x8xf32>
    %180 = vector.shape_cast %179 : vector<8x8xf32> to vector<8x8x1xf32>
    %181 = vector.broadcast %180 : vector<8x8x1xf32> to vector<8x8x8xf32>
    %182 = arith.subf %178, %181 : vector<8x8x8xf32>
    %183 = math.exp %182 : vector<8x8x8xf32>
    %cst_56 = arith.constant 0.000000e+00 : f32
    %184 = vector.shape_cast %4 : vector<1x8x8xi1> to vector<1x8x8xi1>
    %185 = vector.broadcast %184 : vector<1x8x8xi1> to vector<8x8x8xi1>
    %186 = vector.broadcast %cst_56 : f32 to vector<8x8x8xf32>
    %187 = arith.select %185, %186, %183 : vector<8x8x8xi1>, vector<8x8x8xf32>
    %cst_57 = arith.constant dense<0.000000e+00> : vector<8x8xf32>
    %188 = vector.multi_reduction <add>, %187, %cst_57 [2] : vector<8x8x8xf32> to vector<8x8xf32>
    %189 = vector.shape_cast %188 : vector<8x8xf32> to vector<8x8x1xf32>
    %190 = tpu.reciprocal %189 : vector<8x8x1xf32> -> vector<8x8x1xf32>
    %191 = vector.broadcast %190 : vector<8x8x1xf32> to vector<8x8x8xf32>
    %192 = arith.mulf %187, %191 : vector<8x8x8xf32>
    "tpu.trace_start"() <{level = 10 : i32, message = "hqk,hkd->hqd"}> : () -> ()
    %cst_58 = arith.constant dense<0.000000e+00> : vector<8x8x8xf32>
    %193 = tpu.matmul %192, %177, %cst_58 {dimension_numbers = #tpu.dot_dimension_numbers<[2], [1], [1], [2], [0, 0, 0, 1, 1, 2], [0], [0]>} : vector<8x8x8xf32>, vector<8x8x8xf32>, vector<8x8x8xf32> -> vector<8x8x8xf32>
    "tpu.trace_stop"() : () -> ()
    %194 = vector.shape_cast %193 : vector<8x8x8xf32> to vector<2x4x8x8xf32>
    %195 = tpu.transpose %194, [0, 2, 1, 3] : vector<2x4x8x8xf32> -> vector<2x8x4x8xf32>
    %196 = vector.shape_cast %195 : vector<2x8x4x8xf32> to vector<16x32xf32>
    %cst_59 = arith.constant dense<0.000000e+00> : vector<16x32xf32>
    %197 = tpu.matmul %196, %127, %cst_59 {dimension_numbers = #tpu.dot_dimension_numbers<[1], [0], [0], [1], [0, 0, 1, 1], [], []>} : vector<16x32xf32>, vector<32x32xf32>, vector<16x32xf32> -> vector<16x32xf32>
    %198 = vector.broadcast %135 : vector<1x32xf32> to vector<16x32xf32>
    %199 = arith.addf %197, %198 : vector<16x32xf32>
    %200 = arith.addf %123, %199 : vector<16x32xf32>
    %cst_60 = arith.constant dense<0.000000e+00> : vector<16xf32>
    %201 = vector.multi_reduction <add>, %200, %cst_60 [1] : vector<16x32xf32> to vector<16xf32>
    %202 = vector.shape_cast %201 : vector<16xf32> to vector<16x1xf32>
    %cst_61 = arith.constant 3.200000e+01 : f32
    %203 = vector.broadcast %cst_61 : f32 to vector<16x1xf32>
    %204 = arith.divf %202, %203 : vector<16x1xf32>
    %205 = vector.broadcast %204 : vector<16x1xf32> to vector<16x32xf32>
    %206 = arith.subf %200, %205 : vector<16x32xf32>
    %207 = arith.mulf %206, %206 : vector<16x32xf32>
    %cst_62 = arith.constant dense<0.000000e+00> : vector<16xf32>
    %208 = vector.multi_reduction <add>, %207, %cst_62 [1] : vector<16x32xf32> to vector<16xf32>
    %209 = vector.shape_cast %208 : vector<16xf32> to vector<16x1xf32>
    %cst_63 = arith.constant 3.200000e+01 : f32
    %210 = vector.broadcast %cst_63 : f32 to vector<16x1xf32>
    %211 = arith.divf %209, %210 : vector<16x1xf32>
    %212 = vector.broadcast %204 : vector<16x1xf32> to vector<16x32xf32>
    %213 = arith.subf %200, %212 : vector<16x32xf32>
    %cst_64 = arith.constant 9.99999974E-6 : f32
    %214 = vector.broadcast %cst_64 : f32 to vector<16x1xf32>
    %215 = arith.addf %211, %214 : vector<16x1xf32>
    %216 = math.rsqrt %215 : vector<16x1xf32>
    %217 = vector.broadcast %216 : vector<16x1xf32> to vector<16x32xf32>
    %218 = arith.mulf %213, %217 : vector<16x32xf32>
    %219 = vector.broadcast %136 : vector<1x32xf32> to vector<16x32xf32>
    %220 = arith.mulf %219, %218 : vector<16x32xf32>
    %221 = vector.broadcast %137 : vector<1x32xf32> to vector<16x32xf32>
    %222 = arith.addf %220, %221 : vector<16x32xf32>
    %cst_65 = arith.constant dense<0.000000e+00> : vector<16x128xf32>
    %223 = tpu.matmul %222, %128, %cst_65 {dimension_numbers = #tpu.dot_dimension_numbers<[1], [0], [0], [1], [0, 0, 1, 1], [], []>} : vector<16x32xf32>, vector<32x128xf32>, vector<16x128xf32> -> vector<16x128xf32>
    %224 = vector.broadcast %140 : vector<1x128xf32> to vector<16x128xf32>
    %225 = arith.addf %223, %224 : vector<16x128xf32>
    %cst_66 = arith.constant 5.000000e-01 : f32
    %226 = vector.broadcast %cst_66 : f32 to vector<16x128xf32>
    %227 = arith.mulf %226, %225 : vector<16x128xf32>
    %cst_67 = arith.constant 4.471500e-02 : f32
    %228 = vector.broadcast %cst_67 : f32 to vector<16x128xf32>
    %229 = arith.mulf %228, %225 : vector<16x128xf32>
    %230 = arith.mulf %229, %225 : vector<16x128xf32>
    %231 = arith.mulf %230, %225 : vector<16x128xf32>
    %232 = arith.addf %225, %231 : vector<16x128xf32>
    %cst_68 = arith.constant 0.797884583 : f32
    %233 = vector.broadcast %cst_68 : f32 to vector<16x128xf32>
    %234 = arith.mulf %233, %232 : vector<16x128xf32>
    %235 = math.tanh %234 : vector<16x128xf32>
    %cst_69 = arith.constant 1.000000e+00 : f32
    %236 = vector.broadcast %cst_69 : f32 to vector<16x128xf32>
    %237 = arith.addf %236, %235 : vector<16x128xf32>
    %238 = arith.mulf %227, %237 : vector<16x128xf32>
    %cst_70 = arith.constant dense<0.000000e+00> : vector<16x32xf32>
    %239 = tpu.matmul %238, %130, %cst_70 {dimension_numbers = #tpu.dot_dimension_numbers<[1], [0], [0], [1], [0, 0, 1, 1], [], []>} : vector<16x128xf32>, vector<128x32xf32>, vector<16x32xf32> -> vector<16x32xf32>
    %240 = vector.broadcast %138 : vector<1x32xf32> to vector<16x32xf32>
    %241 = arith.addf %239, %240 : vector<16x32xf32>
    %242 = arith.addf %200, %241 : vector<16x32xf32>
    %c2 = arith.constant 2 : index
    %c0_71 = arith.constant 0 : index
    %c0_72 = arith.constant 0 : index
    %243 = vector.load %arg4[%c2, %c0_71, %c0_72] : memref<3x8x32xf32, #tpu.memory_space<vmem>>, vector<1x8x32xf32>
    %244 = vector.shape_cast %243 : vector<1x8x32xf32> to vector<8x32xf32>
    %245 = vector.extract_strided_slice %244 {offsets = [0, 0], sizes = [1, 32], strides = [1, 1]} : vector<8x32xf32> to vector<1x32xf32>
    %246 = vector.extract_strided_slice %244 {offsets = [1, 0], sizes = [1, 32], strides = [1, 1]} : vector<8x32xf32> to vector<1x32xf32>
    %cst_73 = arith.constant dense<0.000000e+00> : vector<16xf32>
    %247 = vector.multi_reduction <add>, %242, %cst_73 [1] : vector<16x32xf32> to vector<16xf32>
    %248 = vector.shape_cast %247 : vector<16xf32> to vector<16x1xf32>
    %cst_74 = arith.constant 3.200000e+01 : f32
    %249 = vector.broadcast %cst_74 : f32 to vector<16x1xf32>
    %250 = arith.divf %248, %249 : vector<16x1xf32>
    %251 = vector.broadcast %250 : vector<16x1xf32> to vector<16x32xf32>
    %252 = arith.subf %242, %251 : vector<16x32xf32>
    %253 = arith.mulf %252, %252 : vector<16x32xf32>
    %cst_75 = arith.constant dense<0.000000e+00> : vector<16xf32>
    %254 = vector.multi_reduction <add>, %253, %cst_75 [1] : vector<16x32xf32> to vector<16xf32>
    %255 = vector.shape_cast %254 : vector<16xf32> to vector<16x1xf32>
    %cst_76 = arith.constant 3.200000e+01 : f32
    %256 = vector.broadcast %cst_76 : f32 to vector<16x1xf32>
    %257 = arith.divf %255, %256 : vector<16x1xf32>
    %258 = vector.broadcast %250 : vector<16x1xf32> to vector<16x32xf32>
    %259 = arith.subf %242, %258 : vector<16x32xf32>
    %cst_77 = arith.constant 9.99999974E-6 : f32
    %260 = vector.broadcast %cst_77 : f32 to vector<16x1xf32>
    %261 = arith.addf %257, %260 : vector<16x1xf32>
    %262 = math.rsqrt %261 : vector<16x1xf32>
    %263 = vector.broadcast %262 : vector<16x1xf32> to vector<16x32xf32>
    %264 = arith.mulf %259, %263 : vector<16x32xf32>
    %265 = vector.broadcast %245 : vector<1x32xf32> to vector<16x32xf32>
    %266 = arith.mulf %265, %264 : vector<16x32xf32>
    %267 = vector.broadcast %246 : vector<1x32xf32> to vector<16x32xf32>
    %268 = arith.addf %266, %267 : vector<16x32xf32>
    %c0_78 = arith.constant 0 : index
    %c0_79 = arith.constant 0 : index
    %269 = vector.load %arg6[%c0_78, %c0_79] : memref<32x128xf32, #tpu.memory_space<vmem>>, vector<32x128xf32>
    %cst_80 = arith.constant dense<0.000000e+00> : vector<16x128xf32>
    %270 = tpu.matmul %268, %269, %cst_80 {dimension_numbers = #tpu.dot_dimension_numbers<[1], [0], [0], [1], [0, 0, 1, 1], [], []>} : vector<16x32xf32>, vector<32x128xf32>, vector<16x128xf32> -> vector<16x128xf32>
    %c0_81 = arith.constant 0 : index
    %c0_82 = arith.constant 0 : index
    %271 = vector.load %arg7[%c0_81, %c0_82] : memref<16x128xf32, #tpu.memory_space<vmem>>, vector<16x128xf32>
    tpu.vector_store %arg7[%c0_81, %c0_82], %270 {strides = array<i32>} : memref<16x128xf32, #tpu.memory_space<vmem>>, vector<16x128xf32>,
    return
  }
  func.func @transform_0(%arg0: i32) -> (i32, i32) {
    %c0_i32 = arith.constant 0 : i32
    %c0_i32_0 = arith.constant 0 : i32
    %c0_i32_1 = arith.constant 0 : i32
    return %c0_i32, %c0_i32_0 : i32, i32
  }
  func.func @transform_1(%arg0: i32) -> (i32, i32, i32) {
    %c0_i32 = arith.constant 0 : i32
    %c0_i32_0 = arith.constant 0 : i32
    %c0_i32_1 = arith.constant 0 : i32
    %c0_i32_2 = arith.constant 0 : i32
    return %c0_i32, %c0_i32_0, %c0_i32_1 : i32, i32, i32
  }
  func.func @transform_2(%arg0: i32) -> (i32, i32, i32) {
    %c0_i32 = arith.constant 0 : i32
    %c0_i32_0 = arith.constant 0 : i32
    %c0_i32_1 = arith.constant 0 : i32
    %c0_i32_2 = arith.constant 0 : i32
    return %c0_i32, %c0_i32_0, %c0_i32_1 : i32, i32, i32
  }
  func.func @transform_3(%arg0: i32) -> (i32, i32, i32) {
    %c0_i32 = arith.constant 0 : i32
    %c0_i32_0 = arith.constant 0 : i32
    %c0_i32_1 = arith.constant 0 : i32
    %c0_i32_2 = arith.constant 0 : i32
    return %c0_i32, %c0_i32_0, %c0_i32_1 : i32, i32, i32
  }
  func.func @transform_4(%arg0: i32) -> (i32, i32, i32) {
    %c0_i32 = arith.constant 0 : i32
    %c0_i32_0 = arith.constant 0 : i32
    %c0_i32_1 = arith.constant 0 : i32
    %c0_i32_2 = arith.constant 0 : i32
    return %c0_i32, %c0_i32_0, %c0_i32_1 : i32, i32, i32
  }
  func.func @transform_5(%arg0: i32) -> (i32, i32) {
    %c0_i32 = arith.constant 0 : i32
    %c0_i32_0 = arith.constant 0 : i32
    %c0_i32_1 = arith.constant 0 : i32
    return %c0_i32, %c0_i32_0 : i32, i32
  }
  func.func @transform_6(%arg0: i32) -> (i32, i32) {
    %c0_i32 = arith.constant 0 : i32
    %c0_i32_0 = arith.constant 0 : i32
    %c0_i32_1 = arith.constant 0 : i32
    return %c0_i32, %c0_i32_0 : i32, i32
  }
}

</mosaic_0001>

<bundles_post_ra>
// kernel: tpu_custom_call.1
= control target key start
LH: loop header
LB: loop body
LE: loop exit
PB: predicated region body
PF: predicated region fallthrough
CT: control target
= control target key end

     0   :  { %vm57_vm0 = vcmask 261120   ;;  %s7991_s0 = inlined_call_operand.vmem [shape: f32[16,32], index: 0, kind: input, shape index: {}]   ;;  %s7992_s1 = inlined_call_operand.vmem [shape: f32[2,32,256], index: 1, kind: input, shape index: {}]   ;;  %s7993_s2 = inlined_call_operand.vmem [shape: f32[2,128,32], index: 2, kind: input, shape index: {}]   ;;  %s7994_s3 = inlined_call_operand.vmem [shape: f32[3,8,32], index: 3, kind: input, shape index: {}]   ;;  %s7995_s4 = inlined_call_operand.vmem [shape: f32[2,1,128], index: 4, kind: input, shape index: {}]   ;;  %s7996_s5 = inlined_call_operand.vmem [shape: f32[32,128], index: 5, kind: input, shape index: {}]   ;;  %s7997_s6 = inlined_call_operand.hbm [shape: f32[16,128], index: 6, kind: output, shape index: {}]  }
   0x1   :  { %v24_v0 = vld [vmem:[%s7991_s0] sm:$0xff]  ;;  %v25_v1 = vld [vmem:[%s7991_s0 + $0x8] sm:$0xff] }
   0x2   :  { %11 = vsyncpa [#allocation3], 0  ;;  %v58_v2 = vsel %vm57_vm0, %v24_v0, 0.0  ;;  %v61_v3 = vsel %vm57_vm0, %v25_v1, 0.0  ;;  %v37_v14 = vld [vmem:[%s7992_s1 + $0x30] sm:$0xff]  ;;  %v35_v15 = vld [vmem:[%s7992_s1 + $0x20] sm:$0xff]  ;;  %v26_v23 = vlaneseq }
   0x3   :  { %59 = vadd.xlane.f32.xlu0 %v58_v2  ;;  %6358 = vmatprep.subr.mxu1 %v37_v14  ;;  %v33_v16 = vld [vmem:[%s7992_s1 + $0x10] sm:$0xff]  ;;  %v31_v17 = vld [vmem:[%s7992_s1] sm:$0xff]  ;;  %s6803_s11 = smov 112   ;;  %s6804_s12 = smov 120   ;;  %v6807_v46 = vmov 0.0   ;;  %vm6808_vm1 = vmmov 0  }
   0x4   :  { %6359 = vmatpush3.msra.mxu1 %v37_v14  ;;  %v6876_v25 = vshrl.u32 %v26_v23, 7  ;;  %v55_v27 = vld [vmem:[%s7994_s3] sm:$0xff]  ;;  %s6805_s13 = smov 104   ;;  %s6806_s14 = smov 96   ;;  %6389 = vmatprep.subr.mxu0 %v6807_v46  ;;  %v6809_v48 = vmov 1983009808  }
   0x5   :  { %6360 = vmatprep.subr.mxu1 %v35_v15  ;;  %6391 = vmatprep.mubr.msk.f32.mxu0 %vm6808_vm1, %v6807_v46  ;;  %v201_v49 = vunpack.c.l.s4 %v6809_v48  ;;  %v6810_v51 = vmov 1934713408   ;;  %vm1070_vm2 = vcmask 64512   ;;  %s6811_s15 = smov 64   ;;  %s6812_s18 = smov 32   ;;  %vm2659_vm4 = vcmask 130048  }
   0x6   :  { %6361 = vmatpush3.msra.mxu1 %v35_v15  ;;  %v6879_v26 = vsub.s32 0, %v6876_v25  ;;  %v6885_v28 = vsub.s32 1, %v6876_v25  ;;  %v233_v52 = vunpack.c.l.s4 %v6810_v51  ;;  %s6813_s23 = smov 16   ;;  %s6814_s24 = smov 8   ;;  %vm2662_vm5 = vcmask 195584  }
   0x7   :  { %62 = vadd.xlane.f32.xlu0 %v61_v3  ;;  %6362 = vmatprep.subr.mxu1 %v33_v16  ;;  %v202_v50 = vunpack.c.0.s8 %v201_v49  ;;  %s6815_s25 = smov 24  }
   0x8   :  { %6363 = vmatpush3.msra.mxu1 %v33_v16  ;;  %v88_v29 = vrot.slane %v55_v27, %v6879_v26  ;;  %v94_v32 = vrot.slane %v55_v27, %v6885_v28  ;;  %v234_v58 = vunpack.c.0.s8 %v233_v52 }
   0x9   :  { %6364 = vmatprep.subr.mxu1 %v31_v17  ;;  %v6946_v55 = vsub.s32 %v202_v50, %v6876_v25 }
   0xa   :  { %6365 = vmatpush3.msra.mxu1 %v31_v17  ;;  %v6957_v63 = vsub.s32 %v234_v58, %v6876_v25 }
   0xb   :  { %6369 = vmatprep.subr.mxu1 %v6807_v46 }
  0x8c   :  { %v60_v4 = vpop.xlane.xlu0 %59 }
  0x8d   :  { %v65_v5 = vmul.f32 0.03125, %v60_v4 }
  0x8f   :  { %v67_v6 = vsub.f32 %v24_v0, %v65_v5 }
  0x90   :  { %v63_v7 = vpop.xlane.xlu0 %62 }
  0x91   :  { %v66_v8 = vmul.f32 0.03125, %v63_v7  ;;  %v69_v9 = vmul.f32 %v67_v6, %v67_v6 }
  0x93   :  { %v68_v10 = vsub.f32 %v25_v1, %v66_v8  ;;  %v71_v11 = vsel %vm57_vm0, %v69_v9, 0.0 }
  0x94   :  { %72 = vadd.xlane.f32.xlu1 %v71_v11 }
  0x95   :  { %v70_v12 = vmul.f32 %v68_v10, %v68_v10 }
  0x97   :  { %v74_v13 = vsel %vm57_vm0, %v70_v12, 0.0 }
  0x98   :  { %75 = vadd.xlane.f32.xlu1 %v74_v13 }
 0x11d   :  { %v73_v18 = vpop.xlane.xlu1 %72 }
 0x11e   :  { %v77_v19 = vmul.f32 0.03125, %v73_v18 }
 0x120   :  { %v79_v20 = vadd.f32 1e-05, %v77_v19 }
 0x121   :  { %v76_v21 = vpop.xlane.xlu1 %75 }
 0x122   :  { %6680 = vrsqrt.f32 %v79_v20  ;;  %v78_v22 = vmul.f32 0.03125, %v76_v21 }
 0x124   :  { %v80_v24 = vadd.f32 1e-05, %v78_v22 }
 0x126   :  { %6682 = vrsqrt.f32 %v80_v24 }
 0x12f   :  { %v6681_v30 = vpop.eup %6680 }
 0x130   :  { %v83_v31 = vmul.f32 %v6681_v30, %v67_v6 }
 0x132   :  { %v89_v33 = vmul.f32 %v88_v29, %v83_v31 }
 0x133   :  { %v6683_v34 = vpop.eup %6682 }
 0x134   :  { %v84_v35 = vmul.f32 %v6683_v34, %v68_v10  ;;  %v95_v36 = vadd.f32 %v94_v32, %v89_v33 }
 0x136   :  { %v90_v37 = vmul.f32 %v88_v29, %v84_v35  ;;  %6366 = vmatprep.mubr.msk.f32.mxu1 %vm57_vm0, %v95_v36 }
 0x138   :  { %v96_v38 = vadd.f32 %v94_v32, %v90_v37 }
 0x13a   :  { %6367 = vmatmul.mubr.msk.f32.vlgmr.msra.gmra.mxu1 %vm57_vm0, %v96_v38 }
 0x13b   :  { %6371 = vmatprep.mubr.msk.f32.mxu1 %vm6808_vm1, %v6807_v46 }
 0x1fa   :  { %v6891_v39 = vpop.f32.mrf.mxu1 }
 0x1fc   :  { %v6893_v40 = vpop.f32.mrf.mxu1 }
 0x1fd   :  { %186 = vrot.lane.b32.xlu1 %v6893_v40, %s6803_s11  ;;  %180 = vrot.lane.b32.xlu0 %v6893_v40, %s6804_s12 }
 0x201   :  { %192 = vrot.lane.b32.xlu1 %v6893_v40, %s6805_s13  ;;  %188 = vrot.lane.b32.xlu0 %v6891_v39, %s6803_s11 }
 0x205   :  { %182 = vrot.lane.b32.xlu1 %v6891_v39, %s6804_s12  ;;  %478 = vrot.lane.b32.xlu0 %v6893_v40, %s6806_s14 }
 0x209   :  { %194 = vrot.lane.b32.xlu1 %v6891_v39, %s6805_s13 }
 0x26f   :  { %v6909_v41 = vpop.permute.xlu1 %186  ;;  %v6911_v42 = vpop.permute.xlu0 %180 }
 0x270   :  { %486 = vrot.lane.b32.xlu0 %v6909_v41, %s6806_s14  ;;  %482 = vrot.lane.b32.xlu1 %v6911_v42, %s6806_s14  ;;  %v198_v56 = vcombine.low %v6893_v40, %v6909_v41  ;;  %v199_v57 = vcombine.high %v6893_v40, %v6909_v41 }
 0x272   :  { %v206_v61 = vrot.slane %v198_v56, %v6946_v55  ;;  %v213_v62 = vrot.slane %v199_v57, %v6946_v55 }
 0x273   :  { %v6917_v43 = vpop.permute.xlu1 %192  ;;  %v6923_v44 = vpop.permute.xlu0 %188 }
 0x274   :  { %480 = vrot.lane.b32.xlu0 %v6891_v39, %s6806_s14  ;;  %490 = vrot.lane.b32.xlu1 %v6917_v43, %s6806_s14  ;;  %v214_v53 = vcombine.low %v6911_v42, %v6917_v43  ;;  %v215_v54 = vcombine.high %v6911_v42, %v6917_v43  ;;  %v266_v14 = vcombine.low %v6891_v39, %v6923_v44 }
 0x275   :  { %v267_v16 = vcombine.high %v6891_v39, %v6923_v44 }
 0x276   :  { %v222_v59 = vrot.slane %v214_v53, %v6946_v55  ;;  %v229_v60 = vrot.slane %v215_v54, %v6946_v55  ;;  %v274_v27 = vrot.slane %v266_v14, %v6946_v55 }
 0x277   :  { %v6925_v45 = vpop.permute.xlu1 %182  ;;  %v479_v13 = vpop.permute.xlu0 %478  ;;  %v281_v30 = vrot.slane %v267_v16, %v6946_v55 }
 0x278   :  { %488 = vrot.lane.b32.xlu0 %v6923_v44, %s6806_s14  ;;  %484 = vrot.lane.b32.xlu1 %v6925_v45, %s6806_s14  ;;  %v230_v0 = vcombine.low %v206_v61, %v222_v59  ;;  %v231_v1 = vcombine.high %v206_v61, %v222_v59  ;;  %v246_v2 = vcombine.low %v213_v62, %v229_v60 }
 0x279   :  { %v247_v3 = vcombine.high %v213_v62, %v229_v60 }
 0x27a   :  { %v238_v4 = vrot.slane %v230_v0, %v6957_v63  ;;  %v245_v5 = vrot.slane %v231_v1, %v6957_v63  ;;  %v254_v6 = vrot.slane %v246_v2, %v6957_v63 }
 0x27b   :  { %v6932_v47 = vpop.permute.xlu1 %194  ;;  %v261_v7 = vrot.slane %v247_v3, %v6957_v63 }
 0x27c   :  { %492 = vrot.lane.b32.xlu1 %v6932_v47, %s6806_s14  ;;  %v334_v8 = vcombine.low %v238_v4, %v245_v5  ;;  %v6095_v9 = vcombine.high %v238_v4, %v245_v5  ;;  %v282_v12 = vcombine.low %v6925_v45, %v6932_v47  ;;  %v283_v15 = vcombine.high %v6925_v45, %v6932_v47 }
 0x27d   :  { %v350_v10 = vcombine.low %v254_v6, %v261_v7  ;;  %v6096_v11 = vcombine.high %v254_v6, %v261_v7 }
 0x27e   :  { %v341_v17 = vrot.slane %v334_v8, %v6946_v55  ;;  %v290_v18 = vrot.slane %v282_v12, %v6946_v55  ;;  %v349_v19 = vrot.slane %v6095_v9, %v6946_v55  ;;  %v297_v29 = vrot.slane %v283_v15, %v6946_v55 }
 0x27f   :  { %v357_v20 = vrot.slane %v350_v10, %v6946_v55  ;;  %v365_v21 = vrot.slane %v6096_v11, %v6946_v55 }
 0x280   :  { %v298_v31 = vcombine.low %v274_v27, %v290_v18  ;;  %v299_v32 = vcombine.high %v274_v27, %v290_v18  ;;  %v366_v33 = vcombine.low %v341_v17, %v349_v19  ;;  %v314_v38 = vcombine.low %v281_v30, %v297_v29 }
 0x281   :  { %v382_v34 = vcombine.low %v357_v20, %v365_v21  ;;  %v315_v48 = vcombine.high %v281_v30, %v297_v29  ;;  %v367_v50 = vcombine.high %v341_v17, %v349_v19  ;;  %v383_v53 = vcombine.high %v357_v20, %v365_v21 }
 0x282   :  { %v306_v54 = vrot.slane %v298_v31, %v6957_v63  ;;  %v313_v56 = vrot.slane %v299_v32, %v6957_v63  ;;  %v6982_v57 = vrot.slane %v366_v33, %v6957_v63  ;;  %v322_v0 = vrot.slane %v314_v38, %v6957_v63 }
 0x283   :  { %v6985_v58 = vrot.slane %v382_v34, %v6957_v63  ;;  %v329_v1 = vrot.slane %v315_v48, %v6957_v63  ;;  %v6994_v3 = vrot.slane %v367_v50, %v6957_v63  ;;  %v6999_v10 = vrot.slane %v383_v53, %v6957_v63 }
 0x284   :  { %v402_v11 = vcombine.low %v306_v54, %v313_v56  ;;  %v6097_v12 = vcombine.high %v306_v54, %v313_v56 }
 0x285   :  { %v398_v9 = vcombine.low %v6982_v57, %v6985_v58  ;;  %v418_v20 = vcombine.low %v322_v0, %v329_v1  ;;  %v6098_v21 = vcombine.high %v322_v0, %v329_v1  ;;  %v399_v1 = vcombine.high %v6982_v57, %v6985_v58 }
 0x286   :  { %v7006_v32 = vrot.slane %v402_v11, %v6946_v55  ;;  %v417_v33 = vrot.slane %v6097_v12, %v6946_v55 }
 0x287   :  { %v425_v53 = vrot.slane %v418_v20, %v6946_v55  ;;  %v433_v54 = vrot.slane %v6098_v21, %v6946_v55  ;;  %v470_v57 = vmul.f32 0.35355338, %v398_v9 }
 0x288   :  { %v435_v58 = vcombine.high %v7006_v32, %v417_v33 }
 0x2e2   :  { %v483_v22 = vpop.permute.xlu1 %482  ;;  %v487_v24 = vpop.permute.xlu0 %486 }
 0x2e3   :  { %v502_v35 = vcombine.low %v479_v13, %v487_v24  ;;  %v503_v36 = vcombine.high %v479_v13, %v487_v24 }
 0x2e5   :  { %v510_v59 = vrot.slane %v502_v35, %v6946_v55  ;;  %v517_v60 = vrot.slane %v503_v36, %v6946_v55 }
 0x2e6   :  { %v481_v37 = vpop.permute.xlu0 %480  ;;  %v491_v49 = vpop.permute.xlu1 %490 }
 0x2e7   :  { %v518_v51 = vcombine.low %v483_v22, %v491_v49  ;;  %v519_v52 = vcombine.high %v483_v22, %v491_v49 }
 0x2e9   :  { %v526_v61 = vrot.slane %v518_v51, %v6946_v55  ;;  %v533_v62 = vrot.slane %v519_v52, %v6946_v55 }
 0x2ea   :  { %v485_v2 = vpop.permute.xlu1 %484  ;;  %v489_v8 = vpop.permute.xlu0 %488 }
 0x2eb   :  { %v534_v4 = vcombine.low %v510_v59, %v526_v61  ;;  %v535_v5 = vcombine.high %v510_v59, %v526_v61  ;;  %v550_v6 = vcombine.low %v517_v60, %v533_v62  ;;  %v551_v7 = vcombine.high %v517_v60, %v533_v62 }
 0x2ec   :  { %v570_v17 = vcombine.low %v481_v37, %v489_v8  ;;  %v571_v18 = vcombine.high %v481_v37, %v489_v8 }
 0x2ed   :  { %v542_v13 = vrot.slane %v534_v4, %v6957_v63  ;;  %v549_v14 = vrot.slane %v535_v5, %v6957_v63  ;;  %v558_v15 = vrot.slane %v550_v6, %v6957_v63  ;;  %v565_v16 = vrot.slane %v551_v7, %v6957_v63 }
 0x2ee   :  { %v493_v19 = vpop.permute.xlu1 %492  ;;  %v578_v38 = vrot.slane %v570_v17, %v6946_v55  ;;  %v585_v48 = vrot.slane %v571_v18, %v6946_v55 }
 0x2ef   :  { %v638_v22 = vcombine.low %v542_v13, %v549_v14  ;;  %v6099_v24 = vcombine.high %v542_v13, %v549_v14  ;;  %v654_v27 = vcombine.low %v558_v15, %v565_v16  ;;  %v6100_v29 = vcombine.high %v558_v15, %v565_v16 }
 0x2f0   :  { %v586_v30 = vcombine.low %v485_v2, %v493_v19  ;;  %v587_v31 = vcombine.high %v485_v2, %v493_v19  ;;  %v434_v2 = vcombine.low %v7006_v32, %v417_v33  ;;  %v450_v13 = vcombine.low %v425_v53, %v433_v54 }
 0x2f1   :  { %v645_v34 = vrot.slane %v638_v22, %v6946_v55  ;;  %v653_v35 = vrot.slane %v6099_v24, %v6946_v55  ;;  %v661_v36 = vrot.slane %v654_v27, %v6946_v55  ;;  %v669_v37 = vrot.slane %v6100_v29, %v6946_v55 }
 0x2f2   :  { %v594_v49 = vrot.slane %v586_v30, %v6946_v55  ;;  %v601_v50 = vrot.slane %v587_v31, %v6946_v55  ;;  %v442_v18 = vrot.slane %v434_v2, %v6957_v63  ;;  %v451_v19 = vcombine.high %v425_v53, %v433_v54 }
 0x2f3   :  { %v670_v51 = vcombine.low %v645_v34, %v653_v35  ;;  %v686_v52 = vcombine.low %v661_v36, %v669_v37  ;;  %v671_v8 = vcombine.high %v645_v34, %v653_v35  ;;  %v687_v11 = vcombine.high %v661_v36, %v669_v37 }
 0x2f4   :  { %v602_v56 = vcombine.low %v578_v38, %v594_v49  ;;  %v603_v59 = vcombine.high %v578_v38, %v594_v49  ;;  %v618_v60 = vcombine.low %v585_v48, %v601_v50  ;;  %v619_v61 = vcombine.high %v585_v48, %v601_v50 }
 0x2f5   :  { %v678_v62 = vrot.slane %v670_v51, %v6957_v63  ;;  %v694_v0 = vrot.slane %v686_v52, %v6957_v63  ;;  %v685_v29 = vrot.slane %v671_v8, %v6957_v63  ;;  %v701_v9 = vrot.slane %v687_v11, %v6957_v63 }
 0x2f6   :  { %v610_v4 = vrot.slane %v602_v56, %v6957_v63  ;;  %v617_v5 = vrot.slane %v603_v59, %v6957_v63  ;;  %v626_v6 = vrot.slane %v618_v60, %v6957_v63  ;;  %v633_v7 = vrot.slane %v619_v61, %v6957_v63 }
 0x2f7   :  { %v702_v12 = vcombine.low %v678_v62, %v694_v0  ;;  %v703_v27 = vcombine.high %v678_v62, %v694_v0  ;;  %v458_v30 = vrot.slane %v450_v13, %v6957_v63  ;;  %v471_v35 = vmul.f32 0.35355338, %v399_v1 }
 0x2f8   :  { %v706_v14 = vcombine.low %v610_v4, %v617_v5  ;;  %v6101_v15 = vcombine.high %v610_v4, %v617_v5  ;;  %v722_v16 = vcombine.low %v626_v6, %v633_v7  ;;  %v6102_v17 = vcombine.high %v626_v6, %v633_v7 }
 0x2f9   :  { %6370 = vmatpush3.xpose.msk.msra.mxu1 %vm1070_vm2, %v702_v12  ;;  %v400_v38 = vcombine.low %v6994_v3, %v6999_v10  ;;  %v704_v48 = vcombine.low %v685_v29, %v701_v9  ;;  %v466_v49 = vcombine.low %v442_v18, %v458_v30  ;;  %v449_v50 = vrot.slane %v435_v58, %v6957_v63 }
 0x2fa   :  { %6374 = vmatprep.subr.mxu1 %v6807_v46  ;;  %v713_v20 = vrot.slane %v706_v14, %v6946_v55  ;;  %v721_v21 = vrot.slane %v6101_v15, %v6946_v55  ;;  %v729_v22 = vrot.slane %v722_v16, %v6946_v55  ;;  %v737_v24 = vrot.slane %v6102_v17, %v6946_v55 }
 0x2fb   :  { %v465_v51 = vrot.slane %v451_v19, %v6957_v63  ;;  %v472_v56 = vmul.f32 0.35355338, %v400_v38  ;;  %v401_v59 = vcombine.high %v6994_v3, %v6999_v10  ;;  %v474_v60 = vmul.f32 0.35355338, %v466_v49 }
 0x2fc   :  { %6372 = vmatmul.mubr.msk.f32.vlgmr.msra.gmra.mxu1 %vm1070_vm2, %v470_v57  ;;  %v738_v31 = vcombine.low %v713_v20, %v721_v21  ;;  %v739_v32 = vcombine.high %v713_v20, %v721_v21  ;;  %v754_v33 = vcombine.low %v729_v22, %v737_v24  ;;  %v755_v34 = vcombine.high %v729_v22, %v737_v24 }
 0x2fd   :  { %6375 = vmatpush3.xpose.msk.msra.mxu1 %vm1070_vm2, %v703_v27  ;;  %6376 = vmatprep.mubr.msk.f32.mxu1 %vm6808_vm1, %v6807_v46  ;;  %v705_v61 = vcombine.high %v685_v29, %v701_v9  ;;  %v468_v62 = vcombine.low %v449_v50, %v465_v51  ;;  %v467_v1 = vcombine.high %v442_v18, %v458_v30  ;;  %v473_v2 = vmul.f32 0.35355338, %v401_v59 }
 0x2fe   :  { %6379 = vmatprep.subr.mxu1 %v6807_v46  ;;  %v746_v36 = vrot.slane %v738_v31, %v6957_v63  ;;  %v762_v37 = vrot.slane %v754_v33, %v6957_v63  ;;  %v753_v53 = vrot.slane %v739_v32, %v6957_v63  ;;  %v769_v54 = vrot.slane %v755_v34, %v6957_v63 }
 0x2ff   :  { %v476_v10 = vmul.f32 0.35355338, %v468_v62  ;;  %v475_v4 = vmul.f32 0.35355338, %v467_v1  ;;  %v469_v5 = vcombine.high %v449_v50, %v465_v51 }
 0x300   :  { %6377 = vmatmul.mubr.msk.f32.vlgmr.msra.gmra.mxu1 %vm1070_vm2, %v471_v35  ;;  %v770_v52 = vcombine.low %v746_v36, %v762_v37  ;;  %v772_v0 = vcombine.low %v753_v53, %v769_v54  ;;  %v771_v3 = vcombine.high %v746_v36, %v762_v37  ;;  %v773_v6 = vcombine.high %v753_v53, %v769_v54 }
 0x301   :  { %6380 = vmatpush3.xpose.msk.msra.mxu1 %vm1070_vm2, %v704_v48  ;;  %6381 = vmatprep.mubr.msk.f32.mxu1 %vm6808_vm1, %v6807_v46  ;;  %v477_v7 = vmul.f32 0.35355338, %v469_v5  ;;  %v29_v48 = vand.u32 127, %v26_v23 }
 0x302   :  { %6390 = vmatpush3.xpose.msk.msra.mxu0 %vm1070_vm2, %v770_v52  ;;  %6384 = vmatprep.subr.mxu1 %v6807_v46 }
 0x303   :  { %6399 = vmatprep.subr.mxu0 %v6807_v46  ;;  %vm7115_vm3 = vcmp.gt.s32.totalorder %v29_v48, %v6876_v25 }
 0x304   :  { %6382 = vmatmul.mubr.msk.f32.vlgmr.msra.gmra.mxu1 %vm1070_vm2, %v472_v56 }
 0x305   :  { %6392 = vmatmul.mubr.msk.f32.vlgmr.msra.gmra.mxu0 %vm1070_vm2, %v474_v60  ;;  %6385 = vmatpush3.xpose.msk.msra.mxu1 %vm1070_vm2, %v705_v61 }
 0x306   :  { %6400 = vmatpush3.xpose.msk.msra.mxu0 %vm1070_vm2, %v772_v0  ;;  %6386 = vmatprep.mubr.msk.f32.mxu1 %vm6808_vm1, %v6807_v46 }
 0x307   :  { %6401 = vmatprep.mubr.msk.f32.mxu0 %vm6808_vm1, %v6807_v46  ;;  %6394 = vmatprep.subr.mxu1 %v6807_v46 }
 0x308   :  { %6387 = vmatmul.mubr.msk.f32.vlgmr.msra.gmra.mxu1 %vm1070_vm2, %v473_v2  ;;  %6409 = vmatprep.subr.mxu0 %v6807_v46 }
 0x309   :  { %6402 = vmatmul.mubr.msk.f32.vlgmr.msra.gmra.mxu0 %vm1070_vm2, %v476_v10  ;;  %6395 = vmatpush3.xpose.msk.msra.mxu1 %vm1070_vm2, %v771_v3 }
 0x30a   :  { %6396 = vmatprep.mubr.msk.f32.mxu1 %vm6808_vm1, %v6807_v46  ;;  %6404 = vmatprep.subr.mxu1 %v6807_v46 }
 0x30b   :  { %6411 = vmatprep.mubr.msk.f32.mxu0 %vm6808_vm1, %v6807_v46 }
 0x30c   :  { %6397 = vmatmul.mubr.msk.f32.vlgmr.msra.gmra.mxu1 %vm1070_vm2, %v475_v4 }
 0x30d   :  { %6405 = vmatpush3.xpose.msk.msra.mxu1 %vm1070_vm2, %v773_v6  ;;  %6406 = vmatprep.mubr.msk.f32.mxu1 %vm6808_vm1, %v6807_v46 }
 0x30e   :  { %6414 = vmatprep.subr.mxu1 %v6807_v46 }
 0x310   :  { %6407 = vmatmul.mubr.msk.f32.vlgmr.msra.gmra.mxu1 %vm1070_vm2, %v477_v7 }
 0x311   :  { %6416 = vmatprep.mubr.msk.f32.mxu1 %vm6808_vm1, %v6807_v46 }
 0x3bc   :  { %v1143_v8 = vpop.f32.mrf.mxu1 }
 0x3bd   :  { %v1679_v21 = vsel %vm1070_vm2, %v1143_v8, -inf }
 0x3be   :  { %v6373_v11 = vpop.f32.mrf.mxu1 }
 0x3c0   :  { %v1219_v12 = vpop.f32.mrf.mxu1 }
 0x3c1   :  { %v1682_v13 = vsel %vm1070_vm2, %v1219_v12, -inf }
 0x3c2   :  { %1683 = vmax.xlane.f32.xlu1 %v1682_v13  ;;  %v6378_v14 = vpop.f32.mrf.mxu1 }
 0x3c4   :  { %v1295_v15 = vpop.f32.mrf.mxu1 }
 0x3c5   :  { %v1447_v16 = vpop.f32.mrf.mxu0  ;;  %v1685_v29 = vsel %vm1070_vm2, %v1295_v15, -inf }
 0x3c6   :  { %v6383_v17 = vpop.f32.mrf.mxu1  ;;  %v1691_v57 = vsel %vm1070_vm2, %v1447_v16, -inf }
 0x3c7   :  { %1692 = vmax.xlane.f32.xlu0 %v1691_v57  ;;  %v6393_v58 = vpop.f32.mrf.mxu0 }
 0x3c8   :  { %v1371_v18 = vpop.f32.mrf.mxu1 }
 0x3c9   :  { %v1599_v19 = vpop.f32.mrf.mxu0  ;;  %v1688_v31 = vsel %vm1070_vm2, %v1371_v18, -inf }
 0x3ca   :  { %v6388_v20 = vpop.f32.mrf.mxu1  ;;  %v1697_v32 = vsel %vm1070_vm2, %v1599_v19, -inf }
 0x3cb   :  { %1680 = vmax.xlane.f32.xlu0 %v1679_v21  ;;  %v6403_v22 = vpop.f32.mrf.mxu0 }
 0x3cc   :  { %v7090_v24 = vpop.f32.mrf.mxu1 }
 0x3cd   :  { %v1694_v33 = vsel %vm1070_vm2, %v7090_v24, -inf }
 0x3ce   :  { %v6398_v27 = vpop.f32.mrf.mxu1 }
 0x3cf   :  { %1686 = vmax.xlane.f32.xlu0 %v1685_v29 }
 0x3d0   :  { %v7093_v9 = vpop.f32.mrf.mxu1 }
 0x3d2   :  { %v6408_v30 = vpop.f32.mrf.mxu1 }
 0x3d3   :  { %1689 = vmax.xlane.f32.xlu0 %v1688_v31  ;;  %778 = vrot.lane.b32.xlu1 %v6911_v42, %s6811_s15  ;;  %v1700_v42 = vsel %vm1070_vm2, %v7093_v9, -inf }
 0x3d7   :  { %1698 = vmax.xlane.f32.xlu0 %v1697_v32  ;;  %782 = vrot.lane.b32.xlu1 %v6909_v41, %s6811_s15 }
 0x3db   :  { %786 = vrot.lane.b32.xlu1 %v6917_v43, %s6811_s15 }
 0x3ed   :  { %774 = vrot.lane.b32.xlu0 %v6893_v40, %s6811_s15 }
 0x3f1   :  { %776 = vrot.lane.b32.xlu0 %v6891_v39, %s6811_s15 }
 0x3ff   :  { %1695 = vmax.xlane.f32.xlu1 %v1694_v33 }
 0x403   :  { %1701 = vmax.xlane.f32.xlu1 %v1700_v42 }
 0x414   :  { %780 = vrot.lane.b32.xlu1 %v6925_v45, %s6811_s15 }
 0x44b   :  { %v1684_v41 = vpop.xlane.xlu1 %1683 }
 0x44c   :  { %v1704_v34 = vsub.f32 %v1219_v12, %v1684_v41 }
 0x44e   :  { %v1713_v43 = vmul.f32 1.442695, %v1704_v34 }
 0x44f   :  { %v779_v36 = vpop.permute.xlu1 %778 }
 0x450   :  { %6684 = vpow2.f32 %v1713_v43  ;;  %v1693_v35 = vpop.xlane.xlu0 %1692 }
 0x451   :  { %v1707_v40 = vsub.f32 %v1447_v16, %v1693_v35 }
 0x453   :  { %v1719_v37 = vmul.f32 1.442695, %v1707_v40  ;;  %v783_v51 = vpop.permute.xlu1 %782 }
 0x454   :  { %v1681_v39 = vpop.xlane.xlu0 %1680 }
 0x455   :  { %6686 = vpow2.f32 %v1719_v37  ;;  %v1703_v38 = vsub.f32 %v1143_v8, %v1681_v39 }
 0x457   :  { %v1711_v49 = vmul.f32 1.442695, %v1703_v38  ;;  %v787_v60 = vpop.permute.xlu1 %786 }
 0x458   :  { %v1687_v50 = vpop.xlane.xlu0 %1686  ;;  %v814_v3 = vcombine.low %v779_v36, %v787_v60  ;;  %v815_v10 = vcombine.high %v779_v36, %v787_v60 }
 0x459   :  { %6688 = vpow2.f32 %v1711_v49  ;;  %v1705_v52 = vsub.f32 %v1295_v15, %v1687_v50 }
 0x45a   :  { %v822_v13 = vrot.slane %v814_v3, %v6946_v55  ;;  %v829_v14 = vrot.slane %v815_v10, %v6946_v55 }
 0x45b   :  { %v1715_v62 = vmul.f32 1.442695, %v1705_v52 }
 0x45c   :  { %v1690_v53 = vpop.xlane.xlu0 %1689 }
 0x45d   :  { %v6685_v54 = vpop.eup %6684  ;;  %v1706_v56 = vsub.f32 %v1371_v18, %v1690_v53 }
 0x45e   :  { %v7121_v59 = vsel %vm7115_vm3, 0.0, %v6685_v54 }
 0x45f   :  { %v1717_v61 = vmul.f32 1.442695, %v1706_v56  ;;  %v1740_v23 = vsel %vm1070_vm2, %v7121_v59, 0.0 }
 0x460   :  { %v1699_v0 = vpop.xlane.xlu0 %1698  ;;  %1741 = vadd.xlane.f32.xlu1 %v1740_v23 }
 0x461   :  { %6690 = vpow2.f32 %v1717_v61  ;;  %v1709_v1 = vsub.f32 %v1599_v19, %v1699_v0 }
 0x462   :  { %v6687_v2 = vpop.eup %6686  ;;  %6692 = vpow2.f32 %v1715_v62 }
 0x463   :  { %v1723_v4 = vmul.f32 1.442695, %v1709_v1  ;;  %v7127_v5 = vsel %vm7115_vm3, 0.0, %v6687_v2 }
 0x464   :  { %v775_v6 = vpop.permute.xlu0 %774  ;;  %v1749_v7 = vsel %vm1070_vm2, %v7127_v5, 0.0 }
 0x465   :  { %6694 = vpow2.f32 %v1723_v4  ;;  %v798_v8 = vcombine.low %v775_v6, %v783_v51  ;;  %v799_v11 = vcombine.high %v775_v6, %v783_v51  ;;  %1750 = vadd.xlane.f32.xlu0 %v1749_v7 }
 0x466   :  { %v6689_v12 = vpop.eup %6688 }
 0x467   :  { %v806_v15 = vrot.slane %v798_v8, %v6946_v55  ;;  %v813_v16 = vrot.slane %v799_v11, %v6946_v55  ;;  %v7137_v17 = vsel %vm7115_vm3, 0.0, %v6689_v12 }
 0x468   :  { %v1737_v57 = vsel %vm1070_vm2, %v7137_v17, 0.0 }
 0x469   :  { %v830_v58 = vcombine.low %v806_v15, %v822_v13  ;;  %v831_v18 = vcombine.high %v806_v15, %v822_v13  ;;  %v846_v19 = vcombine.low %v813_v16, %v829_v14  ;;  %v847_v20 = vcombine.high %v813_v16, %v829_v14  ;;  %1738 = vadd.xlane.f32.xlu0 %v1737_v57  ;;  %v777_v16 = vpop.permute.xlu0 %776 }
 0x46b   :  { %v838_v21 = vrot.slane %v830_v58, %v6957_v63  ;;  %v845_v22 = vrot.slane %v831_v18, %v6957_v63  ;;  %v854_v27 = vrot.slane %v846_v19, %v6957_v63  ;;  %v861_v29 = vrot.slane %v847_v20, %v6957_v63 }
 0x46d   :  { %v934_v30 = vcombine.low %v838_v21, %v845_v22  ;;  %v6103_v31 = vcombine.high %v838_v21, %v845_v22  ;;  %v950_v32 = vcombine.low %v854_v27, %v861_v29  ;;  %v6104_v33 = vcombine.high %v854_v27, %v861_v29 }
 0x46e   :  { %v6691_v42 = vpop.eup %6690 }
 0x46f   :  { %v941_v41 = vrot.slane %v934_v30, %v6946_v55  ;;  %v949_v34 = vrot.slane %v6103_v31, %v6946_v55  ;;  %v957_v43 = vrot.slane %v950_v32, %v6946_v55  ;;  %v965_v35 = vrot.slane %v6104_v33, %v6946_v55  ;;  %v6693_v36 = vpop.eup %6692 }
 0x470   :  { %v7151_v40 = vsel %vm7115_vm3, 0.0, %v6691_v42  ;;  %v1731_v62 = vsel %vm7115_vm3, 0.0, %v6693_v36 }
 0x471   :  { %v1746_v37 = vsel %vm1070_vm2, %v7151_v40, 0.0  ;;  %v966_v39 = vcombine.low %v941_v41, %v949_v34  ;;  %v982_v38 = vcombine.low %v957_v43, %v965_v35  ;;  %v967_v48 = vcombine.high %v941_v41, %v949_v34 }
 0x472   :  { %v6695_v49 = vpop.eup %6694  ;;  %1747 = vadd.xlane.f32.xlu1 %v1746_v37  ;;  %v983_v50 = vcombine.high %v957_v43, %v965_v35  ;;  %v1743_v2 = vsel %vm1070_vm2, %v1731_v62, 0.0 }
 0x473   :  { %v7157_v51 = vsel %vm7115_vm3, 0.0, %v6695_v49  ;;  %v974_v52 = vrot.slane %v966_v39, %v6957_v63  ;;  %v990_v53 = vrot.slane %v982_v38, %v6957_v63  ;;  %v981_v54 = vrot.slane %v967_v48, %v6957_v63 }
 0x474   :  { %v1755_v56 = vsel %vm1070_vm2, %v7157_v51, 0.0  ;;  %v997_v60 = vrot.slane %v983_v50, %v6957_v63 }
 0x475   :  { %1756 = vadd.xlane.f32.xlu0 %v1755_v56  ;;  %v998_v61 = vcombine.low %v974_v52, %v990_v53  ;;  %v999_v23 = vcombine.high %v974_v52, %v990_v53 }
 0x476   :  { %v1001_v0 = vcombine.high %v981_v54, %v997_v60  ;;  %v1000_v1 = vcombine.low %v981_v54, %v997_v60 }
 0x477   :  { %6410 = vmatpush3.msra.mxu0 %v998_v61  ;;  %6415 = vmatpush3.msra.mxu1 %v999_v23 }
 0x478   :  { %6424 = vmatprep.subr.mxu1 %v6807_v46  ;;  %6419 = vmatprep.subr.mxu0 %v6807_v46 }
 0x479   :  { %1744 = vadd.xlane.f32.xlu0 %v1743_v2 }
 0x488   :  { %v1696_v3 = vpop.xlane.xlu1 %1695 }
 0x489   :  { %v1708_v10 = vsub.f32 %v7090_v24, %v1696_v3 }
 0x48b   :  { %v1721_v4 = vmul.f32 1.442695, %v1708_v10 }
 0x48c   :  { %v1702_v6 = vpop.xlane.xlu1 %1701 }
 0x48d   :  { %6696 = vpow2.f32 %v1721_v4  ;;  %v1710_v7 = vsub.f32 %v7093_v9, %v1702_v6 }
 0x48f   :  { %v1725_v8 = vmul.f32 1.442695, %v1710_v7  ;;  %784 = vrot.lane.b32.xlu0 %v6923_v44, %s6811_s15 }
 0x490   :  { %v781_v44 = vpop.permute.xlu1 %780 }
 0x491   :  { %6698 = vpow2.f32 %v1725_v8 }
 0x49a   :  { %v6697_v11 = vpop.eup %6696 }
 0x49b   :  { %v7176_v12 = vsel %vm7115_vm3, 0.0, %v6697_v11 }
 0x49c   :  { %v1752_v13 = vsel %vm1070_vm2, %v7176_v12, 0.0 }
 0x49d   :  { %1753 = vadd.xlane.f32.xlu1 %v1752_v13 }
 0x49e   :  { %v6699_v24 = vpop.eup %6698 }
 0x49f   :  { %v7182_v14 = vsel %vm7115_vm3, 0.0, %v6699_v24 }
 0x4a0   :  { %v1758_v9 = vsel %vm1070_vm2, %v7182_v14, 0.0 }
 0x4a1   :  { %1759 = vadd.xlane.f32.xlu1 %v1758_v9 }
 0x4b2   :  { %788 = vrot.lane.b32.xlu1 %v6932_v47, %s6811_s15 }
 0x4e9   :  { %v1742_v15 = vpop.xlane.xlu1 %1741 }
 0x4ea   :  { %6700 = vrcp.f32 %v1742_v15 }
 0x4ee   :  { %v1751_v57 = vpop.xlane.xlu0 %1750 }
 0x4f2   :  { %v1739_v58 = vpop.xlane.xlu0 %1738 }
 0x4f3   :  { %6702 = vrcp.f32 %v1739_v58 }
 0x4f7   :  { %v6701_v18 = vpop.eup %6700 }
 0x4f8   :  { %v1770_v19 = vmul.f32 %v6701_v18, %v7121_v59 }
 0x4fa   :  { %6417 = vmatmul.mubr.msk.f32.vlgmr.msra.gmra.mxu1 %vm1070_vm2, %v1770_v19 }
 0x4fb   :  { %v1748_v20 = vpop.xlane.xlu1 %1747  ;;  %6425 = vmatpush3.msra.mxu1 %v1001_v0  ;;  %6426 = vmatprep.mubr.msk.f32.mxu1 %vm6808_vm1, %v6807_v46 }
 0x4fc   :  { %6704 = vrcp.f32 %v1748_v20  ;;  %6434 = vmatprep.subr.mxu1 %v6807_v46 }
 0x4fe   :  { %v1757_v47 = vpop.xlane.xlu0 %1756 }
 0x500   :  { %v6703_v21 = vpop.eup %6702 }
 0x501   :  { %v1769_v22 = vmul.f32 %v6703_v21, %v7137_v17 }
 0x502   :  { %v1745_v27 = vpop.xlane.xlu0 %1744 }
 0x503   :  { %6706 = vrcp.f32 %v1745_v27  ;;  %6412 = vmatmul.mubr.msk.f32.vlgmr.msra.gmra.mxu0 %vm1070_vm2, %v1769_v22 }
 0x504   :  { %6420 = vmatpush3.msra.mxu0 %v1000_v1  ;;  %6421 = vmatprep.mubr.msk.f32.mxu0 %vm6808_vm1, %v6807_v46  ;;  %6708 = vrcp.f32 %v1751_v57 }
 0x505   :  { %6429 = vmatprep.subr.mxu0 %v6807_v46 }
 0x506   :  { %v785_v32 = vpop.permute.xlu0 %784 }
 0x507   :  { %v866_v42 = vcombine.low %v777_v16, %v785_v32  ;;  %v867_v41 = vcombine.high %v777_v16, %v785_v32 }
 0x509   :  { %v6705_v59 = vpop.eup %6704  ;;  %v881_v36 = vrot.slane %v867_v41, %v6946_v55 }
 0x50a   :  { %v1772_v29 = vmul.f32 %v6705_v59, %v7151_v40  ;;  %v874_v40 = vrot.slane %v866_v42, %v6946_v55 }
 0x50c   :  { %6427 = vmatmul.mubr.msk.f32.vlgmr.msra.gmra.mxu1 %vm1070_vm2, %v1772_v29 }
 0x50d   :  { %6436 = vmatprep.mubr.msk.f32.mxu1 %vm6808_vm1, %v6807_v46 }
 0x510   :  { %v6707_v30 = vpop.eup %6706 }
 0x511   :  { %v1771_v17 = vmul.f32 %v6707_v30, %v1731_v62  ;;  %v6709_v8 = vpop.eup %6708 }
 0x512   :  { %v1773_v58 = vmul.f32 %v6709_v8, %v7127_v5 }
 0x513   :  { %6422 = vmatmul.mubr.msk.f32.vlgmr.msra.gmra.mxu0 %vm1070_vm2, %v1771_v17 }
 0x514   :  { %6431 = vmatprep.mubr.msk.f32.mxu0 %vm6808_vm1, %v6807_v46 }
 0x526   :  { %v1754_v31 = vpop.xlane.xlu1 %1753 }
 0x527   :  { %6710 = vrcp.f32 %v1754_v31 }
 0x528   :  { %6712 = vrcp.f32 %v1757_v47 }
 0x52a   :  { %v1760_v33 = vpop.xlane.xlu1 %1759 }
 0x52b   :  { %6714 = vrcp.f32 %v1760_v33 }
 0x52e   :  { %v789_v34 = vpop.permute.xlu1 %788 }
 0x52f   :  { %v882_v43 = vcombine.low %v781_v44, %v789_v34  ;;  %v883_v35 = vcombine.high %v781_v44, %v789_v34 }
 0x531   :  { %v890_v37 = vrot.slane %v882_v43, %v6946_v55  ;;  %v897_v39 = vrot.slane %v883_v35, %v6946_v55 }
 0x533   :  { %v898_v38 = vcombine.low %v874_v40, %v890_v37  ;;  %v899_v48 = vcombine.high %v874_v40, %v890_v37  ;;  %v914_v49 = vcombine.low %v881_v36, %v897_v39  ;;  %v915_v50 = vcombine.high %v881_v36, %v897_v39 }
 0x534   :  { %v6711_v11 = vpop.eup %6710 }
 0x535   :  { %v906_v52 = vrot.slane %v898_v38, %v6957_v63  ;;  %v913_v53 = vrot.slane %v899_v48, %v6957_v63  ;;  %v922_v54 = vrot.slane %v914_v49, %v6957_v63  ;;  %v929_v56 = vrot.slane %v915_v50, %v6957_v63  ;;  %v6713_v15 = vpop.eup %6712 }
 0x536   :  { %v1774_v18 = vmul.f32 %v6711_v11, %v7176_v12  ;;  %v1775_v21 = vmul.f32 %v6713_v15, %v7157_v51  ;;  %v6772_v12 = vld [vmem:[%s7992_s1 + $0x20] sm:$0xff]  ;;  %v6773_v51 = vld [vmem:[%s7992_s1 + $0x30] sm:$0xff] }
 0x537   :  { %v1002_v60 = vcombine.low %v906_v52, %v913_v53  ;;  %v6105_v61 = vcombine.high %v906_v52, %v913_v53  ;;  %v1018_v23 = vcombine.low %v922_v54, %v929_v56  ;;  %v6106_v62 = vcombine.high %v922_v54, %v929_v56  ;;  %2677 = vrot.lane.b32.xlu1 %v6772_v12, %s6812_s18 }
 0x538   :  { %v6715_v19 = vpop.eup %6714  ;;  %2679 = vrot.lane.b32.xlu0 %v6773_v51, %s6812_s18 }
 0x539   :  { %v1009_v0 = vrot.slane %v1002_v60, %v6946_v55  ;;  %v1017_v1 = vrot.slane %v6105_v61, %v6946_v55  ;;  %v1025_v2 = vrot.slane %v1018_v23, %v6946_v55  ;;  %v1033_v3 = vrot.slane %v6106_v62, %v6946_v55 }
 0x53a   :  { %v1776_v5 = vmul.f32 %v6715_v19, %v7182_v14  ;;  %v6774_v14 = vld [vmem:[%s7992_s1 + $0x10] sm:$0xff] }
 0x53b   :  { %v1034_v10 = vcombine.low %v1009_v0, %v1017_v1  ;;  %v1050_v4 = vcombine.low %v1025_v2, %v1033_v3  ;;  %v1035_v6 = vcombine.high %v1009_v0, %v1017_v1  ;;  %v1051_v7 = vcombine.high %v1025_v2, %v1033_v3  ;;  %2675 = vrot.lane.b32.xlu1 %v6774_v14, %s6812_s18 }
 0x53d   :  { %v1042_v13 = vrot.slane %v1034_v10, %v6957_v63  ;;  %v1058_v24 = vrot.slane %v1050_v4, %v6957_v63  ;;  %v1049_v9 = vrot.slane %v1035_v6, %v6957_v63  ;;  %v1065_v44 = vrot.slane %v1051_v7, %v6957_v63 }
 0x53f   :  { %v1066_v16 = vcombine.low %v1042_v13, %v1058_v24  ;;  %v1067_v57 = vcombine.high %v1042_v13, %v1058_v24  ;;  %v1068_v20 = vcombine.low %v1049_v9, %v1065_v44  ;;  %v1069_v47 = vcombine.high %v1049_v9, %v1065_v44 }
 0x541   :  { %6430 = vmatpush3.msra.mxu0 %v1066_v16  ;;  %6435 = vmatpush3.msra.mxu1 %v1067_v57 }
 0x542   :  { %6432 = vmatmul.mubr.msk.f32.vlgmr.msra.gmra.mxu0 %vm1070_vm2, %v1773_v58  ;;  %6437 = vmatmul.mubr.msk.f32.vlgmr.msra.gmra.mxu1 %vm1070_vm2, %v1774_v18 }
 0x543   :  { %6439 = vmatprep.subr.mxu0 %v6807_v46  ;;  %6444 = vmatprep.subr.mxu1 %v6807_v46 }
 0x544   :  { %6440 = vmatpush3.msra.mxu0 %v1068_v20  ;;  %6445 = vmatpush3.msra.mxu1 %v1069_v47 }
 0x545   :  { %6441 = vmatprep.mubr.msk.f32.mxu0 %vm6808_vm1, %v6807_v46  ;;  %6446 = vmatprep.mubr.msk.f32.mxu1 %vm6808_vm1, %v6807_v46 }
 0x546   :  { %6442 = vmatmul.mubr.msk.f32.vlgmr.msra.gmra.mxu0 %vm1070_vm2, %v1775_v21  ;;  %6447 = vmatmul.mubr.msk.f32.vlgmr.msra.gmra.mxu1 %vm1070_vm2, %v1776_v5 }
 0x5a9   :  { %v2678_v31 = vpop.permute.xlu1 %2677 }
 0x5aa   :  { %v2680_v32 = vpop.permute.xlu0 %2679 }
 0x5ab   :  { %6449 = vmatprep.subr.mxu0 %v2680_v32 }
 0x5ac   :  { %6450 = vmatpush3.msra.mxu0 %v2680_v32 }
 0x5ad   :  { %6451 = vmatprep.subr.mxu0 %v2678_v31  ;;  %v2676_v34 = vpop.permute.xlu1 %2675 }
 0x5ae   :  { %6452 = vmatpush3.msra.mxu0 %v2678_v31 }
 0x5af   :  { %6453 = vmatprep.subr.mxu0 %v2676_v34 }
 0x5b0   :  { %6454 = vmatpush3.msra.mxu0 %v2676_v34 }
 0x5ba   :  { %v1919_v22 = vpop.f32.mrf.mxu1 }
 0x5bc   :  { %v6418_v27 = vpop.f32.mrf.mxu1 }
 0x5c3   :  { %v1846_v59 = vpop.f32.mrf.mxu0 }
 0x5c5   :  { %v6413_v29 = vpop.f32.mrf.mxu0 }
 0x5cc   :  { %v2065_v30 = vpop.f32.mrf.mxu1 }
 0x5cd   :  { %v2377_v33 = vcombine.low %v1919_v22, %v2065_v30  ;;  %v2378_v42 = vcombine.high %v1919_v22, %v2065_v30 }
 0x5ce   :  { %v6428_v17 = vpop.f32.mrf.mxu1 }
 0x5cf   :  { %v2385_v36 = vrot.slane %v2377_v33, %v6946_v55  ;;  %v2392_v37 = vrot.slane %v2378_v42, %v6946_v55 }
 0x5d3   :  { %v1992_v41 = vpop.f32.mrf.mxu0 }
 0x5d4   :  { %v2361_v43 = vcombine.low %v1846_v59, %v1992_v41  ;;  %v2362_v35 = vcombine.high %v1846_v59, %v1992_v41 }
 0x5d5   :  { %v6423_v40 = vpop.f32.mrf.mxu0 }
 0x5d6   :  { %v2369_v39 = vrot.slane %v2361_v43, %v6946_v55  ;;  %v2376_v38 = vrot.slane %v2362_v35, %v6946_v55 }
 0x5d8   :  { %v2393_v48 = vcombine.low %v2369_v39, %v2385_v36  ;;  %v2394_v49 = vcombine.high %v2369_v39, %v2385_v36  ;;  %v2409_v50 = vcombine.low %v2376_v38, %v2392_v37  ;;  %v2410_v52 = vcombine.high %v2376_v38, %v2392_v37 }
 0x5da   :  { %v2401_v53 = vrot.slane %v2393_v48, %v6957_v63  ;;  %v2408_v54 = vrot.slane %v2394_v49, %v6957_v63  ;;  %v2417_v56 = vrot.slane %v2409_v50, %v6957_v63  ;;  %v2424_v60 = vrot.slane %v2410_v52, %v6957_v63 }
 0x5dc   :  { %v2497_v61 = vcombine.low %v2401_v53, %v2408_v54  ;;  %v6131_v23 = vcombine.high %v2401_v53, %v2408_v54  ;;  %v2513_v62 = vcombine.low %v2417_v56, %v2424_v60  ;;  %v6132_v0 = vcombine.high %v2417_v56, %v2424_v60 }
 0x5de   :  { %v2504_v1 = vrot.slane %v2497_v61, %v6946_v55  ;;  %v2512_v2 = vrot.slane %v6131_v23, %v6946_v55  ;;  %v2520_v3 = vrot.slane %v2513_v62, %v6946_v55  ;;  %v2528_v10 = vrot.slane %v6132_v0, %v6946_v55 }
 0x5e0   :  { %v2530_v4 = vcombine.high %v2504_v1, %v2512_v2  ;;  %v2546_v6 = vcombine.high %v2520_v3, %v2528_v10  ;;  %v2529_v7 = vcombine.low %v2504_v1, %v2512_v2  ;;  %v2545_v8 = vcombine.low %v2520_v3, %v2528_v10  ;;  %v6775_v10 = vld [vmem:[%s7992_s1] sm:$0xff] }
 0x5e2   :  { %v2544_v11 = vrot.slane %v2530_v4, %v6957_v63  ;;  %v2560_v13 = vrot.slane %v2546_v6, %v6957_v63  ;;  %v7262_v24 = vrot.slane %v2529_v7, %v6957_v63  ;;  %v7265_v9 = vrot.slane %v2545_v8, %v6957_v63 }
 0x5e4   :  { %v2563_v44 = vcombine.low %v2544_v11, %v2560_v13  ;;  %v2562_v15 = vcombine.high %v7262_v24, %v7265_v9  ;;  %v2561_v16 = vcombine.low %v7262_v24, %v7265_v9  ;;  %v2564_v57 = vcombine.high %v2544_v11, %v2560_v13 }
 0x5e6   :  { %2643 = vrot.lane.b32.xlu1 %v2563_v44, %s6813_s23  ;;  %2635 = vrot.lane.b32.xlu0 %v2562_v15, %s6814_s24 }
 0x5ea   :  { %2651 = vrot.lane.b32.xlu1 %v2564_v57, %s6815_s25 }
 0x602   :  { %v2138_v58 = vpop.f32.mrf.mxu0  ;;  %v2211_v18 = vpop.f32.mrf.mxu1 }
 0x604   :  { %v6433_v19 = vpop.f32.mrf.mxu0  ;;  %v6438_v20 = vpop.f32.mrf.mxu1 }
 0x605   :  { %v7309_v19 = vld [vmem:[%s7994_s3] sm:$0xff] }
 0x606   :  { %v2284_v47 = vpop.f32.mrf.mxu0  ;;  %v2357_v21 = vpop.f32.mrf.mxu1 }
 0x607   :  { %v2429_v5 = vcombine.low %v2138_v58, %v2284_v47  ;;  %v2430_v12 = vcombine.high %v2138_v58, %v2284_v47  ;;  %v2445_v51 = vcombine.low %v2211_v18, %v2357_v21  ;;  %v2446_v14 = vcombine.high %v2211_v18, %v2357_v21 }
 0x608   :  { %v6443_v22 = vpop.f32.mrf.mxu0  ;;  %v6448_v27 = vpop.f32.mrf.mxu1  ;;  %v2667_v18 = vsub.s32 2, %v6876_v25 }
 0x609   :  { %v2437_v59 = vrot.slane %v2429_v5, %v6946_v55  ;;  %v2444_v29 = vrot.slane %v2430_v12, %v6946_v55  ;;  %v2453_v30 = vrot.slane %v2445_v51, %v6946_v55  ;;  %v2460_v17 = vrot.slane %v2446_v14, %v6946_v55  ;;  %v6777_v12 = vld [vmem:[%s7991_s0 + $0x8] sm:$0xff]  ;;  %v6778_v22 = vld [vmem:[%s7991_s0] sm:$0xff] }
 0x60a   :  { %v2668_v20 = vrot.slane %v7309_v19, %v2667_v18 }
 0x60b   :  { %v2461_v31 = vcombine.low %v2437_v59, %v2453_v30  ;;  %v2462_v32 = vcombine.high %v2437_v59, %v2453_v30  ;;  %v2477_v33 = vcombine.low %v2444_v29, %v2460_v17  ;;  %v2478_v42 = vcombine.high %v2444_v29, %v2460_v17 }
 0x60d   :  { %v2469_v41 = vrot.slane %v2461_v31, %v6957_v63  ;;  %v2476_v34 = vrot.slane %v2462_v32, %v6957_v63  ;;  %v2485_v43 = vrot.slane %v2477_v33, %v6957_v63  ;;  %v2492_v35 = vrot.slane %v2478_v42, %v6957_v63 }
 0x60f   :  { %v2565_v40 = vcombine.low %v2469_v41, %v2476_v34  ;;  %v6133_v36 = vcombine.high %v2469_v41, %v2476_v34  ;;  %v2581_v37 = vcombine.low %v2485_v43, %v2492_v35  ;;  %v6134_v39 = vcombine.high %v2485_v43, %v2492_v35 }
 0x611   :  { %v2572_v38 = vrot.slane %v2565_v40, %v6946_v55  ;;  %v2580_v48 = vrot.slane %v6133_v36, %v6946_v55  ;;  %v2588_v49 = vrot.slane %v2581_v37, %v6946_v55  ;;  %v2596_v50 = vrot.slane %v6134_v39, %v6946_v55  ;;  %v38_v40 = vld [vmem:[%s7992_s1 + $0x38] sm:$0xff]  ;;  %v36_v36 = vld [vmem:[%s7992_s1 + $0x28] sm:$0xff] }
 0x612   :  { %6460 = vmatprep.subr.mxu1 %v38_v40  ;;  %v34_v37 = vld [vmem:[%s7992_s1 + $0x18] sm:$0xff]  ;;  %v32_v39 = vld [vmem:[%s7992_s1 + $0x8] sm:$0xff] }
 0x613   :  { %v2598_v52 = vcombine.high %v2572_v38, %v2580_v48  ;;  %v2614_v53 = vcombine.high %v2588_v49, %v2596_v50  ;;  %v2597_v54 = vcombine.low %v2572_v38, %v2580_v48  ;;  %v2613_v56 = vcombine.low %v2588_v49, %v2596_v50  ;;  %6461 = vmatpush3.msra.mxu1 %v38_v40 }
 0x614   :  { %6462 = vmatprep.subr.mxu1 %v36_v36 }
 0x615   :  { %v2612_v60 = vrot.slane %v2598_v52, %v6957_v63  ;;  %v2628_v61 = vrot.slane %v2614_v53, %v6957_v63  ;;  %v2605_v23 = vrot.slane %v2597_v54, %v6957_v63  ;;  %v2621_v62 = vrot.slane %v2613_v56, %v6957_v63  ;;  %6463 = vmatpush3.msra.mxu1 %v36_v36 }
 0x616   :  { %6464 = vmatprep.subr.mxu1 %v34_v37  ;;  %v2796_v54 = vsub.s32 3, %v6876_v25  ;;  %v2802_v56 = vsub.s32 4, %v6876_v25 }
 0x617   :  { %v2632_v0 = vcombine.high %v2612_v60, %v2628_v61  ;;  %v2630_v1 = vcombine.high %v2605_v23, %v2621_v62  ;;  %v2629_v2 = vcombine.low %v2605_v23, %v2621_v62  ;;  %v2631_v3 = vcombine.low %v2612_v60, %v2628_v61  ;;  %6465 = vmatpush3.msra.mxu1 %v34_v37 }
 0x618   :  { %6466 = vmatprep.subr.mxu1 %v32_v39  ;;  %v2797_v60 = vrot.slane %v7309_v19, %v2796_v54  ;;  %v2803_v62 = vrot.slane %v7309_v19, %v2802_v56 }
 0x619   :  { %2653 = vrot.lane.b32.xlu1 %v2632_v0, %s6815_s25  ;;  %2637 = vrot.lane.b32.xlu0 %v2630_v1, %s6814_s24 }
 0x61a   :  { %6467 = vmatpush3.msra.mxu1 %v32_v39 }
 0x61d   :  { %2645 = vrot.lane.b32.xlu0 %v2631_v3, %s6813_s23 }
 0x621   :  { %2673 = vrot.lane.b32.xlu0 %v6775_v10, %s6812_s18 }
 0x658   :  { %v2644_v4 = vpop.permute.xlu1 %2643  ;;  %v2636_v6 = vpop.permute.xlu0 %2635 }
 0x659   :  { %v2657_v7 = vsel %vm1070_vm2, %v2561_v16, %v2636_v6  ;;  %v54_v6 = vld [vmem:[%s7993_s2 + $0x78] sm:$0xff] }
 0x65a   :  { %v2660_v11 = vsel %vm2659_vm4, %v2657_v7, %v2644_v4  ;;  %v53_v7 = vld [vmem:[%s7993_s2 + $0x70] sm:$0xff] }
 0x65c   :  { %v2652_v8 = vpop.permute.xlu1 %2651 }
 0x65d   :  { %v2663_v13 = vsel %vm2662_vm5, %v2660_v11, %v2652_v8  ;;  %v52_v8 = vld [vmem:[%s7993_s2 + $0x68] sm:$0xff]  ;;  %v51_v11 = vld [vmem:[%s7993_s2 + $0x60] sm:$0xff] }
 0x65e   :  { %6457 = vmatprep.mubr.msk.f32.mxu0 %vm57_vm0, %v2663_v13  ;;  %v50_v13 = vld [vmem:[%s7993_s2 + $0x58] sm:$0xff] }
 0x68b   :  { %v2638_v24 = vpop.permute.xlu0 %2637  ;;  %v2654_v58 = vpop.permute.xlu1 %2653 }
 0x68c   :  { %v2658_v44 = vsel %vm1070_vm2, %v2629_v2, %v2638_v24  ;;  %v49_v24 = vld [vmem:[%s7993_s2 + $0x50] sm:$0xff] }
 0x68f   :  { %v2646_v9 = vpop.permute.xlu0 %2645 }
 0x690   :  { %v2661_v15 = vsel %vm2659_vm4, %v2658_v44, %v2646_v9  ;;  %v48_v9 = vld [vmem:[%s7993_s2 + $0x48] sm:$0xff]  ;;  %v47_v44 = vld [vmem:[%s7993_s2 + $0x40] sm:$0xff] }
 0x691   :  { %v2664_v16 = vsel %vm2662_vm5, %v2661_v15, %v2654_v58  ;;  %v46_v15 = vld [vmem:[%s7993_s2 + $0x38] sm:$0xff]  ;;  %v44_v58 = vld [vmem:[%s7993_s2 + $0x28] sm:$0xff] }
 0x693   :  { %v2674_v57 = vpop.permute.xlu0 %2673 }
 0x694   :  { %6455 = vmatprep.subr.mxu0 %v2674_v57 }
 0x695   :  { %6456 = vmatpush3.msra.mxu0 %v2674_v57  ;;  %v45_v57 = vld [vmem:[%s7993_s2 + $0x30] sm:$0xff] }
 0x696   :  { %6458 = vmatmul.mubr.msk.f32.vlgmr.msra.gmra.mxu0 %vm57_vm0, %v2664_v16  ;;  %6471 = vmatprep.subr.mxu0 %v54_v6  ;;  %v43_v16 = vld [vmem:[%s7993_s2 + $0x20] sm:$0xff] }
 0x697   :  { %6472 = vmatpush3.msra.mxu0 %v54_v6 }
 0x698   :  { %6473 = vmatprep.subr.mxu0 %v53_v7 }
 0x699   :  { %6474 = vmatpush3.msra.mxu0 %v53_v7 }
 0x69a   :  { %6475 = vmatprep.subr.mxu0 %v52_v8 }
 0x69b   :  { %6476 = vmatpush3.msra.mxu0 %v52_v8 }
 0x69c   :  { %6477 = vmatprep.subr.mxu0 %v51_v11 }
 0x69d   :  { %6478 = vmatpush3.msra.mxu0 %v51_v11 }
 0x69e   :  { %6479 = vmatprep.subr.mxu0 %v50_v13 }
 0x69f   :  { %6480 = vmatpush3.msra.mxu0 %v50_v13 }
 0x6a0   :  { %6481 = vmatprep.subr.mxu0 %v49_v24 }
 0x6a1   :  { %6482 = vmatpush3.msra.mxu0 %v49_v24  ;;  %v7429_v24 = vld [vmem:[%s7992_s1 + $0x70] sm:$0xff] }
 0x6a2   :  { %6483 = vmatprep.subr.mxu0 %v48_v9  ;;  %6506 = vmatprep.subr.mxu1 %v7429_v24 }
 0x6a3   :  { %6484 = vmatpush3.msra.mxu0 %v48_v9  ;;  %v7434_v9 = vld [vmem:[%s7992_s1 + $0x60] sm:$0xff] }
 0x6a4   :  { %6485 = vmatprep.subr.mxu0 %v47_v44 }
 0x6a5   :  { %6486 = vmatpush3.msra.mxu0 %v47_v44  ;;  %v7441_v44 = vld [vmem:[%s7992_s1 + $0x50] sm:$0xff] }
 0x6a6   :  { %6487 = vmatprep.subr.mxu0 %v46_v15 }
 0x6a7   :  { %6488 = vmatpush3.msra.mxu0 %v46_v15  ;;  %v6140_v15 = vld [vmem:[%s7992_s1 + $0x40] sm:$0xff] }
 0x6a8   :  { %6489 = vmatprep.subr.mxu0 %v45_v57 }
 0x6a9   :  { %6490 = vmatpush3.msra.mxu0 %v45_v57 }
 0x6aa   :  { %6491 = vmatprep.subr.mxu0 %v44_v58 }
 0x6ab   :  { %6492 = vmatpush3.msra.mxu0 %v44_v58 }
 0x6ac   :  { %6493 = vmatprep.subr.mxu0 %v43_v16 }
 0x6ad   :  { %6494 = vmatpush3.msra.mxu0 %v43_v16 }
 0x756   :  { %v6459_v47 = vpop.f32.mrf.mxu0 }
 0x757   :  { %v2763_v21 = vadd.f32 %v6459_v47, %v2668_v20  ;;  %v41_v47 = vld [vmem:[%s7993_s2 + $0x10] sm:$0xff] }
 0x758   :  { %v2757_v5 = vpop.f32.mrf.mxu0 }
 0x759   :  { %v7317_v51 = vadd.f32 %v6777_v12, %v2763_v21  ;;  %v2758_v14 = vadd.f32 %v2757_v5, %v2668_v20  ;;  %v42_v20 = vld [vmem:[%s7993_s2 + $0x18] sm:$0xff]  ;;  %v40_v21 = vld [vmem:[%s7993_s2 + $0x8] sm:$0xff]  ;;  %v39_v5 = vld [vmem:[%s7993_s2] sm:$0xff] }
 0x75a   :  { %6495 = vmatprep.subr.mxu0 %v42_v20  ;;  %v6137_v12 = vld [vmem:[%s7995_s4] ss:$0 sm:$0xff] }
 0x75b   :  { %v7322_v27 = vadd.f32 %v6778_v22, %v2758_v14  ;;  %v2771_v59 = vsel %vm57_vm0, %v7317_v51, 0.0  ;;  %6496 = vmatpush3.msra.mxu0 %v42_v20 }
 0x75c   :  { %2772 = vadd.xlane.f32.xlu1 %v2771_v59  ;;  %6497 = vmatprep.subr.mxu0 %v41_v47 }
 0x75d   :  { %v2768_v29 = vsel %vm57_vm0, %v7322_v27, 0.0  ;;  %6498 = vmatpush3.msra.mxu0 %v41_v47 }
 0x75e   :  { %2769 = vadd.xlane.f32.xlu0 %v2768_v29  ;;  %6499 = vmatprep.subr.mxu0 %v40_v21 }
 0x75f   :  { %6500 = vmatpush3.msra.mxu0 %v40_v21 }
 0x760   :  { %6501 = vmatprep.subr.mxu0 %v39_v5 }
 0x761   :  { %6502 = vmatpush3.msra.mxu0 %v39_v5  ;;  %v6164_v5 = vld [vmem:[%s7994_s3 + $0x8] sm:$0xff] }
 0x762   :  { %6547 = vmatprep.subr.mxu0 %v6807_v46 }
 0x7e5   :  { %v2773_v30 = vpop.xlane.xlu1 %2772 }
 0x7e6   :  { %v2775_v17 = vmul.f32 0.03125, %v2773_v30 }
 0x7e7   :  { %v2770_v31 = vpop.xlane.xlu0 %2769 }
 0x7e8   :  { %v2774_v32 = vmul.f32 0.03125, %v2770_v31  ;;  %v2777_v33 = vsub.f32 %v7317_v51, %v2775_v17 }
 0x7ea   :  { %v2776_v42 = vsub.f32 %v7322_v27, %v2774_v32  ;;  %v2779_v43 = vmul.f32 %v2777_v33, %v2777_v33 }
 0x7ec   :  { %v2778_v41 = vmul.f32 %v2776_v42, %v2776_v42  ;;  %v2783_v35 = vsel %vm57_vm0, %v2779_v43, 0.0 }
 0x7ee   :  { %v2780_v34 = vsel %vm57_vm0, %v2778_v41, 0.0 }
 0x7ef   :  { %2781 = vadd.xlane.f32.xlu0 %v2780_v34 }
 0x7f3   :  { %2784 = vadd.xlane.f32.xlu0 %v2783_v35 }
 0x878   :  { %v2782_v38 = vpop.xlane.xlu0 %2781 }
 0x879   :  { %v2786_v48 = vmul.f32 0.03125, %v2782_v38 }
 0x87b   :  { %v2788_v49 = vadd.f32 1e-05, %v2786_v48 }
 0x87c   :  { %v2785_v50 = vpop.xlane.xlu0 %2784 }
 0x87d   :  { %6716 = vrsqrt.f32 %v2788_v49  ;;  %v2787_v52 = vmul.f32 0.03125, %v2785_v50 }
 0x87f   :  { %v2789_v53 = vadd.f32 1e-05, %v2787_v52  ;;  %v2913_v52 = vsub.s32 5, %v6876_v25 }
 0x881   :  { %6718 = vrsqrt.f32 %v2789_v53  ;;  %v2914_v53 = vrot.slane %v7309_v19, %v2913_v52 }
 0x88a   :  { %v6717_v61 = vpop.eup %6716 }
 0x88b   :  { %v2792_v23 = vmul.f32 %v6717_v61, %v2776_v42 }
 0x88d   :  { %v2798_v0 = vmul.f32 %v2797_v60, %v2792_v23 }
 0x88e   :  { %v6719_v1 = vpop.eup %6718 }
 0x88f   :  { %v2793_v2 = vmul.f32 %v6719_v1, %v2777_v33  ;;  %v2804_v3 = vadd.f32 %v2803_v62, %v2798_v0 }
 0x891   :  { %v2799_v10 = vmul.f32 %v2797_v60, %v2793_v2  ;;  %6468 = vmatprep.mubr.msk.f32.mxu1 %vm57_vm0, %v2804_v3 }
 0x893   :  { %v2805_v4 = vadd.f32 %v2803_v62, %v2799_v10 }
 0x895   :  { %6469 = vmatmul.mubr.msk.f32.vlgmr.msra.gmra.mxu1 %vm57_vm0, %v2805_v4 }
 0x896   :  { %6507 = vmatpush3.msra.mxu1 %v7429_v24 }
 0x897   :  { %6508 = vmatprep.subr.mxu1 %v7434_v9 }
 0x898   :  { %6509 = vmatpush3.msra.mxu1 %v7434_v9 }
 0x899   :  { %6510 = vmatprep.subr.mxu1 %v7441_v44 }
 0x89a   :  { %6511 = vmatpush3.msra.mxu1 %v7441_v44 }
 0x89b   :  { %6512 = vmatprep.subr.mxu1 %v6140_v15 }
 0x89c   :  { %6513 = vmatpush3.msra.mxu1 %v6140_v15 }
 0x89d   :  { %6517 = vmatprep.subr.mxu1 %v6807_v46 }
 0x955   :  { %v6470_v14 = vpop.f32.mrf.mxu1 }
 0x956   :  { %v2890_v22 = vadd.f32 %v6470_v14, %v6137_v12  ;;  %v3051_v14 = vrot.slane %v6164_v5, %v6879_v26 }
 0x957   :  { %v2884_v59 = vpop.f32.mrf.mxu1 }
 0x958   :  { %v2896_v29 = vmul.f32 0.044715, %v2890_v22  ;;  %v2885_v30 = vadd.f32 %v6137_v12, %v2884_v59  ;;  %v2894_v48 = vmul.f32 0.5, %v2890_v22 }
 0x95a   :  { %v2898_v17 = vmul.f32 %v2896_v29, %v2890_v22  ;;  %v2895_v31 = vmul.f32 0.044715, %v2885_v30  ;;  %v2893_v39 = vmul.f32 0.5, %v2885_v30 }
 0x95c   :  { %v2900_v32 = vmul.f32 %v2898_v17, %v2890_v22  ;;  %v2897_v33 = vmul.f32 %v2895_v31, %v2885_v30  ;;  %v3057_v17 = vrot.slane %v6164_v5, %v6885_v28 }
 0x95e   :  { %v2902_v42 = vadd.f32 %v2900_v32, %v2890_v22  ;;  %v2899_v41 = vmul.f32 %v2897_v33, %v2885_v30 }
 0x960   :  { %v2901_v34 = vadd.f32 %v2899_v41, %v2885_v30  ;;  %v2904_v43 = vmul.f32 0.7978846, %v2902_v42 }
 0x962   :  { %v2903_v35 = vmul.f32 0.7978846, %v2901_v34  ;;  %6720 = vtanh.f32 %v2904_v43 }
 0x964   :  { %6722 = vtanh.f32 %v2903_v35 }
 0x96f   :  { %v6721_v40 = vpop.eup %6720 }
 0x970   :  { %v2908_v37 = vadd.f32 1.0, %v6721_v40 }
 0x971   :  { %v6723_v36 = vpop.eup %6722 }
 0x972   :  { %v2907_v38 = vadd.f32 1.0, %v6723_v36  ;;  %v2910_v50 = vmul.f32 %v2908_v37, %v2894_v48 }
 0x974   :  { %v2909_v49 = vmul.f32 %v2907_v38, %v2893_v39 }
 0x976   :  { %6503 = vmatprep.mubr.f32.mxu0 %v2909_v49 }
 0x977   :  { %6504 = vmatmul.mubr.f32.vlgmr.msra.gmra.mxu0 %v2910_v50 }
 0x978   :  { %6549 = vmatprep.mubr.msk.f32.mxu0 %vm6808_vm1, %v6807_v46 }
 0xa37   :  { %v6505_v60 = vpop.f32.mrf.mxu0 }
 0xa38   :  { %v2987_v61 = vadd.f32 %v6505_v60, %v2914_v53 }
 0xa39   :  { %v2981_v23 = vpop.f32.mrf.mxu0 }
 0xa3a   :  { %v7413_v62 = vadd.f32 %v2987_v61, %v7317_v51  ;;  %v2982_v0 = vadd.f32 %v2981_v23, %v2914_v53 }
 0xa3c   :  { %v7416_v1 = vadd.f32 %v2982_v0, %v7322_v27  ;;  %v3025_v2 = vsel %vm57_vm0, %v7413_v62, 0.0 }
 0xa3d   :  { %3026 = vadd.xlane.f32.xlu1 %v3025_v2 }
 0xa3e   :  { %v3022_v3 = vsel %vm57_vm0, %v7416_v1, 0.0 }
 0xa3f   :  { %3023 = vadd.xlane.f32.xlu0 %v3022_v3 }
 0xac6   :  { %v3027_v10 = vpop.xlane.xlu1 %3026 }
 0xac7   :  { %v3029_v19 = vmul.f32 0.03125, %v3027_v10 }
 0xac8   :  { %v3024_v4 = vpop.xlane.xlu0 %3023 }
 0xac9   :  { %v3031_v6 = vsub.f32 %v7413_v62, %v3029_v19  ;;  %v3028_v7 = vmul.f32 0.03125, %v3024_v4 }
 0xacb   :  { %v3030_v51 = vsub.f32 %v7416_v1, %v3028_v7  ;;  %v3033_v8 = vmul.f32 %v3031_v6, %v3031_v6 }
 0xacd   :  { %v3037_v27 = vsel %vm57_vm0, %v3033_v8, 0.0  ;;  %v3032_v11 = vmul.f32 %v3030_v51, %v3030_v51 }
 0xace   :  { %3038 = vadd.xlane.f32.xlu1 %v3037_v27 }
 0xacf   :  { %v3034_v13 = vsel %vm57_vm0, %v3032_v11, 0.0 }
 0xad0   :  { %3035 = vadd.xlane.f32.xlu0 %v3034_v13 }
 0xb57   :  { %v3039_v57 = vpop.xlane.xlu1 %3038 }
 0xb58   :  { %v3041_v58 = vmul.f32 0.03125, %v3039_v57 }
 0xb59   :  { %v3036_v16 = vpop.xlane.xlu0 %3035 }
 0xb5a   :  { %v3043_v20 = vadd.f32 1e-05, %v3041_v58  ;;  %v3040_v47 = vmul.f32 0.03125, %v3036_v16 }
 0xb5c   :  { %6724 = vrsqrt.f32 %v3043_v20  ;;  %v3042_v21 = vadd.f32 1e-05, %v3040_v47 }
 0xb5e   :  { %6726 = vrsqrt.f32 %v3042_v21 }
 0xb69   :  { %v6725_v12 = vpop.eup %6724 }
 0xb6a   :  { %v3047_v22 = vmul.f32 %v6725_v12, %v3031_v6 }
 0xb6b   :  { %v6727_v59 = vpop.eup %6726 }
 0xb6c   :  { %v3046_v29 = vmul.f32 %v6727_v59, %v3030_v51  ;;  %v3053_v30 = vmul.f32 %v3051_v14, %v3047_v22 }
 0xb6e   :  { %v3052_v31 = vmul.f32 %v3051_v14, %v3046_v29  ;;  %v3059_v33 = vadd.f32 %v3057_v17, %v3053_v30 }
 0xb70   :  { %v3058_v32 = vadd.f32 %v3057_v17, %v3052_v31 }
 0xb72   :  { %6514 = vmatprep.mubr.msk.f32.mxu1 %vm57_vm0, %v3058_v32 }
 0xb73   :  { %6515 = vmatmul.mubr.msk.f32.vlgmr.msra.gmra.mxu1 %vm57_vm0, %v3059_v33 }
 0xb74   :  { %6519 = vmatprep.mubr.msk.f32.mxu1 %vm6808_vm1, %v6807_v46 }
 0xc33   :  { %v7460_v42 = vpop.f32.mrf.mxu1 }
 0xc35   :  { %v7462_v41 = vpop.f32.mrf.mxu1 }
 0xc36   :  { %3149 = vrot.lane.b32.xlu1 %v7462_v41, %s6803_s11  ;;  %3143 = vrot.lane.b32.xlu0 %v7462_v41, %s6804_s12 }
 0xc3a   :  { %3155 = vrot.lane.b32.xlu1 %v7462_v41, %s6805_s13  ;;  %3151 = vrot.lane.b32.xlu0 %v7460_v42, %s6803_s11 }
 0xc3e   :  { %3145 = vrot.lane.b32.xlu1 %v7460_v42, %s6804_s12  ;;  %3441 = vrot.lane.b32.xlu0 %v7462_v41, %s6806_s14 }
 0xc42   :  { %3157 = vrot.lane.b32.xlu1 %v7460_v42, %s6805_s13 }
 0xca8   :  { %v7478_v34 = vpop.permute.xlu1 %3149  ;;  %v7480_v43 = vpop.permute.xlu0 %3143 }
 0xca9   :  { %3449 = vrot.lane.b32.xlu0 %v7478_v34, %s6806_s14  ;;  %3445 = vrot.lane.b32.xlu1 %v7480_v43, %s6806_s14  ;;  %v3161_v38 = vcombine.low %v7462_v41, %v7478_v34  ;;  %v3162_v49 = vcombine.high %v7462_v41, %v7478_v34 }
 0xcab   :  { %v3169_v53 = vrot.slane %v3161_v38, %v6946_v55  ;;  %v3176_v61 = vrot.slane %v3162_v49, %v6946_v55 }
 0xcac   :  { %v7486_v35 = vpop.permute.xlu1 %3155  ;;  %v7492_v40 = vpop.permute.xlu0 %3151 }
 0xcad   :  { %3443 = vrot.lane.b32.xlu0 %v7460_v42, %s6806_s14  ;;  %3453 = vrot.lane.b32.xlu1 %v7486_v35, %s6806_s14  ;;  %v3177_v39 = vcombine.low %v7480_v43, %v7486_v35  ;;  %v3178_v48 = vcombine.high %v7480_v43, %v7486_v35  ;;  %v3229_v11 = vcombine.low %v7460_v42, %v7492_v40 }
 0xcae   :  { %v3230_v15 = vcombine.high %v7460_v42, %v7492_v40 }
 0xcaf   :  { %v3185_v50 = vrot.slane %v3177_v39, %v6946_v55  ;;  %v3192_v60 = vrot.slane %v3178_v48, %v6946_v55  ;;  %v3237_v12 = vrot.slane %v3229_v11, %v6946_v55 }
 0xcb0   :  { %v7494_v36 = vpop.permute.xlu1 %3145  ;;  %v3442_v51 = vpop.permute.xlu0 %3441  ;;  %v3244_v22 = vrot.slane %v3230_v15, %v6946_v55 }
 0xcb1   :  { %3451 = vrot.lane.b32.xlu0 %v7492_v40, %s6806_s14  ;;  %3447 = vrot.lane.b32.xlu1 %v7494_v36, %s6806_s14  ;;  %v3193_v23 = vcombine.low %v3169_v53, %v3185_v50  ;;  %v3194_v0 = vcombine.high %v3169_v53, %v3185_v50  ;;  %v3209_v2 = vcombine.low %v3176_v61, %v3192_v60 }
 0xcb2   :  { %v3210_v3 = vcombine.high %v3176_v61, %v3192_v60 }
 0xcb3   :  { %v3201_v10 = vrot.slane %v3193_v23, %v6957_v63  ;;  %v3208_v19 = vrot.slane %v3194_v0, %v6957_v63  ;;  %v3217_v4 = vrot.slane %v3209_v2, %v6957_v63 }
 0xcb4   :  { %v7500_v37 = vpop.permute.xlu1 %3157  ;;  %v3224_v6 = vrot.slane %v3210_v3, %v6957_v63 }
 0xcb5   :  { %3455 = vrot.lane.b32.xlu1 %v7500_v37, %s6806_s14  ;;  %v3245_v7 = vcombine.low %v7494_v36, %v7500_v37  ;;  %v3297_v8 = vcombine.low %v3201_v10, %v3208_v19  ;;  %v6168_v27 = vcombine.high %v3201_v10, %v3208_v19  ;;  %v3246_v13 = vcombine.high %v7494_v36, %v7500_v37 }
 0xcb6   :  { %v3313_v57 = vcombine.low %v3217_v4, %v3224_v6  ;;  %v6169_v58 = vcombine.high %v3217_v4, %v3224_v6 }
 0xcb7   :  { %v3253_v16 = vrot.slane %v3245_v7, %v6946_v55  ;;  %v3304_v21 = vrot.slane %v3297_v8, %v6946_v55  ;;  %v3312_v5 = vrot.slane %v6168_v27, %v6946_v55  ;;  %v3260_v14 = vrot.slane %v3246_v13, %v6946_v55 }
 0xcb8   :  { %v7535_v59 = vrot.slane %v3313_v57, %v6946_v55  ;;  %v7538_v29 = vrot.slane %v6169_v58, %v6946_v55 }
 0xcb9   :  { %v3261_v30 = vcombine.low %v3237_v12, %v3253_v16  ;;  %v3262_v17 = vcombine.high %v3237_v12, %v3253_v16  ;;  %v3277_v39 = vcombine.low %v3244_v22, %v3260_v14  ;;  %v3278_v38 = vcombine.high %v3244_v22, %v3260_v14 }
 0xcba   :  { %v3329_v49 = vcombine.low %v3304_v21, %v3312_v5  ;;  %v3345_v23 = vcombine.low %v7535_v59, %v7538_v29  ;;  %v3330_v0 = vcombine.high %v3304_v21, %v3312_v5  ;;  %v3346_v8 = vcombine.high %v7535_v59, %v7538_v29 }
 0xcbb   :  { %v3269_v60 = vrot.slane %v3261_v30, %v6957_v63  ;;  %v3276_v61 = vrot.slane %v3262_v17, %v6957_v63  ;;  %v3285_v4 = vrot.slane %v3277_v39, %v6957_v63  ;;  %v3292_v6 = vrot.slane %v3278_v38, %v6957_v63 }
 0xcbd   :  { %v3365_v58 = vcombine.low %v3269_v60, %v3276_v61  ;;  %v6170_v16 = vcombine.high %v3269_v60, %v3276_v61  ;;  %v3381_v22 = vcombine.low %v3285_v4, %v3292_v6  ;;  %v6171_v59 = vcombine.high %v3285_v4, %v3292_v6 }
 0xcbf   :  { %v7583_v4 = vrot.slane %v6171_v59, %v6946_v55 }
 0xd1b   :  { %v3446_v20 = vpop.permute.xlu1 %3445  ;;  %v3450_v47 = vpop.permute.xlu0 %3449 }
 0xd1c   :  { %v3465_v31 = vcombine.low %v3442_v51, %v3450_v47  ;;  %v3466_v32 = vcombine.high %v3442_v51, %v3450_v47  ;;  %v7551_v51 = vrot.slane %v3329_v49, %v6957_v63  ;;  %v7559_v47 = vrot.slane %v3330_v0, %v6957_v63 }
 0xd1d   :  { %v7569_v49 = vrot.slane %v6170_v16, %v6946_v55 }
 0xd1e   :  { %v3473_v2 = vrot.slane %v3465_v31, %v6946_v55  ;;  %v3480_v3 = vrot.slane %v3466_v32, %v6946_v55 }
 0xd1f   :  { %v3444_v33 = vpop.permute.xlu0 %3443  ;;  %v3454_v48 = vpop.permute.xlu1 %3453 }
 0xd20   :  { %v3481_v50 = vcombine.low %v3446_v20, %v3454_v48  ;;  %v3482_v53 = vcombine.high %v3446_v20, %v3454_v48  ;;  %v7556_v20 = vrot.slane %v3345_v23, %v6957_v63  ;;  %v7566_v48 = vrot.slane %v3365_v58, %v6946_v55 }
 0xd22   :  { %v3489_v10 = vrot.slane %v3481_v50, %v6946_v55  ;;  %v3496_v19 = vrot.slane %v3482_v53, %v6946_v55  ;;  %v3361_v16 = vcombine.low %v7551_v51, %v7556_v20 }
 0xd23   :  { %v3448_v7 = vpop.permute.xlu1 %3447  ;;  %v3452_v57 = vpop.permute.xlu0 %3451 }
 0xd24   :  { %v3497_v27 = vcombine.low %v3473_v2, %v3489_v10  ;;  %v3498_v11 = vcombine.high %v3473_v2, %v3489_v10  ;;  %v3513_v13 = vcombine.low %v3480_v3, %v3496_v19  ;;  %v3514_v15 = vcombine.high %v3480_v3, %v3496_v19 }
 0xd25   :  { %v3533_v29 = vcombine.low %v3444_v33, %v3452_v57  ;;  %v3534_v30 = vcombine.high %v3444_v33, %v3452_v57  ;;  %v7580_v19 = vrot.slane %v3381_v22, %v6946_v55 }
 0xd26   :  { %v3505_v21 = vrot.slane %v3497_v27, %v6957_v63  ;;  %v3512_v5 = vrot.slane %v3498_v11, %v6957_v63  ;;  %v3521_v12 = vrot.slane %v3513_v13, %v6957_v63  ;;  %v3528_v14 = vrot.slane %v3514_v15, %v6957_v63 }
 0xd27   :  { %v3456_v17 = vpop.permute.xlu1 %3455  ;;  %v3541_v0 = vrot.slane %v3533_v29, %v6946_v55  ;;  %v3548_v2 = vrot.slane %v3534_v30, %v6946_v55 }
 0xd28   :  { %v3601_v31 = vcombine.low %v3505_v21, %v3512_v5  ;;  %v6172_v32 = vcombine.high %v3505_v21, %v3512_v5  ;;  %v3617_v39 = vcombine.low %v3521_v12, %v3528_v14  ;;  %v6173_v38 = vcombine.high %v3521_v12, %v3528_v14 }
 0xd29   :  { %v3549_v50 = vcombine.low %v3448_v7, %v3456_v17  ;;  %v3550_v53 = vcombine.high %v3448_v7, %v3456_v17  ;;  %v3398_v21 = vcombine.high %v7566_v48, %v7569_v49  ;;  %v3414_v17 = vcombine.high %v7580_v19, %v7583_v4 }
 0xd2a   :  { %v3608_v60 = vrot.slane %v3601_v31, %v6946_v55  ;;  %v3616_v61 = vrot.slane %v6172_v32, %v6946_v55  ;;  %v3624_v23 = vrot.slane %v3617_v39, %v6946_v55  ;;  %v3632_v33 = vrot.slane %v6173_v38, %v6946_v55 }
 0xd2b   :  { %v3557_v3 = vrot.slane %v3549_v50, %v6946_v55  ;;  %v3564_v10 = vrot.slane %v3550_v53, %v6946_v55  ;;  %v3433_v50 = vmul.f32 0.35355338, %v3361_v16  ;;  %v3362_v53 = vcombine.high %v7551_v51, %v7556_v20 }
 0xd2c   :  { %v3633_v6 = vcombine.low %v3608_v60, %v3616_v61  ;;  %v3649_v7 = vcombine.low %v3624_v23, %v3632_v33  ;;  %v3634_v59 = vcombine.high %v3608_v60, %v3616_v61  ;;  %v3650_v29 = vcombine.high %v3624_v23, %v3632_v33 }
 0xd2d   :  { %v3565_v27 = vcombine.low %v3541_v0, %v3557_v3  ;;  %v3566_v11 = vcombine.high %v3541_v0, %v3557_v3  ;;  %v3581_v13 = vcombine.low %v3548_v2, %v3564_v10  ;;  %v3582_v15 = vcombine.high %v3548_v2, %v3564_v10 }
 0xd2e   :  { %v3641_v57 = vrot.slane %v3633_v6, %v6957_v63  ;;  %v3657_v58 = vrot.slane %v3649_v7, %v6957_v63  ;;  %v3360_v0 = vrot.slane %v3346_v8, %v6957_v63  ;;  %v7602_v2 = vrot.slane %v3398_v21, %v6957_v63 }
 0xd2f   :  { %v3573_v5 = vrot.slane %v3565_v27, %v6957_v63  ;;  %v3580_v12 = vrot.slane %v3566_v11, %v6957_v63  ;;  %v3589_v14 = vrot.slane %v3581_v13, %v6957_v63  ;;  %v3596_v22 = vrot.slane %v3582_v15, %v6957_v63 }
 0xd30   :  { %v3665_v30 = vcombine.low %v3641_v57, %v3657_v58  ;;  %v3666_v3 = vcombine.high %v3641_v57, %v3657_v58  ;;  %v3648_v10 = vrot.slane %v3634_v59, %v6957_v63  ;;  %v3664_v51 = vrot.slane %v3650_v29, %v6957_v63 }
 0xd31   :  { %v3669_v31 = vcombine.low %v3573_v5, %v3580_v12  ;;  %v6174_v32 = vcombine.high %v3573_v5, %v3580_v12  ;;  %v3685_v39 = vcombine.low %v3589_v14, %v3596_v22  ;;  %v6175_v38 = vcombine.high %v3589_v14, %v3596_v22 }
 0xd32   :  { %6518 = vmatpush3.xpose.msk.msra.mxu1 %vm1070_vm2, %v3665_v30  ;;  %v3428_v8 = vrot.slane %v3414_v17, %v6957_v63  ;;  %v3434_v7 = vmul.f32 0.35355338, %v3362_v53  ;;  %v3363_v27 = vcombine.low %v7559_v47, %v3360_v0  ;;  %v3397_v15 = vcombine.low %v7566_v48, %v7569_v49 }
 0xd33   :  { %v3676_v60 = vrot.slane %v3669_v31, %v6946_v55  ;;  %v3684_v61 = vrot.slane %v6174_v32, %v6946_v55  ;;  %v3692_v23 = vrot.slane %v3685_v39, %v6946_v55  ;;  %v3700_v33 = vrot.slane %v6175_v38, %v6946_v55  ;;  %6522 = vmatprep.subr.mxu1 %v6807_v46 }
 0xd34   :  { %v3413_v57 = vcombine.low %v7580_v19, %v7583_v4  ;;  %v3667_v21 = vcombine.low %v3648_v10, %v3664_v51  ;;  %v3431_v5 = vcombine.low %v7602_v2, %v3428_v8  ;;  %v3435_v14 = vmul.f32 0.35355338, %v3363_v27 }
 0xd35   :  { %v3702_v20 = vcombine.high %v3676_v60, %v3684_v61  ;;  %v3718_v6 = vcombine.high %v3692_v23, %v3700_v33  ;;  %6520 = vmatmul.mubr.msk.f32.vlgmr.msra.gmra.mxu1 %vm1070_vm2, %v3433_v50  ;;  %v3701_v58 = vcombine.low %v3676_v60, %v3684_v61  ;;  %v3717_v16 = vcombine.low %v3692_v23, %v3700_v33 }
 0xd36   :  { %6523 = vmatpush3.xpose.msk.msra.mxu1 %vm1070_vm2, %v3666_v3  ;;  %6524 = vmatprep.mubr.msk.f32.mxu1 %vm6808_vm1, %v6807_v46  ;;  %v3364_v48 = vcombine.high %v7559_v47, %v3360_v0  ;;  %v3405_v49 = vrot.slane %v3397_v15, %v6957_v63  ;;  %v3421_v19 = vrot.slane %v3413_v57, %v6957_v63  ;;  %v3439_v4 = vmul.f32 0.35355338, %v3431_v5 }
 0xd37   :  { %6527 = vmatprep.subr.mxu1 %v6807_v46  ;;  %v3716_v11 = vrot.slane %v3702_v20, %v6957_v63  ;;  %v3732_v13 = vrot.slane %v3718_v6, %v6957_v63  ;;  %v3668_v22 = vcombine.high %v3648_v10, %v3664_v51  ;;  %v3709_v59 = vrot.slane %v3701_v58, %v6957_v63 }
 0xd38   :  { %v3725_v29 = vrot.slane %v3717_v16, %v6957_v63  ;;  %v3436_v47 = vmul.f32 0.35355338, %v3364_v48  ;;  %v3429_v30 = vcombine.low %v3405_v49, %v3421_v19  ;;  %v3430_v32 = vcombine.high %v3405_v49, %v3421_v19 }
 0xd39   :  { %6525 = vmatmul.mubr.msk.f32.vlgmr.msra.gmra.mxu1 %vm1070_vm2, %v3434_v7  ;;  %v3735_v12 = vcombine.low %v3716_v11, %v3732_v13  ;;  %v3432_v50 = vcombine.high %v7602_v2, %v3428_v8  ;;  %v3736_v53 = vcombine.high %v3716_v11, %v3732_v13 }
 0xd3a   :  { %6528 = vmatpush3.xpose.msk.msra.mxu1 %vm1070_vm2, %v3667_v21  ;;  %6529 = vmatprep.mubr.msk.f32.mxu1 %vm6808_vm1, %v6807_v46  ;;  %v3733_v17 = vcombine.low %v3709_v59, %v3725_v29  ;;  %v3437_v31 = vmul.f32 0.35355338, %v3429_v30  ;;  %v3734_v39 = vcombine.high %v3709_v59, %v3725_v29  ;;  %v3438_v38 = vmul.f32 0.35355338, %v3430_v32 }
 0xd3b   :  { %6548 = vmatpush3.xpose.msk.msra.mxu0 %vm1070_vm2, %v3735_v12  ;;  %6532 = vmatprep.subr.mxu1 %v6807_v46  ;;  %v3440_v0 = vmul.f32 0.35355338, %v3432_v50 }
 0xd3c   :  { %6557 = vmatprep.subr.mxu0 %v6807_v46 }
 0xd3d   :  { %6530 = vmatmul.mubr.msk.f32.vlgmr.msra.gmra.mxu1 %vm1070_vm2, %v3435_v14 }
 0xd3e   :  { %6550 = vmatmul.mubr.msk.f32.vlgmr.msra.gmra.mxu0 %vm1070_vm2, %v3439_v4  ;;  %6533 = vmatpush3.xpose.msk.msra.mxu1 %vm1070_vm2, %v3668_v22 }
 0xd3f   :  { %6534 = vmatprep.mubr.msk.f32.mxu1 %vm6808_vm1, %v6807_v46  ;;  %6537 = vmatprep.subr.mxu1 %v6807_v46 }
 0xd40   :  { %6559 = vmatprep.mubr.msk.f32.mxu0 %vm6808_vm1, %v6807_v46 }
 0xd41   :  { %6535 = vmatmul.mubr.msk.f32.vlgmr.msra.gmra.mxu1 %vm1070_vm2, %v3436_v47 }
 0xd42   :  { %6538 = vmatpush3.xpose.msk.msra.mxu1 %vm1070_vm2, %v3733_v17  ;;  %6539 = vmatprep.mubr.msk.f32.mxu1 %vm6808_vm1, %v6807_v46 }
 0xd43   :  { %6542 = vmatprep.subr.mxu1 %v6807_v46 }
 0xd45   :  { %6540 = vmatmul.mubr.msk.f32.vlgmr.msra.gmra.mxu1 %vm1070_vm2, %v3437_v31 }
 0xd46   :  { %6543 = vmatpush3.xpose.msk.msra.mxu1 %vm1070_vm2, %v3734_v39  ;;  %6544 = vmatprep.mubr.msk.f32.mxu1 %vm6808_vm1, %v6807_v46 }
 0xd47   :  { %6552 = vmatprep.subr.mxu1 %v6807_v46 }
 0xd49   :  { %6545 = vmatmul.mubr.msk.f32.vlgmr.msra.gmra.mxu1 %vm1070_vm2, %v3438_v38 }
 0xd4a   :  { %6553 = vmatpush3.xpose.msk.msra.mxu1 %vm1070_vm2, %v3736_v53  ;;  %6554 = vmatprep.mubr.msk.f32.mxu1 %vm6808_vm1, %v6807_v46 }
 0xd4b   :  { %6562 = vmatprep.subr.mxu1 %v6807_v46 }
 0xd4d   :  { %6555 = vmatmul.mubr.msk.f32.vlgmr.msra.gmra.mxu1 %vm1070_vm2, %v3440_v0 }
 0xd4e   :  { %6564 = vmatprep.mubr.msk.f32.mxu1 %vm6808_vm1, %v6807_v46 }
 0xdf5   :  { %v4105_v60 = vpop.f32.mrf.mxu1 }
 0xdf6   :  { %v4641_v27 = vsel %vm1070_vm2, %v4105_v60, -inf }
 0xdf7   :  { %v6521_v61 = vpop.f32.mrf.mxu1 }
 0xdf9   :  { %v4181_v23 = vpop.f32.mrf.mxu1 }
 0xdfa   :  { %v4644_v2 = vsel %vm1070_vm2, %v4181_v23, -inf }
 0xdfb   :  { %4645 = vmax.xlane.f32.xlu1 %v4644_v2  ;;  %v6526_v33 = vpop.f32.mrf.mxu1 }
 0xdfd   :  { %v4257_v3 = vpop.f32.mrf.mxu1 }
 0xdfe   :  { %v4561_v10 = vpop.f32.mrf.mxu0  ;;  %v4647_v13 = vsel %vm1070_vm2, %v4257_v3, -inf }
 0xdff   :  { %v6531_v51 = vpop.f32.mrf.mxu1  ;;  %v4659_v8 = vsel %vm1070_vm2, %v4561_v10, -inf }
 0xe00   :  { %4660 = vmax.xlane.f32.xlu0 %v4659_v8  ;;  %v6551_v20 = vpop.f32.mrf.mxu0 }
 0xe01   :  { %v4333_v6 = vpop.f32.mrf.mxu1 }
 0xe02   :  { %v4650_v58 = vsel %vm1070_vm2, %v4333_v6, -inf }
 0xe03   :  { %v6536_v7 = vpop.f32.mrf.mxu1 }
 0xe04   :  { %4642 = vmax.xlane.f32.xlu0 %v4641_v27 }
 0xe05   :  { %v4409_v11 = vpop.f32.mrf.mxu1 }
 0xe06   :  { %v4653_v5 = vsel %vm1070_vm2, %v4409_v11, -inf }
 0xe07   :  { %v6541_v15 = vpop.f32.mrf.mxu1 }
 0xe08   :  { %4648 = vmax.xlane.f32.xlu0 %v4647_v13 }
 0xe09   :  { %v7668_v57 = vpop.f32.mrf.mxu1 }
 0xe0b   :  { %v6546_v16 = vpop.f32.mrf.mxu1 }
 0xe0c   :  { %4651 = vmax.xlane.f32.xlu0 %v4650_v58  ;;  %3741 = vrot.lane.b32.xlu1 %v7480_v43, %s6811_s15  ;;  %v4656_v43 = vsel %vm1070_vm2, %v7668_v57, -inf }
 0xe0d   :  { %v7673_v21 = vpop.f32.mrf.mxu1 }
 0xe0e   :  { %v4662_v14 = vsel %vm1070_vm2, %v7673_v21, -inf }
 0xe0f   :  { %v6556_v12 = vpop.f32.mrf.mxu1 }
 0xe10   :  { %4654 = vmax.xlane.f32.xlu0 %v4653_v5  ;;  %3745 = vrot.lane.b32.xlu1 %v7478_v34, %s6811_s15 }
 0xe14   :  { %3749 = vrot.lane.b32.xlu1 %v7486_v35, %s6811_s15 }
 0xe26   :  { %3737 = vrot.lane.b32.xlu0 %v7462_v41, %s6811_s15 }
 0xe2a   :  { %3739 = vrot.lane.b32.xlu0 %v7460_v42, %s6811_s15 }
 0xe38   :  { %4657 = vmax.xlane.f32.xlu1 %v4656_v43 }
 0xe3c   :  { %4663 = vmax.xlane.f32.xlu1 %v4662_v14 }
 0xe4d   :  { %3743 = vrot.lane.b32.xlu1 %v7494_v36, %s6811_s15 }
 0xe84   :  { %v4646_v34 = vpop.xlane.xlu1 %4645 }
 0xe85   :  { %v4666_v48 = vsub.f32 %v4181_v23, %v4646_v34 }
 0xe87   :  { %v4675_v35 = vmul.f32 1.442695, %v4666_v48 }
 0xe88   :  { %v3742_v19 = vpop.permute.xlu1 %3741 }
 0xe89   :  { %6728 = vpow2.f32 %v4675_v35  ;;  %v4661_v49 = vpop.xlane.xlu0 %4660 }
 0xe8a   :  { %v4671_v41 = vsub.f32 %v4561_v10, %v4661_v49 }
 0xe8c   :  { %v4685_v4 = vmul.f32 1.442695, %v4671_v41  ;;  %v3746_v47 = vpop.permute.xlu1 %3745 }
 0xe8d   :  { %v4643_v42 = vpop.xlane.xlu0 %4642 }
 0xe8e   :  { %6730 = vpow2.f32 %v4685_v4  ;;  %v4665_v22 = vsub.f32 %v4105_v60, %v4643_v42 }
 0xe90   :  { %v4673_v59 = vmul.f32 1.442695, %v4665_v22  ;;  %v3750_v38 = vpop.permute.xlu1 %3749 }
 0xe91   :  { %v4649_v29 = vpop.xlane.xlu0 %4648  ;;  %v3777_v23 = vcombine.low %v3742_v19, %v3750_v38  ;;  %v3778_v2 = vcombine.high %v3742_v19, %v3750_v38 }
 0xe92   :  { %6732 = vpow2.f32 %v4673_v59  ;;  %v4667_v30 = vsub.f32 %v4257_v3, %v4649_v29 }
 0xe93   :  { %v3785_v7 = vrot.slane %v3777_v23, %v6946_v55  ;;  %v3792_v27 = vrot.slane %v3778_v2, %v6946_v55 }
 0xe94   :  { %v4677_v17 = vmul.f32 1.442695, %v4667_v30 }
 0xe95   :  { %v4652_v31 = vpop.xlane.xlu0 %4651 }
 0xe96   :  { %v6729_v32 = vpop.eup %6728  ;;  %6734 = vpow2.f32 %v4677_v17  ;;  %v4668_v36 = vsub.f32 %v4333_v6, %v4652_v31 }
 0xe97   :  { %v7692_v39 = vsel %vm7115_vm3, 0.0, %v6729_v32 }
 0xe98   :  { %v4679_v50 = vmul.f32 1.442695, %v4668_v36  ;;  %v4700_v53 = vsel %vm1070_vm2, %v7692_v39, 0.0 }
 0xe99   :  { %v4655_v0 = vpop.xlane.xlu0 %4654  ;;  %4701 = vadd.xlane.f32.xlu1 %v4700_v53 }
 0xe9a   :  { %6736 = vpow2.f32 %v4679_v50  ;;  %v4669_v60 = vsub.f32 %v4409_v11, %v4655_v0 }
 0xe9b   :  { %v6731_v61 = vpop.eup %6730 }
 0xe9c   :  { %v4681_v33 = vmul.f32 1.442695, %v4669_v60  ;;  %v7698_v3 = vsel %vm7115_vm3, 0.0, %v6731_v61 }
 0xe9d   :  { %v3738_v10 = vpop.permute.xlu0 %3737  ;;  %v4715_v51 = vsel %vm1070_vm2, %v7698_v3, 0.0 }
 0xe9e   :  { %6738 = vpow2.f32 %v4681_v33  ;;  %v3761_v8 = vcombine.low %v3738_v10, %v3746_v47  ;;  %v3762_v20 = vcombine.high %v3738_v10, %v3746_v47  ;;  %4716 = vadd.xlane.f32.xlu0 %v4715_v51 }
 0xe9f   :  { %v6733_v6 = vpop.eup %6732 }
 0xea0   :  { %v3769_v11 = vrot.slane %v3761_v8, %v6946_v55  ;;  %v3776_v13 = vrot.slane %v3762_v20, %v6946_v55  ;;  %v7708_v15 = vsel %vm7115_vm3, 0.0, %v6733_v6 }
 0xea1   :  { %v4697_v58 = vsel %vm1070_vm2, %v7708_v15, 0.0 }
 0xea2   :  { %v3793_v16 = vcombine.low %v3769_v11, %v3785_v7  ;;  %v3794_v5 = vcombine.high %v3769_v11, %v3785_v7  ;;  %v3809_v12 = vcombine.low %v3776_v13, %v3792_v27  ;;  %v3810_v43 = vcombine.high %v3776_v13, %v3792_v27  ;;  %4698 = vadd.xlane.f32.xlu0 %v4697_v58 }
 0xea3   :  { %v6735_v14 = vpop.eup %6734 }
 0xea4   :  { %v3801_v34 = vrot.slane %v3793_v16, %v6957_v63  ;;  %v3808_v48 = vrot.slane %v3794_v5, %v6957_v63  ;;  %v3817_v35 = vrot.slane %v3809_v12, %v6957_v63  ;;  %v3824_v49 = vrot.slane %v3810_v43, %v6957_v63 }
 0xea5   :  { %v7718_v41 = vsel %vm7115_vm3, 0.0, %v6735_v14 }
 0xea6   :  { %v3897_v19 = vcombine.low %v3801_v34, %v3808_v48  ;;  %v6176_v4 = vcombine.high %v3801_v34, %v3808_v48  ;;  %v3913_v42 = vcombine.low %v3817_v35, %v3824_v49  ;;  %v6177_v22 = vcombine.high %v3817_v35, %v3824_v49  ;;  %v3740_v48 = vpop.permute.xlu0 %3739 }
 0xea7   :  { %v6737_v59 = vpop.eup %6736  ;;  %v4703_v29 = vsel %vm1070_vm2, %v7718_v41, 0.0 }
 0xea8   :  { %v3904_v47 = vrot.slane %v3897_v19, %v6946_v55  ;;  %v3912_v30 = vrot.slane %v6176_v4, %v6946_v55  ;;  %v3920_v17 = vrot.slane %v3913_v42, %v6946_v55  ;;  %v3928_v31 = vrot.slane %v6177_v22, %v6946_v55  ;;  %4704 = vadd.xlane.f32.xlu0 %v4703_v29 }
 0xea9   :  { %v7728_v32 = vsel %vm7115_vm3, 0.0, %v6737_v59 }
 0xeaa   :  { %v4706_v36 = vsel %vm1070_vm2, %v7728_v32, 0.0  ;;  %v3929_v38 = vcombine.low %v3904_v47, %v3912_v30  ;;  %v3945_v50 = vcombine.low %v3920_v17, %v3928_v31  ;;  %v3930_v53 = vcombine.high %v3904_v47, %v3912_v30 }
 0xeab   :  { %v6739_v0 = vpop.eup %6738  ;;  %4707 = vadd.xlane.f32.xlu1 %v4706_v36  ;;  %v3946_v60 = vcombine.high %v3920_v17, %v3928_v31 }
 0xeac   :  { %v7734_v61 = vsel %vm7115_vm3, 0.0, %v6739_v0  ;;  %v3937_v23 = vrot.slane %v3929_v38, %v6957_v63  ;;  %v3953_v2 = vrot.slane %v3945_v50, %v6957_v63  ;;  %v3944_v33 = vrot.slane %v3930_v53, %v6957_v63 }
 0xead   :  { %v4709_v10 = vsel %vm1070_vm2, %v7734_v61, 0.0  ;;  %v3960_v51 = vrot.slane %v3946_v60, %v6957_v63 }
 0xeae   :  { %4710 = vadd.xlane.f32.xlu0 %v4709_v10  ;;  %v3961_v8 = vcombine.low %v3937_v23, %v3953_v2  ;;  %v3962_v20 = vcombine.high %v3937_v23, %v3953_v2 }
 0xeaf   :  { %v3964_v6 = vcombine.high %v3944_v33, %v3960_v51  ;;  %v3963_v7 = vcombine.low %v3944_v33, %v3960_v51 }
 0xeb0   :  { %6558 = vmatpush3.msra.mxu0 %v3961_v8  ;;  %6563 = vmatpush3.msra.mxu1 %v3962_v20 }
 0xeb1   :  { %6572 = vmatprep.subr.mxu1 %v6807_v46  ;;  %6567 = vmatprep.subr.mxu0 %v6807_v46 }
 0xec1   :  { %v4658_v27 = vpop.xlane.xlu1 %4657 }
 0xec2   :  { %v4670_v11 = vsub.f32 %v7668_v57, %v4658_v27 }
 0xec4   :  { %v4683_v13 = vmul.f32 1.442695, %v4670_v11  ;;  %3747 = vrot.lane.b32.xlu0 %v7492_v40, %s6811_s15 }
 0xec5   :  { %v4664_v58 = vpop.xlane.xlu1 %4663 }
 0xec6   :  { %6740 = vpow2.f32 %v4683_v13  ;;  %v4672_v16 = vsub.f32 %v7673_v21, %v4664_v58 }
 0xec8   :  { %v4687_v5 = vmul.f32 1.442695, %v4672_v16  ;;  %5637 = vrot.lane.b32.xlu0 %v7429_v24, %s6812_s18 }
 0xec9   :  { %v3744_v24 = vpop.permute.xlu1 %3743 }
 0xeca   :  { %6742 = vpow2.f32 %v4687_v5 }
 0xed3   :  { %v6741_v12 = vpop.eup %6740 }
 0xed4   :  { %v7752_v43 = vsel %vm7115_vm3, 0.0, %v6741_v12 }
 0xed5   :  { %v4712_v57 = vsel %vm1070_vm2, %v7752_v43, 0.0 }
 0xed6   :  { %4713 = vadd.xlane.f32.xlu1 %v4712_v57 }
 0xed7   :  { %v6743_v14 = vpop.eup %6742 }
 0xed8   :  { %v7758_v40 = vsel %vm7115_vm3, 0.0, %v6743_v14 }
 0xed9   :  { %v4718_v21 = vsel %vm1070_vm2, %v7758_v40, 0.0 }
 0xeda   :  { %4719 = vadd.xlane.f32.xlu1 %v4718_v21 }
 0xeeb   :  { %3751 = vrot.lane.b32.xlu1 %v7500_v37, %s6811_s15 }
 0xeef   :  { %5635 = vrot.lane.b32.xlu1 %v7434_v9, %s6812_s18 }
 0xef3   :  { %5633 = vrot.lane.b32.xlu1 %v7441_v44, %s6812_s18 }
 0xf22   :  { %v4702_v34 = vpop.xlane.xlu1 %4701 }
 0xf23   :  { %6744 = vrcp.f32 %v4702_v34 }
 0xf27   :  { %v4717_v45 = vpop.xlane.xlu0 %4716 }
 0xf2b   :  { %v4699_v35 = vpop.xlane.xlu0 %4698 }
 0xf2c   :  { %6746 = vrcp.f32 %v4699_v35 }
 0xf30   :  { %v6745_v49 = vpop.eup %6744 }
 0xf31   :  { %v4705_v19 = vpop.xlane.xlu0 %4704  ;;  %v4730_v4 = vmul.f32 %v6745_v49, %v7692_v39 }
 0xf32   :  { %6748 = vrcp.f32 %v4705_v19 }
 0xf33   :  { %6565 = vmatmul.mubr.msk.f32.vlgmr.msra.gmra.mxu1 %vm1070_vm2, %v4730_v4 }
 0xf34   :  { %v4708_v37 = vpop.xlane.xlu1 %4707  ;;  %6573 = vmatpush3.msra.mxu1 %v3964_v6  ;;  %6574 = vmatprep.mubr.msk.f32.mxu1 %vm6808_vm1, %v6807_v46 }
 0xf35   :  { %6750 = vrcp.f32 %v4708_v37  ;;  %6582 = vmatprep.subr.mxu1 %v6807_v46 }
 0xf39   :  { %v6747_v9 = vpop.eup %6746 }
 0xf3a   :  { %v4729_v44 = vmul.f32 %v6747_v9, %v7708_v15  ;;  %v4711_v15 = vpop.xlane.xlu0 %4710 }
 0xf3b   :  { %6752 = vrcp.f32 %v4711_v15 }
 0xf3c   :  { %6560 = vmatmul.mubr.msk.f32.vlgmr.msra.gmra.mxu0 %vm1070_vm2, %v4729_v44 }
 0xf3d   :  { %6568 = vmatpush3.msra.mxu0 %v3963_v7  ;;  %6569 = vmatprep.mubr.msk.f32.mxu0 %vm6808_vm1, %v6807_v46 }
 0xf3e   :  { %6577 = vmatprep.subr.mxu0 %v6807_v46  ;;  %v3748_v47 = vpop.permute.xlu0 %3747 }
 0xf3f   :  { %v6749_v39 = vpop.eup %6748  ;;  %v3829_v17 = vcombine.low %v3740_v48, %v3748_v47  ;;  %v3830_v31 = vcombine.high %v3740_v48, %v3748_v47 }
 0xf40   :  { %v4731_v42 = vmul.f32 %v6749_v39, %v7718_v41 }
 0xf41   :  { %v3844_v50 = vrot.slane %v3830_v31, %v6946_v55 }
 0xf42   :  { %v6751_v22 = vpop.eup %6750  ;;  %6570 = vmatmul.mubr.msk.f32.vlgmr.msra.gmra.mxu0 %vm1070_vm2, %v4731_v42  ;;  %v5638_v15 = vpop.permute.xlu0 %5637 }
 0xf43   :  { %v4732_v59 = vmul.f32 %v6751_v22, %v7728_v32  ;;  %6579 = vmatprep.mubr.msk.f32.mxu0 %vm6808_vm1, %v6807_v46  ;;  %v3837_v32 = vrot.slane %v3829_v17, %v6946_v55 }
 0xf45   :  { %6575 = vmatmul.mubr.msk.f32.vlgmr.msra.gmra.mxu1 %vm1070_vm2, %v4732_v59 }
 0xf46   :  { %6584 = vmatprep.mubr.msk.f32.mxu1 %vm6808_vm1, %v6807_v46 }
 0xf5f   :  { %v4714_v29 = vpop.xlane.xlu1 %4713 }
 0xf60   :  { %6754 = vrcp.f32 %v4714_v29 }
 0xf61   :  { %6756 = vrcp.f32 %v4717_v45 }
 0xf63   :  { %v4720_v30 = vpop.xlane.xlu1 %4719 }
 0xf64   :  { %6758 = vrcp.f32 %v4720_v30 }
 0xf67   :  { %v3752_v41 = vpop.permute.xlu1 %3751 }
 0xf68   :  { %v3845_v36 = vcombine.low %v3744_v24, %v3752_v41  ;;  %v3846_v38 = vcombine.high %v3744_v24, %v3752_v41  ;;  %v6753_v24 = vpop.eup %6752 }
 0xf69   :  { %v4733_v9 = vmul.f32 %v6753_v24, %v7734_v61 }
 0xf6a   :  { %v3853_v53 = vrot.slane %v3845_v36, %v6946_v55  ;;  %v3860_v0 = vrot.slane %v3846_v38, %v6946_v55 }
 0xf6c   :  { %v3861_v60 = vcombine.low %v3837_v32, %v3853_v53  ;;  %v3862_v23 = vcombine.high %v3837_v32, %v3853_v53  ;;  %v3877_v2 = vcombine.low %v3844_v50, %v3860_v0  ;;  %v3878_v33 = vcombine.high %v3844_v50, %v3860_v0 }
 0xf6d   :  { %v6755_v34 = vpop.eup %6754 }
 0xf6e   :  { %v3869_v10 = vrot.slane %v3861_v60, %v6957_v63  ;;  %v3876_v51 = vrot.slane %v3862_v23, %v6957_v63  ;;  %v3885_v8 = vrot.slane %v3877_v2, %v6957_v63  ;;  %v3892_v20 = vrot.slane %v3878_v33, %v6957_v63  ;;  %v6757_v19 = vpop.eup %6756 }
 0xf6f   :  { %v4734_v44 = vmul.f32 %v6755_v34, %v7752_v43  ;;  %v4735_v59 = vmul.f32 %v6757_v19, %v7698_v3  ;;  %v5636_v43 = vpop.permute.xlu1 %5635 }
 0xf70   :  { %v3965_v6 = vcombine.low %v3869_v10, %v3876_v51  ;;  %v6178_v7 = vcombine.high %v3869_v10, %v3876_v51  ;;  %v3981_v27 = vcombine.low %v3885_v8, %v3892_v20  ;;  %v6179_v11 = vcombine.high %v3885_v8, %v3892_v20 }
 0xf71   :  { %v6759_v39 = vpop.eup %6758 }
 0xf72   :  { %v3972_v13 = vrot.slane %v3965_v6, %v6946_v55  ;;  %v3980_v58 = vrot.slane %v6178_v7, %v6946_v55  ;;  %v3988_v16 = vrot.slane %v3981_v27, %v6946_v55  ;;  %v3996_v5 = vrot.slane %v6179_v11, %v6946_v55 }
 0xf73   :  { %v4736_v61 = vmul.f32 %v6759_v39, %v7758_v40  ;;  %v5634_v29 = vpop.permute.xlu1 %5633 }
 0xf74   :  { %v3997_v12 = vcombine.low %v3972_v13, %v3980_v58  ;;  %v4013_v57 = vcombine.low %v3988_v16, %v3996_v5  ;;  %v3998_v14 = vcombine.high %v3972_v13, %v3980_v58  ;;  %v4014_v21 = vcombine.high %v3988_v16, %v3996_v5 }
 0xf76   :  { %v4005_v48 = vrot.slane %v3997_v12, %v6957_v63  ;;  %v4021_v45 = vrot.slane %v4013_v57, %v6957_v63  ;;  %v4012_v35 = vrot.slane %v3998_v14, %v6957_v63  ;;  %v4028_v49 = vrot.slane %v4014_v21, %v6957_v63 }
 0xf78   :  { %v4029_v4 = vcombine.low %v4005_v48, %v4021_v45  ;;  %v4030_v37 = vcombine.high %v4005_v48, %v4021_v45  ;;  %v4031_v42 = vcombine.low %v4012_v35, %v4028_v49  ;;  %v4032_v22 = vcombine.high %v4012_v35, %v4028_v49 }
 0xf7a   :  { %6578 = vmatpush3.msra.mxu0 %v4029_v4  ;;  %6583 = vmatpush3.msra.mxu1 %v4030_v37 }
 0xf7b   :  { %6580 = vmatmul.mubr.msk.f32.vlgmr.msra.gmra.mxu0 %vm1070_vm2, %v4733_v9  ;;  %6585 = vmatmul.mubr.msk.f32.vlgmr.msra.gmra.mxu1 %vm1070_vm2, %v4734_v44 }
 0xf7c   :  { %6587 = vmatprep.subr.mxu0 %v6807_v46  ;;  %6592 = vmatprep.subr.mxu1 %v6807_v46 }
 0xf7d   :  { %6588 = vmatpush3.msra.mxu0 %v4031_v42  ;;  %6593 = vmatpush3.msra.mxu1 %v4032_v22 }
 0xf7e   :  { %6589 = vmatprep.mubr.msk.f32.mxu0 %vm6808_vm1, %v6807_v46  ;;  %6594 = vmatprep.mubr.msk.f32.mxu1 %vm6808_vm1, %v6807_v46 }
 0xf7f   :  { %6590 = vmatmul.mubr.msk.f32.vlgmr.msra.gmra.mxu0 %vm1070_vm2, %v4735_v59  ;;  %6595 = vmatmul.mubr.msk.f32.vlgmr.msra.gmra.mxu1 %vm1070_vm2, %v4736_v61 }
 0xf80   :  { %6597 = vmatprep.subr.mxu0 %v5638_v15 }
 0xf81   :  { %6598 = vmatpush3.msra.mxu0 %v5638_v15 }
 0xf82   :  { %6599 = vmatprep.subr.mxu0 %v5636_v43 }
 0xf83   :  { %6600 = vmatpush3.msra.mxu0 %v5636_v43 }
 0xf84   :  { %6601 = vmatprep.subr.mxu0 %v5634_v29 }
 0xf85   :  { %6602 = vmatpush3.msra.mxu0 %v5634_v29 }
 0xff3   :  { %v4879_v3 = vpop.f32.mrf.mxu1 }
 0xff5   :  { %v6566_v40 = vpop.f32.mrf.mxu1 }
 0xffc   :  { %v4806_v47 = vpop.f32.mrf.mxu0 }
 0xffe   :  { %v6561_v30 = vpop.f32.mrf.mxu0 }
0x1002   :  { %v4952_v17 = vpop.f32.mrf.mxu0 }
0x1003   :  { %v5321_v31 = vcombine.low %v4806_v47, %v4952_v17  ;;  %v5322_v46 = vcombine.high %v4806_v47, %v4952_v17 }
0x1004   :  { %v6571_v41 = vpop.f32.mrf.mxu0 }
0x1005   :  { %v5025_v36 = vpop.f32.mrf.mxu1  ;;  %v5329_v53 = vrot.slane %v5321_v31, %v6946_v55  ;;  %v5336_v0 = vrot.slane %v5322_v46, %v6946_v55 }
0x1006   :  { %v5337_v38 = vcombine.low %v4879_v3, %v5025_v36  ;;  %v5338_v32 = vcombine.high %v4879_v3, %v5025_v36 }
0x1007   :  { %v6576_v50 = vpop.f32.mrf.mxu1 }
0x1008   :  { %v5345_v60 = vrot.slane %v5337_v38, %v6946_v55  ;;  %v5352_v23 = vrot.slane %v5338_v32, %v6946_v55 }
0x100a   :  { %v5353_v2 = vcombine.low %v5329_v53, %v5345_v60  ;;  %v5354_v33 = vcombine.high %v5329_v53, %v5345_v60  ;;  %v5369_v10 = vcombine.low %v5336_v0, %v5352_v23  ;;  %v5370_v51 = vcombine.high %v5336_v0, %v5352_v23 }
0x100c   :  { %v5361_v8 = vrot.slane %v5353_v2, %v6957_v63  ;;  %v5368_v20 = vrot.slane %v5354_v33, %v6957_v63  ;;  %v5377_v6 = vrot.slane %v5369_v10, %v6957_v63  ;;  %v5384_v7 = vrot.slane %v5370_v51, %v6957_v63 }
0x100e   :  { %v5457_v27 = vcombine.low %v5361_v8, %v5368_v20  ;;  %v6204_v11 = vcombine.high %v5361_v8, %v5368_v20  ;;  %v5473_v13 = vcombine.low %v5377_v6, %v5384_v7  ;;  %v6205_v58 = vcombine.high %v5377_v6, %v5384_v7 }
0x1010   :  { %v5464_v16 = vrot.slane %v5457_v27, %v6946_v55  ;;  %v5472_v5 = vrot.slane %v6204_v11, %v6946_v55  ;;  %v5480_v12 = vrot.slane %v5473_v13, %v6946_v55  ;;  %v5488_v57 = vrot.slane %v6205_v58, %v6946_v55 }
0x1012   :  { %v5490_v14 = vcombine.high %v5464_v16, %v5472_v5  ;;  %v5506_v21 = vcombine.high %v5480_v12, %v5488_v57  ;;  %v5489_v24 = vcombine.low %v5464_v16, %v5472_v5  ;;  %v5505_v34 = vcombine.low %v5480_v12, %v5488_v57 }
0x1014   :  { %v5504_v48 = vrot.slane %v5490_v14, %v6957_v63  ;;  %v5520_v45 = vrot.slane %v5506_v21, %v6957_v63  ;;  %v5497_v35 = vrot.slane %v5489_v24, %v6957_v63  ;;  %v5513_v49 = vrot.slane %v5505_v34, %v6957_v63  ;;  %v6779_v24 = vld [vmem:[%s7992_s1 + $0x40] sm:$0xff] }
0x1016   :  { %v5523_v19 = vcombine.low %v5504_v48, %v5520_v45  ;;  %v5522_v4 = vcombine.high %v5497_v35, %v5513_v49  ;;  %v5521_v37 = vcombine.low %v5497_v35, %v5513_v49  ;;  %v5524_v9 = vcombine.high %v5504_v48, %v5520_v45 }
0x1018   :  { %5603 = vrot.lane.b32.xlu1 %v5523_v19, %s6813_s23  ;;  %5595 = vrot.lane.b32.xlu0 %v5522_v4, %s6814_s24 }
0x101c   :  { %5611 = vrot.lane.b32.xlu1 %v5524_v9, %s6815_s25 }
0x103b   :  { %v5098_v44 = vpop.f32.mrf.mxu0  ;;  %v5171_v39 = vpop.f32.mrf.mxu1 }
0x103d   :  { %v6581_v42 = vpop.f32.mrf.mxu0  ;;  %v6586_v22 = vpop.f32.mrf.mxu1 }
0x103f   :  { %v5244_v59 = vpop.f32.mrf.mxu0  ;;  %v5317_v61 = vpop.f32.mrf.mxu1 }
0x1040   :  { %v5389_v43 = vcombine.low %v5098_v44, %v5244_v59  ;;  %v5390_v15 = vcombine.high %v5098_v44, %v5244_v59  ;;  %v5405_v29 = vcombine.low %v5171_v39, %v5317_v61  ;;  %v5406_v3 = vcombine.high %v5171_v39, %v5317_v61 }
0x1041   :  { %v6591_v40 = vpop.f32.mrf.mxu0  ;;  %v6596_v47 = vpop.f32.mrf.mxu1 }
0x1042   :  { %v5397_v30 = vrot.slane %v5389_v43, %v6946_v55  ;;  %v5404_v17 = vrot.slane %v5390_v15, %v6946_v55  ;;  %v5413_v31 = vrot.slane %v5405_v29, %v6946_v55  ;;  %v5420_v46 = vrot.slane %v5406_v3, %v6946_v55 }
0x1044   :  { %v5421_v41 = vcombine.low %v5397_v30, %v5413_v31  ;;  %v5422_v36 = vcombine.high %v5397_v30, %v5413_v31  ;;  %v5437_v38 = vcombine.low %v5404_v17, %v5420_v46  ;;  %v5438_v32 = vcombine.high %v5404_v17, %v5420_v46 }
0x1046   :  { %v5429_v50 = vrot.slane %v5421_v41, %v6957_v63  ;;  %v5436_v53 = vrot.slane %v5422_v36, %v6957_v63  ;;  %v5445_v0 = vrot.slane %v5437_v38, %v6957_v63  ;;  %v5452_v60 = vrot.slane %v5438_v32, %v6957_v63 }
0x1048   :  { %v5525_v23 = vcombine.low %v5429_v50, %v5436_v53  ;;  %v6206_v2 = vcombine.high %v5429_v50, %v5436_v53  ;;  %v5541_v33 = vcombine.low %v5445_v0, %v5452_v60  ;;  %v6207_v10 = vcombine.high %v5445_v0, %v5452_v60  ;;  %v6147_v50 = vld [vmem:[%s7992_s1 + $0x78] sm:$0xff]  ;;  %v6145_v53 = vld [vmem:[%s7992_s1 + $0x68] sm:$0xff] }
0x1049   :  { %6608 = vmatprep.subr.mxu1 %v6147_v50  ;;  %v6143_v0 = vld [vmem:[%s7992_s1 + $0x58] sm:$0xff]  ;;  %v6141_v60 = vld [vmem:[%s7992_s1 + $0x48] sm:$0xff] }
0x104a   :  { %v5532_v51 = vrot.slane %v5525_v23, %v6946_v55  ;;  %v5540_v8 = vrot.slane %v6206_v2, %v6946_v55  ;;  %v5548_v20 = vrot.slane %v5541_v33, %v6946_v55  ;;  %v5556_v6 = vrot.slane %v6207_v10, %v6946_v55  ;;  %6609 = vmatpush3.msra.mxu1 %v6147_v50 }
0x104b   :  { %6610 = vmatprep.subr.mxu1 %v6145_v53 }
0x104c   :  { %v5558_v7 = vcombine.high %v5532_v51, %v5540_v8  ;;  %v5574_v27 = vcombine.high %v5548_v20, %v5556_v6  ;;  %v5557_v11 = vcombine.low %v5532_v51, %v5540_v8  ;;  %v5573_v13 = vcombine.low %v5548_v20, %v5556_v6  ;;  %6611 = vmatpush3.msra.mxu1 %v6145_v53 }
0x104d   :  { %6612 = vmatprep.subr.mxu1 %v6143_v0 }
0x104e   :  { %v5572_v58 = vrot.slane %v5558_v7, %v6957_v63  ;;  %v5588_v16 = vrot.slane %v5574_v27, %v6957_v63  ;;  %v5565_v5 = vrot.slane %v5557_v11, %v6957_v63  ;;  %v5581_v12 = vrot.slane %v5573_v13, %v6957_v63  ;;  %6613 = vmatpush3.msra.mxu1 %v6143_v0 }
0x104f   :  { %6614 = vmatprep.subr.mxu1 %v6141_v60 }
0x1050   :  { %v5592_v57 = vcombine.high %v5572_v58, %v5588_v16  ;;  %v5590_v14 = vcombine.high %v5565_v5, %v5581_v12  ;;  %v5589_v21 = vcombine.low %v5565_v5, %v5581_v12  ;;  %v5591_v55 = vcombine.low %v5572_v58, %v5588_v16  ;;  %6615 = vmatpush3.msra.mxu1 %v6141_v60 }
0x1052   :  { %5613 = vrot.lane.b32.xlu1 %v5592_v57, %s6815_s25  ;;  %5597 = vrot.lane.b32.xlu0 %v5590_v14, %s6814_s24  ;;  %v6161_v57 = vld [vmem:[%s7993_s2 + $0xe8] sm:$0xff]  ;;  %v6160_v14 = vld [vmem:[%s7993_s2 + $0xe0] sm:$0xff] }
0x1056   :  { %5605 = vrot.lane.b32.xlu0 %v5591_v55, %s6813_s23  ;;  %v6158_v55 = vld [vmem:[%s7993_s2 + $0xd0] sm:$0xff] }
0x105a   :  { %5631 = vrot.lane.b32.xlu0 %v6779_v24, %s6812_s18  ;;  %v6157_v24 = vld [vmem:[%s7993_s2 + $0xc8] sm:$0xff] }
0x108a   :  { %v5604_v34 = vpop.permute.xlu1 %5603  ;;  %v5596_v48 = vpop.permute.xlu0 %5595 }
0x108b   :  { %v5617_v63 = vsel %vm1070_vm2, %v5521_v37, %v5596_v48  ;;  %v7869_v37 = vld [vmem:[%s7994_s3 + $0x8] sm:$0xff]  ;;  %v6155_v48 = vld [vmem:[%s7993_s2 + $0xb8] sm:$0xff] }
0x108c   :  { %v5619_v35 = vsel %vm2659_vm4, %v5617_v63, %v5604_v34  ;;  %v5626_v59 = vrot.slane %v7869_v37, %v2667_v18  ;;  %v5755_v20 = vrot.slane %v7869_v37, %v2796_v54  ;;  %v5761_v27 = vrot.slane %v7869_v37, %v2802_v56  ;;  %v6163_v54 = vld [vmem:[%s7993_s2 + $0xf8] sm:$0xff]  ;;  %v6162_v56 = vld [vmem:[%s7993_s2 + $0xf0] sm:$0xff]  ;;  %v6156_v34 = vld [vmem:[%s7993_s2 + $0xc0] sm:$0xff] }
0x108d   :  { %v6154_v63 = vld [vmem:[%s7993_s2 + $0xb0] sm:$0xff]  ;;  %v5872_v0 = vrot.slane %v7869_v37, %v2913_v52 }
0x108e   :  { %v5612_v45 = vpop.permute.xlu1 %5611 }
0x108f   :  { %v5621_v49 = vsel %vm2662_vm5, %v5619_v35, %v5612_v45  ;;  %v6153_v45 = vld [vmem:[%s7993_s2 + $0xa8] sm:$0xff]  ;;  %v6152_v35 = vld [vmem:[%s7993_s2 + $0xa0] sm:$0xff] }
0x1090   :  { %6605 = vmatprep.mubr.msk.f32.mxu0 %vm57_vm0, %v5621_v49  ;;  %v6151_v49 = vld [vmem:[%s7993_s2 + $0x98] sm:$0xff] }
0x10c4   :  { %v5598_v19 = vpop.permute.xlu0 %5597  ;;  %v5614_v42 = vpop.permute.xlu1 %5613 }
0x10c5   :  { %v5618_v9 = vsel %vm1070_vm2, %v5589_v21, %v5598_v19  ;;  %v6159_v21 = vld [vmem:[%s7993_s2 + $0xd8] sm:$0xff]  ;;  %v6150_v19 = vld [vmem:[%s7993_s2 + $0x90] sm:$0xff] }
0x10c8   :  { %v5606_v4 = vpop.permute.xlu0 %5605 }
0x10c9   :  { %v5620_v44 = vsel %vm2659_vm4, %v5618_v9, %v5606_v4  ;;  %v6149_v4 = vld [vmem:[%s7993_s2 + $0x88] sm:$0xff]  ;;  %v6148_v9 = vld [vmem:[%s7993_s2 + $0x80] sm:$0xff] }
0x10ca   :  { %v5622_v22 = vsel %vm2662_vm5, %v5620_v44, %v5614_v42  ;;  %v6210_v44 = vld [vmem:[%s7995_s4 + $0x1] ss:$0 sm:$0xff] }
0x10cc   :  { %v5632_v39 = vpop.permute.xlu0 %5631 }
0x10cd   :  { %6603 = vmatprep.subr.mxu0 %v5632_v39 }
0x10ce   :  { %6604 = vmatpush3.msra.mxu0 %v5632_v39 }
0x10cf   :  { %6606 = vmatmul.mubr.msk.f32.vlgmr.msra.gmra.mxu0 %vm57_vm0, %v5622_v22  ;;  %6619 = vmatprep.subr.mxu0 %v6163_v54 }
0x10d0   :  { %6620 = vmatpush3.msra.mxu0 %v6163_v54 }
0x10d1   :  { %6621 = vmatprep.subr.mxu0 %v6162_v56 }
0x10d2   :  { %6622 = vmatpush3.msra.mxu0 %v6162_v56 }
0x10d3   :  { %6623 = vmatprep.subr.mxu0 %v6161_v57 }
0x10d4   :  { %6624 = vmatpush3.msra.mxu0 %v6161_v57 }
0x10d5   :  { %6625 = vmatprep.subr.mxu0 %v6160_v14 }
0x10d6   :  { %6626 = vmatpush3.msra.mxu0 %v6160_v14 }
0x10d7   :  { %6627 = vmatprep.subr.mxu0 %v6159_v21 }
0x10d8   :  { %6628 = vmatpush3.msra.mxu0 %v6159_v21 }
0x10d9   :  { %6629 = vmatprep.subr.mxu0 %v6158_v55 }
0x10da   :  { %6630 = vmatpush3.msra.mxu0 %v6158_v55 }
0x10db   :  { %6631 = vmatprep.subr.mxu0 %v6157_v24 }
0x10dc   :  { %6632 = vmatpush3.msra.mxu0 %v6157_v24  ;;  %v6213_v24 = vld [vmem:[%s7994_s3 + $0x10] sm:$0xff] }
0x10dd   :  { %6633 = vmatprep.subr.mxu0 %v6156_v34 }
0x10de   :  { %6634 = vmatpush3.msra.mxu0 %v6156_v34 }
0x10df   :  { %6635 = vmatprep.subr.mxu0 %v6155_v48 }
0x10e0   :  { %6636 = vmatpush3.msra.mxu0 %v6155_v48  ;;  %v5981_v48 = vrot.slane %v6213_v24, %v6879_v26 }
0x10e1   :  { %6637 = vmatprep.subr.mxu0 %v6154_v63 }
0x10e2   :  { %6638 = vmatpush3.msra.mxu0 %v6154_v63 }
0x10e3   :  { %6639 = vmatprep.subr.mxu0 %v6153_v45 }
0x10e4   :  { %6640 = vmatpush3.msra.mxu0 %v6153_v45 }
0x10e5   :  { %6641 = vmatprep.subr.mxu0 %v6152_v35 }
0x10e6   :  { %6642 = vmatpush3.msra.mxu0 %v6152_v35 }
0x10e7   :  { %6643 = vmatprep.subr.mxu0 %v6151_v49 }
0x10e8   :  { %6644 = vmatpush3.msra.mxu0 %v6151_v49 }
0x10e9   :  { %6645 = vmatprep.subr.mxu0 %v6150_v19 }
0x10ea   :  { %6646 = vmatpush3.msra.mxu0 %v6150_v19  ;;  %v5987_v19 = vrot.slane %v6213_v24, %v6885_v28 }
0x10eb   :  { %6647 = vmatprep.subr.mxu0 %v6149_v4 }
0x10ec   :  { %6648 = vmatpush3.msra.mxu0 %v6149_v4 }
0x10ed   :  { %6649 = vmatprep.subr.mxu0 %v6148_v9 }
0x10ee   :  { %6650 = vmatpush3.msra.mxu0 %v6148_v9 }
0x118f   :  { %v6607_v61 = vpop.f32.mrf.mxu0 }
0x1190   :  { %v5721_v43 = vadd.f32 %v6607_v61, %v5626_v59 }
0x1191   :  { %v5715_v15 = vpop.f32.mrf.mxu0 }
0x1192   :  { %v7875_v29 = vadd.f32 %v5721_v43, %v7413_v62  ;;  %v5716_v3 = vadd.f32 %v5715_v15, %v5626_v59 }
0x1194   :  { %v7878_v40 = vadd.f32 %v5716_v3, %v7416_v1  ;;  %v5729_v47 = vsel %vm57_vm0, %v7875_v29, 0.0 }
0x1195   :  { %5730 = vadd.xlane.f32.xlu1 %v5729_v47 }
0x1196   :  { %v5726_v30 = vsel %vm57_vm0, %v7878_v40, 0.0 }
0x1197   :  { %5727 = vadd.xlane.f32.xlu0 %v5726_v30 }
0x121e   :  { %v5731_v17 = vpop.xlane.xlu1 %5730 }
0x121f   :  { %v5733_v18 = vmul.f32 0.03125, %v5731_v17 }
0x1220   :  { %v5728_v31 = vpop.xlane.xlu0 %5727 }
0x1221   :  { %v5732_v46 = vmul.f32 0.03125, %v5728_v31  ;;  %v5735_v41 = vsub.f32 %v7875_v29, %v5733_v18 }
0x1223   :  { %v5734_v62 = vsub.f32 %v7878_v40, %v5732_v46  ;;  %v5737_v38 = vmul.f32 %v5735_v41, %v5735_v41 }
0x1225   :  { %v5736_v36 = vmul.f32 %v5734_v62, %v5734_v62  ;;  %v5741_v32 = vsel %vm57_vm0, %v5737_v38, 0.0 }
0x1227   :  { %v5738_v1 = vsel %vm57_vm0, %v5736_v36, 0.0 }
0x1228   :  { %5739 = vadd.xlane.f32.xlu0 %v5738_v1 }
0x122c   :  { %5742 = vadd.xlane.f32.xlu0 %v5741_v32 }
0x12b1   :  { %v5740_v23 = vpop.xlane.xlu0 %5739 }
0x12b2   :  { %v5744_v2 = vmul.f32 0.03125, %v5740_v23 }
0x12b4   :  { %v5746_v33 = vadd.f32 1e-05, %v5744_v2 }
0x12b5   :  { %v5743_v10 = vpop.xlane.xlu0 %5742 }
0x12b6   :  { %6760 = vrsqrt.f32 %v5746_v33  ;;  %v5745_v51 = vmul.f32 0.03125, %v5743_v10 }
0x12b8   :  { %v5747_v8 = vadd.f32 1e-05, %v5745_v51 }
0x12ba   :  { %6762 = vrsqrt.f32 %v5747_v8 }
0x12c3   :  { %v6761_v6 = vpop.eup %6760 }
0x12c4   :  { %v5750_v7 = vmul.f32 %v6761_v6, %v5734_v62 }
0x12c6   :  { %v5756_v11 = vmul.f32 %v5755_v20, %v5750_v7 }
0x12c7   :  { %v6763_v13 = vpop.eup %6762 }
0x12c8   :  { %v5751_v58 = vmul.f32 %v6763_v13, %v5735_v41  ;;  %v5762_v16 = vadd.f32 %v5761_v27, %v5756_v11 }
0x12ca   :  { %v5757_v5 = vmul.f32 %v5755_v20, %v5751_v58  ;;  %6616 = vmatprep.mubr.msk.f32.mxu1 %vm57_vm0, %v5762_v16  ;;  %v5992_v16 = vld [vmem:[%s7996_s5 + $0x10] sm:$0xff] }
0x12cc   :  { %v5763_v12 = vadd.f32 %v5761_v27, %v5757_v5  ;;  %v5991_v5 = vld [vmem:[%s7996_s5 + $0x8] sm:$0xff] }
0x12ce   :  { %6617 = vmatmul.mubr.msk.f32.vlgmr.msra.gmra.mxu1 %vm57_vm0, %v5763_v12  ;;  %v5990_v12 = vld [vmem:[%s7996_s5] sm:$0xff] }
0x138e   :  { %v6618_v39 = vpop.f32.mrf.mxu1 }
0x138f   :  { %v5848_v42 = vadd.f32 %v6618_v39, %v6210_v44 }
0x1390   :  { %v5842_v22 = vpop.f32.mrf.mxu1 }
0x1391   :  { %v5854_v59 = vmul.f32 0.044715, %v5848_v42  ;;  %v5843_v61 = vadd.f32 %v6210_v44, %v5842_v22  ;;  %v5852_v32 = vmul.f32 0.5, %v5848_v42 }
0x1393   :  { %v5856_v43 = vmul.f32 %v5854_v59, %v5848_v42  ;;  %v5853_v15 = vmul.f32 0.044715, %v5843_v61  ;;  %v5851_v1 = vmul.f32 0.5, %v5843_v61 }
0x1395   :  { %v5858_v3 = vmul.f32 %v5856_v43, %v5848_v42  ;;  %v5855_v47 = vmul.f32 %v5853_v15, %v5843_v61 }
0x1397   :  { %v5860_v30 = vadd.f32 %v5858_v3, %v5848_v42  ;;  %v5857_v17 = vmul.f32 %v5855_v47, %v5843_v61 }
0x1399   :  { %v5859_v18 = vadd.f32 %v5857_v17, %v5843_v61  ;;  %v5862_v31 = vmul.f32 0.7978846, %v5860_v30 }
0x139b   :  { %v5861_v46 = vmul.f32 0.7978846, %v5859_v18  ;;  %6764 = vtanh.f32 %v5862_v31 }
0x139d   :  { %6766 = vtanh.f32 %v5861_v46 }
0x13a8   :  { %v6765_v41 = vpop.eup %6764 }
0x13a9   :  { %v5866_v36 = vadd.f32 1.0, %v6765_v41 }
0x13aa   :  { %v6767_v62 = vpop.eup %6766 }
0x13ab   :  { %v5865_v38 = vadd.f32 1.0, %v6767_v62  ;;  %v5868_v53 = vmul.f32 %v5866_v36, %v5852_v32 }
0x13ad   :  { %v5867_v50 = vmul.f32 %v5865_v38, %v5851_v1 }
0x13af   :  { %6651 = vmatprep.mubr.f32.mxu0 %v5867_v50 }
0x13b0   :  { %6652 = vmatmul.mubr.f32.vlgmr.msra.gmra.mxu0 %v5868_v53 }
0x1470   :  { %v6653_v60 = vpop.f32.mrf.mxu0 }
0x1471   :  { %v5945_v23 = vadd.f32 %v6653_v60, %v5872_v0 }
0x1472   :  { %v5939_v2 = vpop.f32.mrf.mxu0 }
0x1473   :  { %v5949_v33 = vadd.f32 %v5945_v23, %v7875_v29  ;;  %v5940_v10 = vadd.f32 %v5939_v2, %v5872_v0 }
0x1475   :  { %v5948_v51 = vadd.f32 %v5940_v10, %v7878_v40  ;;  %v5955_v8 = vsel %vm57_vm0, %v5949_v33, 0.0  ;;  %v5993_v40 = vld [vmem:[%s7996_s5 + $0x18] sm:$0xff]  ;;  %s6816_s5 = smov [#allocation2]  }
0x1476   :  { %5956 = vadd.xlane.f32.xlu1 %v5955_v8  ;;  %6654 = vmatprep.subr.mxu1 %v5993_v40  ;;  %s6082_s15 = sshll.u32 %s6816_s5, 4  ;;  %s6083_s15 = int_to_ptr.vmem [resolvable:$true] %s6082_s15 }
0x1477   :  { %v5952_v20 = vsel %vm57_vm0, %v5948_v51, 0.0  ;;  %6655 = vmatpush3.msra.mxu1 %v5993_v40  ;;  %s6781_s3 = scalar_lea.vmem %s6083_s15, 256  ;;  %p6786_p1 = scmp.lt.s32.totalorder %s6083_s15, %s6083_s15 }
0x1478   :  { %5953 = vadd.xlane.f32.xlu0 %v5952_v20  ;;  %6656 = vmatprep.subr.mxu1 %v5992_v16  ;;  %p6782_p0 = scmp.ne.s32.totalorder %s6083_s15, %s6781_s3  ;;  %p6787_p2 = scmp.lt.s32.totalorder %s6781_s3, %s6781_s3 }
0x1479   :  { %6657 = vmatpush3.msra.mxu1 %v5992_v16 }
0x147a   :  { %6658 = vmatprep.subr.mxu1 %v5991_v5  ;;  %p6788_p3 = por %p6787_p2, %p6786_p1 }
0x147b   :  { %6659 = vmatpush3.msra.mxu1 %v5991_v5 }
0x147c   :  { %6660 = vmatprep.subr.mxu1 %v5990_v12  ;;  %p6789_p4 = pnand %p6788_p3, %p6782_p0 }
0x147d   :  { %6661 = vmatpush3.msra.mxu1 %v5990_v12 }
0x14ff   :  { %v5957_v6 = vpop.xlane.xlu1 %5956 }
0x1500   :  { %v5959_v7 = vmul.f32 0.03125, %v5957_v6 }
0x1501   :  { %v5954_v27 = vpop.xlane.xlu0 %5953 }
0x1502   :  { %v5961_v25 = vsub.f32 %v5949_v33, %v5959_v7  ;;  %v5958_v11 = vmul.f32 0.03125, %v5954_v27 }
0x1504   :  { %v5960_v52 = vsub.f32 %v5948_v51, %v5958_v11  ;;  %v5963_v37 = vmul.f32 %v5961_v25, %v5961_v25 }
0x1506   :  { %v5967_v13 = vsel %vm57_vm0, %v5963_v37, 0.0  ;;  %v5962_v58 = vmul.f32 %v5960_v52, %v5960_v52 }
0x1507   :  { %5968 = vadd.xlane.f32.xlu1 %v5967_v13 }
0x1508   :  { %v5964_v29 = vsel %vm57_vm0, %v5962_v58, 0.0 }
0x1509   :  { %5965 = vadd.xlane.f32.xlu0 %v5964_v29 }
0x1590   :  { %v5969_v54 = vpop.xlane.xlu1 %5968 }
0x1591   :  { %v5971_v56 = vmul.f32 0.03125, %v5969_v54 }
0x1592   :  { %v5966_v57 = vpop.xlane.xlu0 %5965 }
0x1593   :  { %v5973_v14 = vadd.f32 1e-05, %v5971_v56  ;;  %v5970_v21 = vmul.f32 0.03125, %v5966_v57 }
0x1595   :  { %6768 = vrsqrt.f32 %v5973_v14  ;;  %v5972_v55 = vadd.f32 1e-05, %v5970_v21 }
0x1597   :  { %6770 = vrsqrt.f32 %v5972_v55 }
0x15a2   :  { %v6769_v34 = vpop.eup %6768 }
0x15a3   :  { %v5977_v63 = vmul.f32 %v6769_v34, %v5961_v25 }
0x15a4   :  { %v6771_v45 = vpop.eup %6770 }
0x15a5   :  { %v5976_v35 = vmul.f32 %v6771_v45, %v5960_v52  ;;  %v5983_v49 = vmul.f32 %v5981_v48, %v5977_v63 }
0x15a7   :  { %v5982_v4 = vmul.f32 %v5981_v48, %v5976_v35  ;;  %v5989_v44 = vadd.f32 %v5987_v19, %v5983_v49 }
0x15a9   :  { %v5988_v9 = vadd.f32 %v5987_v19, %v5982_v4 }
0x15ab   :  { %6662 = vmatprep.mubr.msk.f32.mxu1 %vm57_vm0, %v5988_v9 }
0x15ac   :  { %6663 = vmatmul.mubr.msk.f32.vlgmr.msra.gmra.mxu1 %vm57_vm0, %v5989_v44 }
0x166c   :  { %v6664_v39 = vpop.f32.mrf.mxu1 }
0x166d   :  { %6076 = vst [vmem:[#allocation2 + $0x8] sm:$0xff] %v6664_v39 }
0x166e   :  { %v6066_v42 = vpop.f32.mrf.mxu1 }
0x166f   :  { %6075 = vst [vmem:[#allocation2] sm:$0xff] %v6066_v42 }
0x1670   :  { %6792 = shalt.err (!%p6789_p4)
}
0x1671   :  { %s6817_s18 = smov 128  }
0x1672   :  { %6088 = dma.vmem_to_hbm [thread:$0]  %s6083_s15, 256, %s7997_s6, [#allocation3], %s6817_s18, %s6817_s18, %s6814_s24  }
0x1673   :  { %6801 = dma.done.wait [#allocation3], 256  }
0x1674   :  { %6802 = vsyncadd [#allocation3], 4294967040 }
0x1675   :  { %6092 = vsyncpa [#allocation3], 1 }

</bundles_post_ra>
